<compile_context>
chip_gen: v5e
topology: v5e:2x2
jax: 0.10.0
libtpu: 0.0.40
codegen_flags: <defaults>
</compile_context>

<pallas_src>
import numpy as np
import jax
import jax.numpy as jnp
from jax.experimental import pallas as pl
from jax.experimental.pallas import tpu as pltpu

VMEM_SPEC = pl.BlockSpec(memory_space=pltpu.MemorySpace.VMEM)

HIDDEN = 256      # hidden_size0
EMBED = 200
OUT_DIM = 738     # 'ms' branch
OUT_PAD = 768     # lane-padded head width
CTX_DIM = 150     # attention context width (662 - 512)
CTX_PAD = 256     # lane-padded context width
COMB_DIM = 685    # 662 + 15 + 8
COMB_PAD = 768    # lane-padded head input width


# --------------------------- in-kernel helpers ------------------------------

def _gelu(x):
    # tanh-approximation GELU (~5 VALU ops + 1 EUP tanh; matches torch GELU ~1e-3)
    c = 0.7978845608028654
    return 0.5 * x * (1.0 + jnp.tanh(c * (x + 0.044715 * x * x * x)))


def _layernorm(x, g, b, eps=1e-5):
    mu = jnp.mean(x, axis=-1, keepdims=True)
    var = jnp.mean(jnp.square(x - mu), axis=-1, keepdims=True)
    return (x - mu) * jax.lax.rsqrt(var + eps) * g + b


# ----------------------------- Pallas kernels ------------------------------

def _matmul_bias_kernel(x_ref, w_ref, b_ref, o_ref):
    # f32 activation cast to bf16 in-kernel; bf16 weight; f32 accumulation + bias.
    o_ref[...] = (jnp.dot(x_ref[...].astype(jnp.bfloat16), w_ref[...],
                          preferred_element_type=jnp.float32) + b_ref[...])


def big_dense(x_f32, w_bf16, b_f32):
    M = x_f32.shape[0]
    N = w_bf16.shape[1]
    return pl.pallas_call(
        _matmul_bias_kernel,
        out_shape=jax.ShapeDtypeStruct((M, N), jnp.float32),
        in_specs=[VMEM_SPEC, VMEM_SPEC, VMEM_SPEC],
        out_specs=VMEM_SPEC,
    )(x_f32, w_bf16, b_f32)


def _conv_ln_gelu_kernel(p_ref, w_ref, g_ref, b_ref, o_ref):
    acc = jnp.dot(p_ref[...].astype(jnp.bfloat16), w_ref[...],
                  preferred_element_type=jnp.float32)
    o_ref[...] = _gelu(_layernorm(acc, g_ref[...], b_ref[...]))


def conv_ln_gelu(x_emb, conv_wf_bf16, ln_g, ln_b):
    """Conv1d(200,512,k=5,s=2,p=1,bias=False) + LayerNorm(512) + GELU, fused.

    im2col patches are built with plain slices/reshape (no gather); the patch
    K dim is zero-padded 1000 -> 1024 (weight rows padded to match)."""
    B, L, C = x_emb.shape
    K, stride, pad = 5, 2, 1
    T_out = (L + 2 * pad - K) // stride + 1
    Cout = conv_wf_bf16.shape[1]
    Kpad = conv_wf_bf16.shape[0]                                  # 1024
    need = 2 * (T_out + 2)
    xp = jnp.pad(x_emb, ((0, 0), (pad, need - L - pad), (0, 0)))
    pairs = xp.reshape(B, need // 2, 2 * C)
    patches = jnp.concatenate(
        [pairs[:, 0:T_out], pairs[:, 1:T_out + 1], pairs[:, 2:T_out + 2, :C],
         jnp.zeros((B, T_out, Kpad - K * C), x_emb.dtype)],
        axis=-1)                                                   # (B, T_out, Kpad), (k,c) order
    patches = patches.reshape(B * T_out, Kpad)
    out = pl.pallas_call(
        _conv_ln_gelu_kernel,
        out_shape=jax.ShapeDtypeStruct((B * T_out, Cout), jnp.float32),
        in_specs=[VMEM_SPEC] * 4,
        out_specs=VMEM_SPEC,
    )(patches, conv_wf_bf16, ln_g.reshape(1, Cout), ln_b.reshape(1, Cout))
    return out.reshape(B, T_out, Cout)


def _lstm_rec_kernel(gx_ref, lens_ref, whh_ref, y_ref):
    """Whole fwd+rev LSTM time recurrence in one kernel invocation (time-blocked)."""
    T = gx_ref.shape[0]
    H = y_ref.shape[-1]
    B = y_ref.shape[2]
    lens = lens_ref[...]                                  # (B, H) int32, lane-dense lengths

    def step(t, carry):
        hf, cf, hr, cr = carry
        m = (lens > t).astype(jnp.float32)                # (B, H) valid-step mask
        nxt = []
        for d, h, c in ((0, hf, cf), (1, hr, cr)):
            gates = gx_ref[t, d] + jnp.dot(h.astype(jnp.bfloat16), whh_ref[d],
                                           preferred_element_type=jnp.float32)  # (B, 4H)
            i = jax.nn.sigmoid(gates[:, 0:H])
            f = jax.nn.sigmoid(gates[:, H:2 * H])
            g = jnp.tanh(gates[:, 2 * H:3 * H])
            o = jax.nn.sigmoid(gates[:, 3 * H:4 * H])
            c_new = f * c + i * g
            h_new = o * jnp.tanh(c_new)
            y_ref[t, d] = m * h_new                       # padded steps -> 0 (pad_packed)
            nxt.append(m * h_new + (1.0 - m) * h)
            nxt.append(m * c_new + (1.0 - m) * c)
        return tuple(nxt)

    z = jnp.zeros((B, H), jnp.float32)
    jax.lax.fori_loop(0, T, step, (z, z, z, z), unroll=True)


def lstm_recurrence(gx, lens_bc, whh_st):
    T, _, B, G = gx.shape
    H = G // 4
    return pl.pallas_call(
        _lstm_rec_kernel,
        out_shape=jax.ShapeDtypeStruct((T, 2, B, H), jnp.float32),
        in_specs=[VMEM_SPEC] * 3,
        out_specs=VMEM_SPEC,
    )(gx, lens_bc, whh_st)


def _attn_ln_pool_kernel(lens_ref, h_ref, wv_ref, gc_ref, bc_ref, gh_ref, bh_ref,
                         pc_ref, ph_ref):
    """Self-attention + [ctx|h] LayerNorm(662) + length-masked mean pool, per batch row."""
    h = h_ref[0]                                           # (T, D) f32
    T, D = h.shape
    E = wv_ref.shape[1]                                    # padded ctx width (256)
    b = pl.program_id(0)
    ln_i = lens_ref[b]
    lenf = jnp.maximum(ln_i.astype(jnp.float32), 1.0)      # guard divide-by-zero
    kmask = (jax.lax.broadcasted_iota(jnp.int32, (1, T), 1) < ln_i).astype(jnp.float32)
    qmask = (jax.lax.broadcasted_iota(jnp.int32, (T, 1), 0) < ln_i).astype(jnp.float32)
    cvalid = (jax.lax.broadcasted_iota(jnp.int32, (1, E), 1) < CTX_DIM).astype(jnp.float32)

    # Scaled dot-product self-attention (stand-in for external Atten.compute_context).
    hb = h.astype(jnp.bfloat16)
    scores = jnp.einsum('td,sd->ts', hb, hb,
                        preferred_element_type=jnp.float32) * (1.0 / float(np.sqrt(D)))
    scores = scores + (kmask - 1.0) * 1e30                 # mask padded keys
    mx = jnp.max(scores, axis=-1, keepdims=True)
    e = jnp.exp(scores - mx)
    attn = e * pl.reciprocal(jnp.sum(e, axis=-1, keepdims=True), approx=True)
    v = jnp.dot(hb, wv_ref[...], preferred_element_type=jnp.float32)        # (T, E)
    ctx = jnp.dot(attn.astype(jnp.bfloat16), v.astype(jnp.bfloat16),
                  preferred_element_type=jnp.float32)                        # (T, E)

    # LayerNorm(662) over concat([ctx(:150) | h(512)]) without materializing the concat.
    # Padded ctx columns are exactly 0 (zero weight columns), so sums are exact.
    n = float(CTX_DIM + D)
    mu = (jnp.sum(ctx, axis=-1, keepdims=True)
          + jnp.sum(h, axis=-1, keepdims=True)) / n
    dc = (ctx - mu) * cvalid
    dh = h - mu
    var = (jnp.sum(dc * dc, axis=-1, keepdims=True)
           + jnp.sum(dh * dh, axis=-1, keepdims=True)) / n
    inv = jax.lax.rsqrt(var + 1e-5)
    yc = dc * inv * gc_ref[...] + bc_ref[...]              # padded cols: gamma=beta=0 -> 0
    yh = dh * inv * gh_ref[...] + bh_ref[...]

    # Length-masked mean pooling over valid query rows (CustomAveragePooling).
    pc_ref[0] = jnp.sum(yc * qmask, axis=0, keepdims=True) / lenf
    ph_ref[0] = jnp.sum(yh * qmask, axis=0, keepdims=True) / lenf


def attn_ln_pool(h, lens_i32, wv, gc, bc, gh, bh):
    B, T, D = h.shape
    E = wv.shape[1]
    pc, ph = pl.pallas_call(
        _attn_ln_pool_kernel,
        out_shape=(jax.ShapeDtypeStruct((B, 1, E), jnp.float32),
                   jax.ShapeDtypeStruct((B, 1, D), jnp.float32)),
        grid_spec=pltpu.PrefetchScalarGridSpec(
            num_scalar_prefetch=1,
            grid=(B,),
            in_specs=[pl.BlockSpec((1, T, D), lambda b, lens: (b, 0, 0)),
                      pl.BlockSpec((D, E), lambda b, lens: (0, 0)),
                      pl.BlockSpec((1, E), lambda b, lens: (0, 0)),
                      pl.BlockSpec((1, E), lambda b, lens: (0, 0)),
                      pl.BlockSpec((1, D), lambda b, lens: (0, 0)),
                      pl.BlockSpec((1, D), lambda b, lens: (0, 0))],
            out_specs=[pl.BlockSpec((1, 1, E), lambda b, lens: (b, 0, 0)),
                       pl.BlockSpec((1, 1, D), lambda b, lens: (b, 0, 0))],
        ),
        compiler_params=pltpu.CompilerParams(dimension_semantics=("parallel",)),
    )(lens_i32, h, wv, gc, bc, gh, bh)
    return pc[:, 0, :], ph[:, 0, :]


def _head_kernel(x_ref, w1_ref, b1_ref, g3_ref, b3_ref,
                 w2_ref, b2_ref, g4_ref, b4_ref, ln_ref, ln2_ref):
    nv = float(OUT_DIM)
    vmask = (jax.lax.broadcasted_iota(jnp.int32, (1, OUT_PAD), 1)
             < OUT_DIM).astype(jnp.float32)

    def mln(x, g, b):
        # Exact LayerNorm(738) on a lane-padded (*, 768) tensor whose padded cols are 0.
        mu = jnp.sum(x, axis=-1, keepdims=True) / nv
        d = (x - mu) * vmask
        var = jnp.sum(d * d, axis=-1, keepdims=True) / nv
        return d * jax.lax.rsqrt(var + 1e-5) * g + b       # padded gamma=beta=0 -> 0

    h1 = jnp.dot(x_ref[...].astype(jnp.bfloat16), w1_ref[...],
                 preferred_element_type=jnp.float32) + b1_ref[...]
    h1 = _gelu(mln(h1, g3_ref[...], b3_ref[...]))
    h2 = jnp.dot(h1.astype(jnp.bfloat16), w2_ref[...],
                 preferred_element_type=jnp.float32) + b2_ref[...]
    h2 = _gelu(mln(h2, g4_ref[...], b4_ref[...]))
    ln_ref[...] = h1
    ln2_ref[...] = h2


def head(combined_pad, p):
    B = combined_pad.shape[0]
    return pl.pallas_call(
        _head_kernel,
        out_shape=(jax.ShapeDtypeStruct((B, OUT_PAD), jnp.float32),
                   jax.ShapeDtypeStruct((B, OUT_PAD), jnp.float32)),
        in_specs=[VMEM_SPEC] * 9,
        out_specs=(VMEM_SPEC, VMEM_SPEC),
    )(combined_pad,
      p['lin1_w'], p['lin1_b'], p['ln3_g'], p['ln3_b'],
      p['lin2_w'], p['lin2_b'], p['ln4_g'], p['ln4_b'])


# ----------------------------- Glue (plain JAX) -----------------------------

def make_reverse_index(lengths_np, T):
    B = len(lengths_np)
    idx = np.tile(np.arange(T)[None, :], (B, 1))
    for b in range(B):
        Lb = int(min(int(lengths_np[b]), T))
        idx[b, :Lb] = Lb - 1 - np.arange(Lb)
    return idx.astype(np.int32)


def max_pooling_downsample(tensor, lx):
    """Vectorized port of myModel.max_pooling_downsample (host lengths)."""
    B, T, N = tensor.shape
    target = T // 2
    lx = np.asarray(lx).astype(np.int64).copy()
    idx_a = np.zeros((B, target), np.int32)
    idx_b = np.zeros((B, target), np.int32)
    for i in range(B):
        rl = int(lx[i])
        if rl > target:
            n_pool = rl - target
            j = np.arange(target)
            a = np.where(j < n_pool, 2 * j, n_pool + j)
            b = np.where(j < n_pool, 2 * j + 1, a)
            idx_a[i], idx_b[i] = a, b
            lx[i] = target
        else:
            idx_a[i] = np.arange(target)
            idx_b[i] = np.arange(target)
    ia = jnp.asarray(idx_a)[:, :, None]
    ib = jnp.asarray(idx_b)[:, :, None]
    out = jnp.maximum(jnp.take_along_axis(tensor, ia, axis=1),
                      jnp.take_along_axis(tensor, ib, axis=1))
    return out, lx


def fused_bilstm_single(x, lengths_np, p):
    """One bidirectional LSTM layer with packed-sequence semantics (length masking)."""
    B, T, IN = x.shape
    H = HIDDEN
    rev_idx = jnp.asarray(make_reverse_index(lengths_np, T))[:, :, None]    # (B, T, 1)

    # Hoisted input projection: one big bf16 matmul for both directions.
    g_all = big_dense(x.reshape(B * T, IN), p['wih_cat'], p['b_cat']).reshape(B, T, 8 * H)
    gx_f = g_all[..., :4 * H]
    gx_r = jnp.take_along_axis(g_all[..., 4 * H:], rev_idx, axis=1)         # reversed time order
    gx = jnp.transpose(jnp.stack([gx_f, gx_r], axis=0), (2, 0, 1, 3))       # (T, 2, B, 4H)

    lens_bc = jnp.asarray(np.tile(
        np.minimum(np.asarray(lengths_np, np.int32), T)[:, None], (1, H)))  # (B, H) lane-dense

    y = lstm_recurrence(gx, lens_bc, p['whh_st'])                           # (T, 2, B, H)
    y_f = jnp.transpose(y[:, 0], (1, 0, 2))                                 # (B, T, H)
    y_r = jnp.take_along_axis(jnp.transpose(y[:, 1], (1, 0, 2)), rev_idx, axis=1)
    return jnp.concatenate([y_f, y_r], axis=-1)                             # (B, T, 2H)


def bilstm_2layer(x, lengths_np, params):
    h = fused_bilstm_single(x, lengths_np, params['l0'])
    h = fused_bilstm_single(h, lengths_np, params['l1'])
    return h


def cross_entropy(logits, target):
    logp = jax.nn.log_softmax(logits, axis=-1)
    return -jnp.mean(jnp.take_along_axis(logp, target[:, None], axis=1))


# ----------------------------- Parameters -----------------------------------

def xavier_uniform(key, shape, fan_in, fan_out):
    bound = np.sqrt(6.0 / (fan_in + fan_out))
    return jax.random.uniform(key, shape, jnp.float32, -bound, bound)


def _init_lstm_dir(key, input_size, hidden):
    k1, k2, k3, k4 = jax.random.split(key, 4)
    bound = 1.0 / np.sqrt(hidden)
    wih_t = jax.random.uniform(k1, (input_size, 4 * hidden), jnp.float32, -bound, bound)
    whh_t = jax.random.uniform(k2, (hidden, 4 * hidden), jnp.float32, -bound, bound)
    b = (jax.random.uniform(k3, (4 * hidden,), jnp.float32, -bound, bound)
         + jax.random.uniform(k4, (4 * hidden,), jnp.float32, -bound, bound))
    return wih_t, whh_t, b


def _init_bilstm_layer(key, input_size, hidden):
    kf, kr = jax.random.split(key)
    wih_f, whh_f, b_f = _init_lstm_dir(kf, input_size, hidden)
    wih_r, whh_r, b_r = _init_lstm_dir(kr, input_size, hidden)
    return {
        'wih_cat': jnp.concatenate([wih_f, wih_r], axis=1).astype(jnp.bfloat16),  # (IN, 8H)
        'b_cat': jnp.concatenate([b_f, b_r]).reshape(1, 8 * hidden).astype(jnp.float32),
        'whh_st': jnp.stack([whh_f, whh_r], axis=0).astype(jnp.bfloat16),          # (2, H, 4H)
    }


def init_bilstm_params(key, input_size, hidden):
    k0, k1 = jax.random.split(key)
    return {'l0': _init_bilstm_layer(k0, input_size, hidden),
            'l1': _init_bilstm_layer(k1, 2 * hidden, hidden)}


def _padded_row(v, n_pad):
    out = jnp.zeros((n_pad,), jnp.float32)
    return out.at[:v.shape[0]].set(v).reshape(1, n_pad)


def init_params(key, vocab):
    ks = iter(jax.random.split(key, 16))
    emb = jax.random.normal(next(ks), (vocab, EMBED), jnp.float32) * 0.1
    emb = emb.at[0].set(0.0)                                      # padding_idx=0

    conv_w = xavier_uniform(next(ks), (512, EMBED, 5), EMBED * 5, 512 * 5)
    conv_wf = jnp.transpose(conv_w, (2, 1, 0)).reshape(5 * EMBED, 512)   # (1000, 512), (k,c)
    conv_wf = jnp.pad(conv_wf, ((0, 1024 - 5 * EMBED), (0, 0))).astype(jnp.bfloat16)

    ln2_g = jnp.ones((662,), jnp.float32)
    ln2_b = jnp.zeros((662,), jnp.float32)

    lin1_w = jnp.zeros((COMB_PAD, OUT_PAD), jnp.float32).at[:COMB_DIM, :OUT_DIM].set(
        xavier_uniform(next(ks), (COMB_DIM, OUT_DIM), COMB_DIM, OUT_DIM))
    lin2_w = jnp.zeros((OUT_PAD, OUT_PAD), jnp.float32).at[:OUT_DIM, :OUT_DIM].set(
        xavier_uniform(next(ks), (OUT_DIM, OUT_DIM), OUT_DIM, OUT_DIM))
    attn_wv = jnp.zeros((512, CTX_PAD), jnp.float32).at[:, :CTX_DIM].set(
        xavier_uniform(next(ks), (512, CTX_DIM), 512, CTX_DIM))

    return {
        'embed': emb,
        'age_emb': jax.random.normal(next(ks), (91, 8), jnp.float32),
        'los_emb': jax.random.normal(next(ks), (88, 15), jnp.float32),
        'conv_wf': conv_wf,
        'ln0_g': jnp.ones((512,), jnp.float32), 'ln0_b': jnp.zeros((512,), jnp.float32),
        # LayerNorm(662) split into ctx part (lane-padded to 256) and hidden part.
        'ln2_gc': _padded_row(ln2_g[:CTX_DIM], CTX_PAD),
        'ln2_bc': _padded_row(ln2_b[:CTX_DIM], CTX_PAD),
        'ln2_gh': ln2_g[CTX_DIM:].reshape(1, 512),
        'ln2_bh': ln2_b[CTX_DIM:].reshape(1, 512),
        'ln3_g': _padded_row(jnp.ones((OUT_DIM,), jnp.float32), OUT_PAD),
        'ln3_b': _padded_row(jnp.zeros((OUT_DIM,), jnp.float32), OUT_PAD),
        'ln4_g': _padded_row(jnp.ones((OUT_DIM,), jnp.float32), OUT_PAD),
        'ln4_b': _padded_row(jnp.zeros((OUT_DIM,), jnp.float32), OUT_PAD),
        'lin1_w': lin1_w.astype(jnp.bfloat16),
        'lin1_b': jnp.zeros((1, OUT_PAD), jnp.float32),
        'lin2_w': lin2_w.astype(jnp.bfloat16),
        'lin2_b': jnp.zeros((1, OUT_PAD), jnp.float32),
        'attn_wv': attn_wv.astype(jnp.bfloat16),
        'lstm': [init_bilstm_params(next(ks), 4 * HIDDEN, HIDDEN),
                 init_bilstm_params(next(ks), 4 * HIDDEN, HIDDEN)],
    }


# ----------------------------- Forward ---------------------------------------

def forward(params, criterion1, x, lx, age, los, target, cnt):
    # All nn.Dropout layers are identity in eval mode.
    x_emb = params['embed'][x]                               # (B, L, 200)
    age_embed = params['age_emb'][age][:, 0, :]              # (B, 8)
    los_embed = params['los_emb'][los][:, 0, :]              # (B, 15)

    # conv1 + layer_norm0 + gelu (one fused kernel)
    out = conv_ln_gelu(x_emb, params['conv_wf'], params['ln0_g'], params['ln0_b'])

    lx = np.asarray(lx) // 2 - 3
    output, lx = max_pooling_downsample(out, lx)

    for i in range(2):
        # (training-only locked dropout skipped: eval mode)
        lx = lx // 2
        B, T, Fdim = output.shape
        T = T // 2 * 2
        output = output[:, :T, :].reshape(B, T // 2, Fdim * 2)
        output = bilstm_2layer(output, lx, params['lstm'][i])
        output = output[:, :int(np.max(lx)), :]              # pad_packed truncation

    B = output.shape[0]
    lens_i32 = jnp.asarray(np.asarray(lx, dtype=np.int32))

    # attention + concat + LayerNorm2 + masked mean pool, fused per batch row.
    # TODO(synk): original code torch.save's attn_weights ('tensor.pt'); no file I/O here.
    pooled_ctx, pooled_h = attn_ln_pool(
        output, lens_i32, params['attn_wv'], params['ln2_gc'], params['ln2_bc'],
        params['ln2_gh'], params['ln2_bh'])

    combined = jnp.concatenate(
        [pooled_ctx[:, :CTX_DIM], pooled_h, los_embed, age_embed,
         jnp.zeros((B, COMB_PAD - COMB_DIM), jnp.float32)], axis=1)   # (B, 768) lane-padded

    ln_p, ln2_p = head(combined, params)                     # lin1+LN3+GELU+lin2+LN4+GELU fused
    ln = ln_p[:, :OUT_DIM]
    logit = ln2_p[:, :OUT_DIM]

    loss1 = 0.3 * criterion1(ln, target)
    loss = cross_entropy(logit, target)
    return logit, loss, loss1, cnt


# ----------------------------- Main ------------------------------------------

if __name__ == "__main__":
    key = jax.random.PRNGKey(0)
    kp, kx, ka, kl, kt = jax.random.split(key, 5)

    B, L, vocab = 2, 69, 50
    params = init_params(kp, vocab)

    x = jax.random.randint(kx, (B, L), 1, vocab, dtype=jnp.int32)
    lx = np.array([69, 30], dtype=np.int64)                   # host lengths (like PyTorch lx on CPU)
    age = jax.random.randint(ka, (B, 1), 0, 91, dtype=jnp.int32)
    los = jax.random.randint(kl, (B, 1), 0, 88, dtype=jnp.int32)
    target = jax.random.randint(kt, (B,), 0, OUT_DIM, dtype=jnp.int32)

    logit, loss, loss1, cnt = forward(params, cross_entropy, x, lx, age, los, target, cnt=0)
    jax.block_until_ready((logit, loss, loss1))
    assert logit.shape == (B, OUT_DIM)
    print("KERNEL_OK")
</pallas_src>

<mosaic_0001>
module attributes {stable_mosaic.version = 11 : i64} {
  func.func @_conv_ln_gelu_kernel(%arg0: memref<68x1024xf32, #tpu.memory_space<vmem>>, %arg1: memref<1024x512xbf16, #tpu.memory_space<vmem>>, %arg2: memref<1x512xf32, #tpu.memory_space<vmem>>, %arg3: memref<1x512xf32, #tpu.memory_space<vmem>>, %arg4: memref<68x512xf32, #tpu.memory_space<vmem>>) attributes {dimension_semantics = [], scalar_prefetch = 0 : i64, scratch_operands = 0 : i64, tpu.core_type = #tpu.core_type<tc>} {
    %c0 = arith.constant 0 : index
    %c0_0 = arith.constant 0 : index
    %0 = vector.load %arg0[%c0, %c0_0] : memref<68x1024xf32, #tpu.memory_space<vmem>>, vector<68x1024xf32>
    %1 = arith.truncf %0 : vector<68x1024xf32> to vector<68x1024xbf16>
    %c0_1 = arith.constant 0 : index
    %c0_2 = arith.constant 0 : index
    %2 = vector.load %arg1[%c0_1, %c0_2] : memref<1024x512xbf16, #tpu.memory_space<vmem>>, vector<1024x512xbf16>
    %cst = arith.constant dense<0.000000e+00> : vector<68x512xf32>
    %3 = tpu.matmul %1, %2, %cst {dimension_numbers = #tpu.dot_dimension_numbers<[1], [0], [0], [1], [0, 0, 1, 1], [], []>} : vector<68x1024xbf16>, vector<1024x512xbf16>, vector<68x512xf32> -> vector<68x512xf32>
    %c0_3 = arith.constant 0 : index
    %c0_4 = arith.constant 0 : index
    %4 = vector.load %arg2[%c0_3, %c0_4] : memref<1x512xf32, #tpu.memory_space<vmem>>, vector<1x512xf32>
    %c0_5 = arith.constant 0 : index
    %c0_6 = arith.constant 0 : index
    %5 = vector.load %arg3[%c0_5, %c0_6] : memref<1x512xf32, #tpu.memory_space<vmem>>, vector<1x512xf32>
    %cst_7 = arith.constant dense<0.000000e+00> : vector<68xf32>
    %6 = vector.multi_reduction <add>, %3, %cst_7 [1] : vector<68x512xf32> to vector<68xf32>
    %7 = vector.shape_cast %6 : vector<68xf32> to vector<68x1xf32>
    %cst_8 = arith.constant 5.120000e+02 : f32
    %8 = vector.broadcast %cst_8 : f32 to vector<68x1xf32>
    %9 = arith.divf %7, %8 : vector<68x1xf32>
    %10 = vector.broadcast %9 : vector<68x1xf32> to vector<68x512xf32>
    %11 = arith.subf %3, %10 : vector<68x512xf32>
    %12 = arith.mulf %11, %11 : vector<68x512xf32>
    %cst_9 = arith.constant dense<0.000000e+00> : vector<68xf32>
    %13 = vector.multi_reduction <add>, %12, %cst_9 [1] : vector<68x512xf32> to vector<68xf32>
    %14 = vector.shape_cast %13 : vector<68xf32> to vector<68x1xf32>
    %cst_10 = arith.constant 5.120000e+02 : f32
    %15 = vector.broadcast %cst_10 : f32 to vector<68x1xf32>
    %16 = arith.divf %14, %15 : vector<68x1xf32>
    %17 = vector.broadcast %9 : vector<68x1xf32> to vector<68x512xf32>
    %18 = arith.subf %3, %17 : vector<68x512xf32>
    %cst_11 = arith.constant 9.99999974E-6 : f32
    %19 = vector.broadcast %cst_11 : f32 to vector<68x1xf32>
    %20 = arith.addf %16, %19 : vector<68x1xf32>
    %21 = math.rsqrt %20 : vector<68x1xf32>
    %22 = vector.broadcast %21 : vector<68x1xf32> to vector<68x512xf32>
    %23 = arith.mulf %18, %22 : vector<68x512xf32>
    %24 = vector.broadcast %4 : vector<1x512xf32> to vector<68x512xf32>
    %25 = arith.mulf %23, %24 : vector<68x512xf32>
    %26 = vector.broadcast %5 : vector<1x512xf32> to vector<68x512xf32>
    %27 = arith.addf %25, %26 : vector<68x512xf32>
    %cst_12 = arith.constant 5.000000e-01 : f32
    %28 = vector.broadcast %cst_12 : f32 to vector<68x512xf32>
    %29 = arith.mulf %28, %27 : vector<68x512xf32>
    %cst_13 = arith.constant 4.471500e-02 : f32
    %30 = vector.broadcast %cst_13 : f32 to vector<68x512xf32>
    %31 = arith.mulf %30, %27 : vector<68x512xf32>
    %32 = arith.mulf %31, %27 : vector<68x512xf32>
    %33 = arith.mulf %32, %27 : vector<68x512xf32>
    %34 = arith.addf %27, %33 : vector<68x512xf32>
    %cst_14 = arith.constant 0.797884583 : f32
    %35 = vector.broadcast %cst_14 : f32 to vector<68x512xf32>
    %36 = arith.mulf %35, %34 : vector<68x512xf32>
    %37 = math.tanh %36 : vector<68x512xf32>
    %cst_15 = arith.constant 1.000000e+00 : f32
    %38 = vector.broadcast %cst_15 : f32 to vector<68x512xf32>
    %39 = arith.addf %38, %37 : vector<68x512xf32>
    %40 = arith.mulf %29, %39 : vector<68x512xf32>
    %c0_16 = arith.constant 0 : index
    %c0_17 = arith.constant 0 : index
    %41 = vector.load %arg4[%c0_16, %c0_17] : memref<68x512xf32, #tpu.memory_space<vmem>>, vector<68x512xf32>
    tpu.vector_store %arg4[%c0_16, %c0_17], %40 {strides = array<i32>} : memref<68x512xf32, #tpu.memory_space<vmem>>, vector<68x512xf32>,
    return
  }
}

</mosaic_0001>

<bundles_post_ra>
// kernel: tpu_custom_call.1
= control target key start
LH: loop header
LB: loop body
LE: loop exit
PB: predicated region body
PF: predicated region fallthrough
CT: control target
= control target key end

     0   :  { %9 = vsyncpa [#allocation3], 0  ;;  %s6251_s0 = inlined_call_operand.hbm [shape: f32[68,1024], index: 0, kind: input, shape index: {}]   ;;  %s6252_s1 = inlined_call_operand.hbm [shape: bf16[1024,512], index: 1, kind: input, shape index: {}]   ;;  %s6253_s2 = inlined_call_operand.hbm [shape: f32[1,512], index: 2, kind: input, shape index: {}]   ;;  %s6254_s3 = inlined_call_operand.hbm [shape: f32[1,512], index: 3, kind: input, shape index: {}]   ;;  %s6255_s4 = inlined_call_operand.hbm [shape: f32[68,512], index: 4, kind: output, shape index: {}]  }
   0x1   :  { %10 = vsyncpa [#allocation6], 0 }
   0x2   :  { %11 = vsyncpa [#allocation9], 0  ;;  %s30_s17 = sshll.u32 %s6252_s1, 4  ;;  %s31_s17 = int_to_ptr.hbm [resolvable:$true] %s30_s17 }
   0x3   :  { %12 = vsyncpa [#allocation4], 0  ;;  %s5097_s18 = smov [#allocation5]   ;;  %s17_s22 = sshll.u32 %s6251_s0, 4  ;;  %s18_s22 = int_to_ptr.hbm [resolvable:$true] %s17_s22 }
   0x4   :  { %s32_s19 = sshll.u32 %s5097_s18, 4  ;;  %s5098_s23 = smov 256   ;;  %s33_s19 = int_to_ptr.vmem [resolvable:$true] %s32_s19 }
   0x5   :  { %s5099_s24 = smov 16   ;;  %s5100_s25 = smov [#allocation2]  }
   0x6   :  { %38 = dma.hbm_to_vmem [thread:$0]  %s31_s17, 32768, %s33_s19, [#allocation6], %s5098_s23, %s5098_s23, %s5099_s24  }
   0x7   :  { %s19_s26 = sshll.u32 %s5100_s25, 4  ;;  %s5101_s27 = smov 1024   ;;  %s20_s26 = int_to_ptr.vmem [resolvable:$true] %s19_s26 }
   0x8   :  { %s5102_s28 = smov 64   ;;  %s44_s30 = sshll.u32 %s6253_s2, 4  ;;  %s45_s30 = int_to_ptr.hbm [resolvable:$true] %s44_s30 }
   0x9   :  { %25 = dma.hbm_to_vmem [thread:$0]  %s18_s22, 9216, %s20_s26, [#allocation3], %s5101_s27, %s5101_s27, %s5102_s28  }
   0xa   :  { %s5103_s5 = smov [#allocation7]   ;;  %s55_s8 = sshll.u32 %s6254_s3, 4  ;;  %s56_s8 = int_to_ptr.hbm [resolvable:$true] %s55_s8 }
   0xb   :  { %s46_s6 = sshll.u32 %s5103_s5, 4  ;;  %s5104_s9 = smov [#allocation8]   ;;  %s47_s6 = int_to_ptr.vmem [resolvable:$true] %s46_s6 }
   0xc   :  { %49 = dma.hbm_to_vmem [thread:$0]  %s45_s30, 64, %s47_s6, [#allocation6]  }
   0xd   :  { %s57_s10 = sshll.u32 %s5104_s9, 4  ;;  %s58_s10 = int_to_ptr.vmem [resolvable:$true] %s57_s10 }
   0xe   :  { %60 = dma.hbm_to_vmem [thread:$0]  %s56_s8, 64, %s58_s10, [#allocation9]  }
   0xf   :  { %5089 = dma.done.wait [#allocation3], 9216  }
  0x10   :  { %5090 = vsyncadd [#allocation3], 4294958080 }
  0x11   :  { %5091 = dma.done.wait [#allocation6], 32832  }
  0x12   :  { %5092 = vsyncadd [#allocation6], 4294934464 }
  0x13   :  { %5093 = dma.done.wait [#allocation9], 64  }
  0x14   :  { %5094 = vsyncadd [#allocation9], 4294967232  ;;  %v3699_v0 = vld [vmem:[#allocation5 + $0xe0] sm:$0xf]  ;;  %v4639_v1 = vld [vmem:[#allocation5 + $0xec] sm:$0xf0] }
  0x15   :  { %v3827_v2 = vld [vmem:[#allocation5 + $0x1e0] sm:$0xf]  ;;  %v3700_v3 = vor.u32 %v4639_v1, %v3699_v0  ;;  %v4671_v4 = vld [vmem:[#allocation5 + $0x1ec] sm:$0xf0]  ;;  %vm2823_vm0 = vcmask 1043456   ;;  %s5106_s2 = smov [#allocation10]  }
  0x16   :  { %v3955_v5 = vld [vmem:[#allocation5 + $0x2e0] sm:$0xf]  ;;  %v4703_v6 = vld [vmem:[#allocation5 + $0x2ec] sm:$0xf0]  ;;  %v3828_v7 = vor.u32 %v4671_v4, %v3827_v2  ;;  %s3568_s3 = sshll.u32 %s5106_s2, 4  ;;  %s3570_s13 = sshll.u32 %s6255_s4, 4  ;;  %s3569_s3 = int_to_ptr.vmem [resolvable:$true] %s3568_s3  ;;  %s3571_s13 = int_to_ptr.hbm [resolvable:$true] %s3570_s13 }
  0x17   :  { %v3956_v8 = vor.u32 %v4703_v6, %v3955_v5  ;;  %v4083_v9 = vld [vmem:[#allocation5 + $0x3e0] sm:$0xf]  ;;  %v4735_v10 = vld [vmem:[#allocation5 + $0x3ec] sm:$0xf0]  ;;  %1725 = vmatpush.bf16.msra.mxu0 %v3700_v3  ;;  %s5107_s14 = smov 512   ;;  %s5108_s15 = smov 32  }
  0x18   :  { %v3683_v11 = vld [vmem:[#allocation5 + $0xc0] sm:$0xf]  ;;  %v4084_v12 = vor.u32 %v4735_v10, %v4083_v9  ;;  %v4635_v13 = vld [vmem:[#allocation5 + $0xcc] sm:$0xf0]  ;;  %1758 = vmatpush.bf16.msra.mxu1 %v3828_v7 }
  0x19   :  { %v3811_v14 = vld [vmem:[#allocation5 + $0x1c0] sm:$0xf]  ;;  %v4667_v15 = vld [vmem:[#allocation5 + $0x1cc] sm:$0xf0]  ;;  %1791 = vmatpush.bf16.msra.mxu2 %v3956_v8  ;;  %v3684_v16 = vor.u32 %v4635_v13, %v3683_v11 }
  0x1a   :  { %v3812_v17 = vor.u32 %v4667_v15, %v3811_v14  ;;  %v3939_v18 = vld [vmem:[#allocation5 + $0x2c0] sm:$0xf]  ;;  %v4699_v19 = vld [vmem:[#allocation5 + $0x2cc] sm:$0xf0]  ;;  %1824 = vmatpush.bf16.msra.mxu3 %v4084_v12 }
  0x1b   :  { %v4067_v20 = vld [vmem:[#allocation5 + $0x3c0] sm:$0xf]  ;;  %v3940_v21 = vor.u32 %v4699_v19, %v3939_v18  ;;  %v4731_v22 = vld [vmem:[#allocation5 + $0x3cc] sm:$0xf0]  ;;  %1726 = vmatpush.bf16.msra.mxu0 %v3684_v16 }
  0x1c   :  { %v3667_v23 = vld [vmem:[#allocation5 + $0xa0] sm:$0xf]  ;;  %v4631_v24 = vld [vmem:[#allocation5 + $0xac] sm:$0xf0]  ;;  %v4068_v25 = vor.u32 %v4731_v22, %v4067_v20  ;;  %1759 = vmatpush.bf16.msra.mxu1 %v3812_v17 }
  0x1d   :  { %v3795_v26 = vld [vmem:[#allocation5 + $0x1a0] sm:$0xf]  ;;  %v4663_v27 = vld [vmem:[#allocation5 + $0x1ac] sm:$0xf0]  ;;  %v3668_v29 = vor.u32 %v4631_v24, %v3667_v23  ;;  %1792 = vmatpush.bf16.msra.mxu2 %v3940_v21 }
  0x1e   :  { %v3923_v28 = vld [vmem:[#allocation5 + $0x2a0] sm:$0xf]  ;;  %v4695_v30 = vld [vmem:[#allocation5 + $0x2ac] sm:$0xf0]  ;;  %v3796_v33 = vor.u32 %v4663_v27, %v3795_v26  ;;  %1825 = vmatpush.bf16.msra.mxu3 %v4068_v25 }
  0x1f   :  { %v4051_v31 = vld [vmem:[#allocation5 + $0x3a0] sm:$0xf]  ;;  %v4727_v32 = vld [vmem:[#allocation5 + $0x3ac] sm:$0xf0]  ;;  %v3924_v34 = vor.u32 %v4695_v30, %v3923_v28  ;;  %1727 = vmatpush.bf16.msra.mxu0 %v3668_v29  ;;  %v78_v30 = vld [vmem:[#allocation2 + $0x8] sm:$0xff] }
  0x20   :  { %v3651_v35 = vld [vmem:[#allocation5 + $0x80] sm:$0xf]  ;;  %v4627_v36 = vld [vmem:[#allocation5 + $0x8c] sm:$0xf0]  ;;  %v4052_v38 = vor.u32 %v4727_v32, %v4051_v31  ;;  %1760 = vmatpush.bf16.msra.mxu1 %v3796_v33  ;;  %v86_v31 = vld [vmem:[#allocation2 + $0x48] sm:$0xff] }
  0x21   :  { %v3779_v37 = vld [vmem:[#allocation5 + $0x180] sm:$0xf]  ;;  %v4659_v39 = vld [vmem:[#allocation5 + $0x18c] sm:$0xf0]  ;;  %v3652_v44 = vor.u32 %v4627_v36, %v3651_v35  ;;  %1793 = vmatpush.bf16.msra.mxu2 %v3924_v34 }
  0x22   :  { %v3907_v40 = vld [vmem:[#allocation5 + $0x280] sm:$0xf]  ;;  %v4691_v41 = vld [vmem:[#allocation5 + $0x28c] sm:$0xf0]  ;;  %v3780_v45 = vor.u32 %v4659_v39, %v3779_v37  ;;  %1826 = vmatpush.bf16.msra.mxu3 %v4052_v38 }
  0x23   :  { %v4035_v42 = vld [vmem:[#allocation5 + $0x380] sm:$0xf]  ;;  %v4723_v43 = vld [vmem:[#allocation5 + $0x38c] sm:$0xf0]  ;;  %v3908_v46 = vor.u32 %v4691_v41, %v3907_v40  ;;  %1728 = vmatpush.bf16.msra.mxu0 %v3652_v44  ;;  %v80_v41 = vld [vmem:[#allocation2 + $0x18] sm:$0xff] }
  0x24   :  { %v3635_v47 = vld [vmem:[#allocation5 + $0x60] sm:$0xf]  ;;  %v4623_v48 = vld [vmem:[#allocation5 + $0x6c] sm:$0xf0]  ;;  %v4036_v50 = vor.u32 %v4723_v43, %v4035_v42  ;;  %1761 = vmatpush.bf16.msra.mxu1 %v3780_v45  ;;  %v88_v42 = vld [vmem:[#allocation2 + $0x58] sm:$0xff] }
  0x25   :  { %v3763_v49 = vld [vmem:[#allocation5 + $0x160] sm:$0xf]  ;;  %v4655_v51 = vld [vmem:[#allocation5 + $0x16c] sm:$0xf0]  ;;  %v3636_v56 = vor.u32 %v4623_v48, %v3635_v47  ;;  %1794 = vmatpush.bf16.msra.mxu2 %v3908_v46 }
  0x26   :  { %v3891_v52 = vld [vmem:[#allocation5 + $0x260] sm:$0xf]  ;;  %v4687_v53 = vld [vmem:[#allocation5 + $0x26c] sm:$0xf0]  ;;  %v3764_v57 = vor.u32 %v4655_v51, %v3763_v49  ;;  %1827 = vmatpush.bf16.msra.mxu3 %v4036_v50 }
  0x27   :  { %v4019_v54 = vld [vmem:[#allocation5 + $0x360] sm:$0xf]  ;;  %v4719_v55 = vld [vmem:[#allocation5 + $0x36c] sm:$0xf0]  ;;  %v3892_v58 = vor.u32 %v4687_v53, %v3891_v52  ;;  %1729 = vmatpush.bf16.msra.mxu0 %v3636_v56  ;;  %v5148_v53 = vpack.c.bf16 %v86_v31, %v78_v30  ;;  %v102_v31 = vld [vmem:[#allocation2 + $0xc8] sm:$0xff] }
  0x28   :  { %v3619_v59 = vld [vmem:[#allocation5 + $0x40] sm:$0xf]  ;;  %v4619_v60 = vld [vmem:[#allocation5 + $0x4c] sm:$0xf0]  ;;  %v4020_v62 = vor.u32 %v4719_v55, %v4019_v54  ;;  %1762 = vmatpush.bf16.msra.mxu1 %v3764_v57  ;;  %v5152_v57 = vpack.c.bf16 %v88_v42, %v80_v41 }
  0x29   :  { %v3747_v61 = vld [vmem:[#allocation5 + $0x140] sm:$0xf]  ;;  %v4651_v63 = vld [vmem:[#allocation5 + $0x14c] sm:$0xf0]  ;;  %v3620_v4 = vor.u32 %v4619_v60, %v3619_v59  ;;  %1795 = vmatpush.bf16.msra.mxu2 %v3892_v58  ;;  %6289 = vst [vmem:[#allocation15_spill] sm:$0xff] %v5148_v53 }
  0x2a   :  { %v3875_v0 = vld [vmem:[#allocation5 + $0x240] sm:$0xf]  ;;  %v4683_v1 = vld [vmem:[#allocation5 + $0x24c] sm:$0xf0]  ;;  %v3748_v5 = vor.u32 %v4651_v63, %v3747_v61  ;;  %1828 = vmatpush.bf16.msra.mxu3 %v4020_v62  ;;  %6291 = vst [vmem:[#allocation17_spill] sm:$0xff] %v5152_v57 }
  0x2b   :  { %v4003_v2 = vld [vmem:[#allocation5 + $0x340] sm:$0xf]  ;;  %v4715_v3 = vld [vmem:[#allocation5 + $0x34c] sm:$0xf0]  ;;  %v3876_v6 = vor.u32 %v4683_v1, %v3875_v0  ;;  %1730 = vmatpush.bf16.msra.mxu0 %v3620_v4 }
  0x2c   :  { %v3603_v7 = vld [vmem:[#allocation5 + $0x20] sm:$0xf]  ;;  %v4615_v8 = vld [vmem:[#allocation5 + $0x2c] sm:$0xf0]  ;;  %v4004_v10 = vor.u32 %v4715_v3, %v4003_v2  ;;  %1763 = vmatpush.bf16.msra.mxu1 %v3748_v5 }
  0x2d   :  { %v3731_v9 = vld [vmem:[#allocation5 + $0x120] sm:$0xf]  ;;  %v4647_v11 = vld [vmem:[#allocation5 + $0x12c] sm:$0xf0]  ;;  %v3604_v17 = vor.u32 %v4615_v8, %v3603_v7  ;;  %1796 = vmatpush.bf16.msra.mxu2 %v3876_v6 }
  0x2e   :  { %v3859_v12 = vld [vmem:[#allocation5 + $0x220] sm:$0xf]  ;;  %v4679_v13 = vld [vmem:[#allocation5 + $0x22c] sm:$0xf0]  ;;  %v3732_v21 = vor.u32 %v4647_v11, %v3731_v9  ;;  %1829 = vmatpush.bf16.msra.mxu3 %v4004_v10 }
  0x2f   :  { %v3987_v14 = vld [vmem:[#allocation5 + $0x320] sm:$0xf]  ;;  %v4711_v15 = vld [vmem:[#allocation5 + $0x32c] sm:$0xf0]  ;;  %v3860_v22 = vor.u32 %v4679_v13, %v3859_v12  ;;  %1731 = vmatpush.bf16.msra.mxu0 %v3604_v17 }
  0x30   :  { %v3587_v16 = vld [vmem:[#allocation5] sm:$0xf]  ;;  %v4611_v18 = vld [vmem:[#allocation5 + $0xc] sm:$0xf0]  ;;  %v3988_v26 = vor.u32 %v4711_v15, %v3987_v14  ;;  %1764 = vmatpush.bf16.msra.mxu1 %v3732_v21 }
  0x31   :  { %v3715_v19 = vld [vmem:[#allocation5 + $0x100] sm:$0xf]  ;;  %v4643_v20 = vld [vmem:[#allocation5 + $0x10c] sm:$0xf0]  ;;  %v3588_v34 = vor.u32 %v4611_v18, %v3587_v16  ;;  %1797 = vmatpush.bf16.msra.mxu2 %v3860_v22 }
  0x32   :  { %v3843_v23 = vld [vmem:[#allocation5 + $0x200] sm:$0xf]  ;;  %v4675_v24 = vld [vmem:[#allocation5 + $0x20c] sm:$0xf0]  ;;  %v3716_v38 = vor.u32 %v4643_v20, %v3715_v19  ;;  %1830 = vmatpush.bf16.msra.mxu3 %v3988_v26  ;;  %v94_v26 = vld [vmem:[#allocation2 + $0x88] sm:$0xff] }
  0x33   :  { %v3971_v25 = vld [vmem:[#allocation5 + $0x300] sm:$0xf]  ;;  %v4707_v27 = vld [vmem:[#allocation5 + $0x30c] sm:$0xf0]  ;;  %v3844_v39 = vor.u32 %v4675_v24, %v3843_v23  ;;  %1732 = vmatpush.bf16.msra.mxu0 %v3588_v34 }
  0x34   :  { %v77_v28 = vld [vmem:[#allocation2] sm:$0xff]  ;;  %v4831_v33 = vld [vmem:[#allocation5 + $0x6ec] sm:$0xf0]  ;;  %v3972_v43 = vor.u32 %v4707_v27, %v3971_v25  ;;  %1765 = vmatpush.bf16.msra.mxu1 %v3716_v38  ;;  %v104_v38 = vld [vmem:[#allocation2 + $0xd8] sm:$0xff] }
  0x35   :  { %v85_v29 = vld [vmem:[#allocation2 + $0x40] sm:$0xff]  ;;  %v79_v35 = vld [vmem:[#allocation2 + $0x10] sm:$0xff]  ;;  %1798 = vmatpush.bf16.msra.mxu2 %v3844_v39 }
  0x36   :  { %v4467_v32 = vld [vmem:[#allocation5 + $0x6e0] sm:$0xf]  ;;  %v4863_v37 = vld [vmem:[#allocation5 + $0x7ec] sm:$0xf0]  ;;  %v5146_v48 = vpack.c.bf16 %v85_v29, %v77_v28  ;;  %1831 = vmatpush.bf16.msra.mxu3 %v3972_v43 }
  0x37   :  { %v4595_v36 = vld [vmem:[#allocation5 + $0x7e0] sm:$0xf]  ;;  %v87_v40 = vld [vmem:[#allocation2 + $0x50] sm:$0xff]  ;;  %v4468_v44 = vor.u32 %v4831_v33, %v4467_v32  ;;  %1766 = vmatmul.bf16.vlgmr.msra.gmra.mxu1 %v5148_v53 }
  0x38   :  { %v4211_v45 = vld [vmem:[#allocation5 + $0x4e0] sm:$0xf]  ;;  %v4767_v46 = vld [vmem:[#allocation5 + $0x4ec] sm:$0xf0]  ;;  %v4596_v49 = vor.u32 %v4863_v37, %v4595_v36  ;;  %v5150_v54 = vpack.c.bf16 %v87_v40, %v79_v35  ;;  %1733 = vmatmul.bf16.vlgmr.msra.gmra.mxu0 %v5146_v48  ;;  %v96_v36 = vld [vmem:[#allocation2 + $0x98] sm:$0xff] }
  0x39   :  { %v4339_v47 = vld [vmem:[#allocation5 + $0x5e0] sm:$0xf]  ;;  %v4799_v50 = vld [vmem:[#allocation5 + $0x5ec] sm:$0xf0]  ;;  %v4212_v58 = vor.u32 %v4767_v46, %v4211_v45  ;;  %1923 = vmatpush.bf16.msrb.mxu2 %v4468_v44  ;;  %1832 = vmatmul.bf16.vlgmr.msra.gmra.mxu3 %v5152_v57 }
  0x3a   :  { %v4451_v51 = vld [vmem:[#allocation5 + $0x6c0] sm:$0xf]  ;;  %v4827_v52 = vld [vmem:[#allocation5 + $0x6cc] sm:$0xf0]  ;;  %6290 = vst [vmem:[#allocation16_spill] sm:$0xff] %v5150_v54  ;;  %v4340_v59 = vor.u32 %v4799_v50, %v4339_v47  ;;  %1956 = vmatpush.bf16.msrb.mxu3 %v4596_v49  ;;  %1799 = vmatmul.bf16.vlgmr.msra.gmra.mxu2 %v5150_v54  ;;  %v5160_v47 = vpack.c.bf16 %v102_v31, %v94_v26 }
  0x3b   :  { %v4579_v55 = vld [vmem:[#allocation5 + $0x7c0] sm:$0xf]  ;;  %v4859_v56 = vld [vmem:[#allocation5 + $0x7cc] sm:$0xf0]  ;;  %v4452_v60 = vor.u32 %v4827_v52, %v4451_v51  ;;  %1857 = vmatpush.bf16.msrb.mxu0 %v4212_v58  ;;  %v5164_v50 = vpack.c.bf16 %v104_v38, %v96_v36 }
  0x3c   :  { %v4195_v61 = vld [vmem:[#allocation5 + $0x4c0] sm:$0xf]  ;;  %v4763_v62 = vld [vmem:[#allocation5 + $0x4cc] sm:$0xf0]  ;;  %v4580_v0 = vor.u32 %v4859_v56, %v4579_v55  ;;  %1890 = vmatpush.bf16.msrb.mxu1 %v4340_v59 }
  0x3d   :  { %v4323_v63 = vld [vmem:[#allocation5 + $0x5c0] sm:$0xf]  ;;  %v4795_v1 = vld [vmem:[#allocation5 + $0x5cc] sm:$0xf0]  ;;  %v4196_v6 = vor.u32 %v4763_v62, %v4195_v61  ;;  %1924 = vmatpush.bf16.msrb.mxu2 %v4452_v60  ;;  %6292 = vst [vmem:[#allocation18_spill] sm:$0xff] %v5164_v50 }
  0x3e   :  { %v4435_v2 = vld [vmem:[#allocation5 + $0x6a0] sm:$0xf]  ;;  %v4823_v3 = vld [vmem:[#allocation5 + $0x6ac] sm:$0xf0]  ;;  %v4324_v7 = vor.u32 %v4795_v1, %v4323_v63  ;;  %1957 = vmatpush.bf16.msrb.mxu3 %v4580_v0 }
  0x3f   :  { %v4563_v4 = vld [vmem:[#allocation5 + $0x7a0] sm:$0xf]  ;;  %v4855_v5 = vld [vmem:[#allocation5 + $0x7ac] sm:$0xf0]  ;;  %v4436_v8 = vor.u32 %v4823_v3, %v4435_v2  ;;  %1858 = vmatpush.bf16.msrb.mxu0 %v4196_v6 }
  0x40   :  { %v4179_v9 = vld [vmem:[#allocation5 + $0x4a0] sm:$0xf]  ;;  %v4759_v10 = vld [vmem:[#allocation5 + $0x4ac] sm:$0xf0]  ;;  %v4564_v12 = vor.u32 %v4855_v5, %v4563_v4  ;;  %1891 = vmatpush.bf16.msrb.mxu1 %v4324_v7 }
  0x41   :  { %v4307_v11 = vld [vmem:[#allocation5 + $0x5a0] sm:$0xf]  ;;  %v4791_v13 = vld [vmem:[#allocation5 + $0x5ac] sm:$0xf0]  ;;  %v4180_v18 = vor.u32 %v4759_v10, %v4179_v9  ;;  %1925 = vmatpush.bf16.msrb.mxu2 %v4436_v8 }
  0x42   :  { %v4419_v14 = vld [vmem:[#allocation5 + $0x680] sm:$0xf]  ;;  %v4819_v15 = vld [vmem:[#allocation5 + $0x68c] sm:$0xf0]  ;;  %v4308_v21 = vor.u32 %v4791_v13, %v4307_v11  ;;  %1958 = vmatpush.bf16.msrb.mxu3 %v4564_v12 }
  0x43   :  { %v4547_v16 = vld [vmem:[#allocation5 + $0x780] sm:$0xf]  ;;  %v4851_v17 = vld [vmem:[#allocation5 + $0x78c] sm:$0xf0]  ;;  %v4420_v22 = vor.u32 %v4819_v15, %v4419_v14  ;;  %1859 = vmatpush.bf16.msrb.mxu0 %v4180_v18  ;;  %v110_v15 = vld [vmem:[#allocation2 + $0x108] sm:$0xff] }
  0x44   :  { %v93_v19 = vld [vmem:[#allocation2 + $0x80] sm:$0xff]  ;;  %v4755_v24 = vld [vmem:[#allocation5 + $0x48c] sm:$0xf0]  ;;  %v4548_v27 = vor.u32 %v4851_v17, %v4547_v16  ;;  %1892 = vmatpush.bf16.msrb.mxu1 %v4308_v21  ;;  %v118_v16 = vld [vmem:[#allocation2 + $0x148] sm:$0xff] }
  0x45   :  { %v101_v20 = vld [vmem:[#allocation2 + $0xc0] sm:$0xff]  ;;  %v4787_v28 = vld [vmem:[#allocation5 + $0x58c] sm:$0xf0]  ;;  %1926 = vmatpush.bf16.msrb.mxu2 %v4420_v22  ;;  %v5172_v22 = vpack.c.bf16 %v118_v16, %v110_v15  ;;  %v4069_v15 = vld [vmem:[#allocation5 + $0x3d0] sm:$0xf0] }
  0x46   :  { %v4163_v23 = vld [vmem:[#allocation5 + $0x480] sm:$0xf]  ;;  %v4815_v30 = vld [vmem:[#allocation5 + $0x66c] sm:$0xf0]  ;;  %v5158_v43 = vpack.c.bf16 %v101_v20, %v93_v19  ;;  %1959 = vmatpush.bf16.msrb.mxu3 %v4548_v27  ;;  %v112_v19 = vld [vmem:[#allocation2 + $0x118] sm:$0xff] }
  0x47   :  { %v4291_v25 = vld [vmem:[#allocation5 + $0x580] sm:$0xf]  ;;  %v4847_v33 = vld [vmem:[#allocation5 + $0x76c] sm:$0xf0]  ;;  %v4164_v37 = vor.u32 %v4755_v24, %v4163_v23  ;;  %1771 = vmatmul.bf16.gmra.mxu1 %v5160_v47  ;;  %v120_v20 = vld [vmem:[#allocation2 + $0x158] sm:$0xff]  ;;  %6294 = vst [vmem:[#allocation20_spill] sm:$0xff] %v5172_v22 }
  0x48   :  { %v4403_v29 = vld [vmem:[#allocation5 + $0x660] sm:$0xf]  ;;  %v95_v34 = vld [vmem:[#allocation2 + $0x90] sm:$0xff]  ;;  %v4292_v39 = vor.u32 %v4787_v28, %v4291_v25  ;;  %1738 = vmatmul.bf16.gmra.mxu0 %v5158_v43  ;;  %v5176_v24 = vpack.c.bf16 %v120_v20, %v112_v19  ;;  %v4665_v16 = vld [vmem:[#allocation5 + $0x1c4] sm:$0xf] }
  0x49   :  { %v4531_v32 = vld [vmem:[#allocation5 + $0x760] sm:$0xf]  ;;  %v103_v35 = vld [vmem:[#allocation2 + $0xd0] sm:$0xff]  ;;  %v4404_v40 = vor.u32 %v4815_v30, %v4403_v29  ;;  %1860 = vmatpush.bf16.msrb.mxu0 %v4164_v37  ;;  %1837 = vmatmul.bf16.gmra.mxu3 %v5164_v50 }
  0x4a   :  { %v4147_v41 = vld [vmem:[#allocation5 + $0x460] sm:$0xf]  ;;  %v4751_v42 = vld [vmem:[#allocation5 + $0x46c] sm:$0xf0]  ;;  %v4532_v44 = vor.u32 %v4847_v33, %v4531_v32  ;;  %v5162_v49 = vpack.c.bf16 %v103_v35, %v95_v34  ;;  %1893 = vmatpush.bf16.msrb.mxu1 %v4292_v39  ;;  %6296 = vst [vmem:[#allocation22_spill] sm:$0xff] %v5176_v24 }
  0x4b   :  { %v4275_v45 = vld [vmem:[#allocation5 + $0x560] sm:$0xf]  ;;  %v4783_v46 = vld [vmem:[#allocation5 + $0x56c] sm:$0xf0]  ;;  %v4148_v51 = vor.u32 %v4751_v42, %v4147_v41  ;;  %1927 = vmatpush.bf16.msrb.mxu2 %v4404_v40  ;;  %v126_v42 = vld [vmem:[#allocation2 + $0x188] sm:$0xff] }
  0x4c   :  { %v4276_v52 = vor.u32 %v4783_v46, %v4275_v45  ;;  %1960 = vmatpush.bf16.msrb.mxu3 %v4532_v44  ;;  %1804 = vmatmul.bf16.gmra.mxu2 %v5162_v49  ;;  %v4387_v55 = vld [vmem:[#allocation5 + $0x640] sm:$0xf]  ;;  %v4811_v56 = vld [vmem:[#allocation5 + $0x64c] sm:$0xf0]  ;;  %v134_v44 = vld [vmem:[#allocation2 + $0x1c8] sm:$0xff] }
  0x4d   :  { %1861 = vmatpush.bf16.msrb.mxu0 %v4148_v51  ;;  %v4131_v58 = vld [vmem:[#allocation5 + $0x440] sm:$0xf]  ;;  %v4388_v59 = vor.u32 %v4811_v56, %v4387_v55  ;;  %v4747_v60 = vld [vmem:[#allocation5 + $0x44c] sm:$0xf0]  ;;  %v128_v51 = vld [vmem:[#allocation2 + $0x198] sm:$0xff]  ;;  %v5184_v56 = vpack.c.bf16 %v134_v44, %v126_v42 }
  0x4e   :  { %1894 = vmatpush.bf16.msrb.mxu1 %v4276_v52  ;;  %v4515_v61 = vld [vmem:[#allocation5 + $0x740] sm:$0xf]  ;;  %v4843_v62 = vld [vmem:[#allocation5 + $0x74c] sm:$0xf0]  ;;  %v4132_v63 = vor.u32 %v4747_v60, %v4131_v58  ;;  %v136_v52 = vld [vmem:[#allocation2 + $0x1d8] sm:$0xff] }
  0x4f   :  { %v4516_v0 = vor.u32 %v4843_v62, %v4515_v61  ;;  %v4259_v1 = vld [vmem:[#allocation5 + $0x540] sm:$0xf]  ;;  %v4779_v2 = vld [vmem:[#allocation5 + $0x54c] sm:$0xf0]  ;;  %1928 = vmatpush.bf16.msrb.mxu2 %v4388_v59  ;;  %v5188_v59 = vpack.c.bf16 %v136_v52, %v128_v51  ;;  %v4701_v60 = vld [vmem:[#allocation5 + $0x2e4] sm:$0xf] }
  0x50   :  { %v4371_v3 = vld [vmem:[#allocation5 + $0x620] sm:$0xf]  ;;  %v4260_v4 = vor.u32 %v4779_v2, %v4259_v1  ;;  %v4807_v5 = vld [vmem:[#allocation5 + $0x62c] sm:$0xf0]  ;;  %v3957_v61 = vld [vmem:[#allocation5 + $0x2f0] sm:$0xf0] }
  0x51   :  { %v4115_v6 = vld [vmem:[#allocation5 + $0x420] sm:$0xf]  ;;  %v4743_v7 = vld [vmem:[#allocation5 + $0x42c] sm:$0xf0]  ;;  %1862 = vmatpush.bf16.msrb.mxu0 %v4132_v63  ;;  %1961 = vmatpush.bf16.msrb.mxu3 %v4516_v0  ;;  %v4372_v8 = vor.u32 %v4807_v5, %v4371_v3  ;;  %6297 = vst [vmem:[#allocation23_spill] sm:$0xff] %v5188_v59  ;;  %v3960_v63 = vor.u32 %v4701_v60, %v3957_v61  ;;  %v82_v61 = vld [vmem:[#allocation2 + $0x28] sm:$0xff] }
  0x52   :  { %v4116_v9 = vor.u32 %v4743_v7, %v4115_v6  ;;  %v4499_v10 = vld [vmem:[#allocation5 + $0x720] sm:$0xf]  ;;  %v4839_v11 = vld [vmem:[#allocation5 + $0x72c] sm:$0xf0]  ;;  %1895 = vmatpush.bf16.msrb.mxu1 %v4260_v4  ;;  %v4637_v62 = vld [vmem:[#allocation5 + $0xe4] sm:$0xf] }
  0x53   :  { %v4500_v12 = vor.u32 %v4839_v11, %v4499_v10  ;;  %v109_v13 = vld [vmem:[#allocation2 + $0x100] sm:$0xff]  ;;  %1929 = vmatpush.bf16.msrb.mxu2 %v4372_v8  ;;  %v111_v17 = vld [vmem:[#allocation2 + $0x110] sm:$0xff] }
  0x54   :  { %v117_v14 = vld [vmem:[#allocation2 + $0x140] sm:$0xff]  ;;  %v119_v18 = vld [vmem:[#allocation2 + $0x150] sm:$0xff] }
  0x55   :  { %1863 = vmatpush.bf16.msrb.mxu0 %v4116_v9  ;;  %1962 = vmatpush.bf16.msrb.mxu3 %v4500_v12  ;;  %v5170_v21 = vpack.c.bf16 %v117_v14, %v109_v13  ;;  %v5174_v23 = vpack.c.bf16 %v119_v18, %v111_v17  ;;  %v4243_v25 = vld [vmem:[#allocation5 + $0x520] sm:$0xf]  ;;  %v4775_v26 = vld [vmem:[#allocation5 + $0x52c] sm:$0xf0]  ;;  %v3701_v0 = vld [vmem:[#allocation5 + $0xf0] sm:$0xf0] }
  0x56   :  { %v4355_v27 = vld [vmem:[#allocation5 + $0x600] sm:$0xf]  ;;  %v4244_v28 = vor.u32 %v4775_v26, %v4243_v25  ;;  %v4803_v29 = vld [vmem:[#allocation5 + $0x60c] sm:$0xf0]  ;;  %v4733_v1 = vld [vmem:[#allocation5 + $0x3e4] sm:$0xf]  ;;  %v3704_v3 = vor.u32 %v4637_v62, %v3701_v0 }
  0x57   :  { %6293 = vst [vmem:[#allocation19_spill] sm:$0xff] %v5170_v21  ;;  %1776 = vmatmul.bf16.gmra.mxu1 %v5172_v22  ;;  %v4099_v30 = vld [vmem:[#allocation5 + $0x400] sm:$0xf]  ;;  %v4739_v31 = vld [vmem:[#allocation5 + $0x40c] sm:$0xf0]  ;;  %v4356_v32 = vor.u32 %v4803_v29, %v4355_v27  ;;  %v90_v62 = vld [vmem:[#allocation2 + $0x68] sm:$0xff] }
  0x58   :  { %6295 = vst [vmem:[#allocation21_spill] sm:$0xff] %v5174_v23  ;;  %1743 = vmatmul.bf16.gmra.mxu0 %v5170_v21  ;;  %v4100_v33 = vor.u32 %v4739_v31, %v4099_v30  ;;  %v4483_v34 = vld [vmem:[#allocation5 + $0x700] sm:$0xf]  ;;  %v4835_v35 = vld [vmem:[#allocation5 + $0x70c] sm:$0xf0]  ;;  %1896 = vmatpush.bf16.msrb.mxu1 %v4244_v28 }
  0x59   :  { %1842 = vmatmul.bf16.gmra.mxu3 %v5176_v24  ;;  %v4227_v36 = vld [vmem:[#allocation5 + $0x500] sm:$0xf]  ;;  %v4484_v37 = vor.u32 %v4835_v35, %v4483_v34  ;;  %v4771_v38 = vld [vmem:[#allocation5 + $0x50c] sm:$0xf0]  ;;  %1930 = vmatpush.bf16.msrb.mxu2 %v4356_v32  ;;  %v4085_v2 = vld [vmem:[#allocation5 + $0x3f0] sm:$0xf0] }
  0x5a   :  { %1864 = vmatpush.bf16.msrb.mxu0 %v4100_v33  ;;  %v4228_v39 = vor.u32 %v4771_v38, %v4227_v36  ;;  %v125_v40 = vld [vmem:[#allocation2 + $0x180] sm:$0xff]  ;;  %v127_v45 = vld [vmem:[#allocation2 + $0x190] sm:$0xff]  ;;  %v4088_v4 = vor.u32 %v4733_v1, %v4085_v2  ;;  %v142_v25 = vld [vmem:[#allocation2 + $0x208] sm:$0xf] }
  0x5b   :  { %1963 = vmatpush.bf16.msrb.mxu3 %v4484_v37  ;;  %v133_v41 = vld [vmem:[#allocation2 + $0x1c0] sm:$0xff]  ;;  %v135_v46 = vld [vmem:[#allocation2 + $0x1d0] sm:$0xff]  ;;  %v144_v27 = vld [vmem:[#allocation2 + $0x218] sm:$0xf]  ;;  %v5196_v29 = vpack.c.bf16 %v142_v25, %v142_v25 }
  0x5c   :  { %1809 = vmatmul.bf16.gmra.mxu2 %v5174_v23  ;;  %1897 = vmatpush.bf16.msrb.mxu1 %v4228_v39  ;;  %v5182_v55 = vpack.c.bf16 %v133_v41, %v125_v40  ;;  %v5186_v58 = vpack.c.bf16 %v135_v46, %v127_v45  ;;  %v4669_v5 = vld [vmem:[#allocation5 + $0x1e4] sm:$0xf]  ;;  %v3829_v6 = vld [vmem:[#allocation5 + $0x1f0] sm:$0xf0]  ;;  %v141_v20 = vld [vmem:[#allocation2 + $0x200] sm:$0xf]  ;;  %v5200_v31 = vpack.c.bf16 %v144_v27, %v144_v27 }
  0x5d   :  { %v4697_v7 = vld [vmem:[#allocation5 + $0x2c4] sm:$0xf]  ;;  %2055 = vmatpush.bf16.msra.mxu2 %v3960_v63  ;;  %v3832_v8 = vor.u32 %v4669_v5, %v3829_v6  ;;  %v3941_v9 = vld [vmem:[#allocation5 + $0x2d0] sm:$0xf0]  ;;  %v143_v26 = vld [vmem:[#allocation2 + $0x210] sm:$0xf]  ;;  %v5194_v28 = vpack.c.bf16 %v141_v20, %v141_v20 }
  0x5e   :  { %v4633_v10 = vld [vmem:[#allocation5 + $0xc4] sm:$0xf]  ;;  %v3685_v11 = vld [vmem:[#allocation5 + $0xd0] sm:$0xf0]  ;;  %1989 = vmatpush.bf16.msra.mxu0 %v3704_v3  ;;  %v3944_v12 = vor.u32 %v4697_v7, %v3941_v9  ;;  %v5198_v30 = vpack.c.bf16 %v143_v26, %v143_v26  ;;  %v84_v1 = vld [vmem:[#allocation2 + $0x38] sm:$0xff] }
  0x5f   :  { %2088 = vmatpush.bf16.msra.mxu3 %v4088_v4  ;;  %v3688_v13 = vor.u32 %v4633_v10, %v3685_v11  ;;  %v4729_v14 = vld [vmem:[#allocation5 + $0x3c4] sm:$0xf]  ;;  %v3813_v18 = vld [vmem:[#allocation5 + $0x1d0] sm:$0xf0]  ;;  %v92_v2 = vld [vmem:[#allocation2 + $0x78] sm:$0xff]  ;;  %v5208_v4 = vpack.c.bf16 %v90_v62, %v82_v61 }
  0x60   :  { %2022 = vmatpush.bf16.msra.mxu1 %v3832_v8  ;;  %v4072_v17 = vor.u32 %v4729_v14, %v4069_v15  ;;  %v3816_v19 = vor.u32 %v4665_v16, %v3813_v18  ;;  %v4693_v32 = vld [vmem:[#allocation5 + $0x2a4] sm:$0xf]  ;;  %v3925_v33 = vld [vmem:[#allocation5 + $0x2b0] sm:$0xf0]  ;;  %v5212_v6 = vpack.c.bf16 %v92_v2, %v84_v1 }
  0x61   :  { %2056 = vmatpush.bf16.msra.mxu2 %v3944_v12  ;;  %v4629_v34 = vld [vmem:[#allocation5 + $0xa4] sm:$0xf]  ;;  %v3928_v35 = vor.u32 %v4693_v32, %v3925_v33  ;;  %v3669_v36 = vld [vmem:[#allocation5 + $0xb0] sm:$0xf0] }
  0x62   :  { %1990 = vmatpush.bf16.msra.mxu0 %v3688_v13  ;;  %v4725_v37 = vld [vmem:[#allocation5 + $0x3a4] sm:$0xf]  ;;  %v4053_v38 = vld [vmem:[#allocation5 + $0x3b0] sm:$0xf0]  ;;  %v3672_v39 = vor.u32 %v4629_v34, %v3669_v36 }
  0x63   :  { %2089 = vmatpush.bf16.msra.mxu3 %v4072_v17  ;;  %v4056_v40 = vor.u32 %v4725_v37, %v4053_v38  ;;  %v4661_v41 = vld [vmem:[#allocation5 + $0x1a4] sm:$0xf]  ;;  %v3797_v42 = vld [vmem:[#allocation5 + $0x1b0] sm:$0xf0]  ;;  %v98_v38 = vld [vmem:[#allocation2 + $0xa8] sm:$0xff] }
  0x64   :  { %2023 = vmatpush.bf16.msra.mxu1 %v3816_v19  ;;  %v4689_v44 = vld [vmem:[#allocation5 + $0x284] sm:$0xf]  ;;  %v3800_v45 = vor.u32 %v4661_v41, %v3797_v42  ;;  %v3909_v46 = vld [vmem:[#allocation5 + $0x290] sm:$0xf0]  ;;  %v100_v42 = vld [vmem:[#allocation2 + $0xb8] sm:$0xff] }
  0x65   :  { %2057 = vmatpush.bf16.msra.mxu2 %v3928_v35  ;;  %v3912_v51 = vor.u32 %v4689_v44, %v3909_v46  ;;  %v81_v52 = vld [vmem:[#allocation2 + $0x20] sm:$0xff]  ;;  %v83_v63 = vld [vmem:[#allocation2 + $0x30] sm:$0xff]  ;;  %v108_v44 = vld [vmem:[#allocation2 + $0xf8] sm:$0xff] }
  0x66   :  { %1991 = vmatpush.bf16.msra.mxu0 %v3672_v39  ;;  %v89_v60 = vld [vmem:[#allocation2 + $0x60] sm:$0xff]  ;;  %v91_v0 = vld [vmem:[#allocation2 + $0x70] sm:$0xff]  ;;  %v106_v39 = vld [vmem:[#allocation2 + $0xe8] sm:$0xff] }
  0x67   :  { %1781 = vmatmul.bf16.gmra.mxu1 %v5184_v56  ;;  %2090 = vmatpush.bf16.msra.mxu3 %v4056_v40  ;;  %v5206_v3 = vpack.c.bf16 %v89_v60, %v81_v52  ;;  %v5210_v5 = vpack.c.bf16 %v91_v0, %v83_v63  ;;  %v4625_v7 = vld [vmem:[#allocation5 + $0x84] sm:$0xf]  ;;  %v3653_v8 = vld [vmem:[#allocation5 + $0x90] sm:$0xf0]  ;;  %v5220_v46 = vpack.c.bf16 %v106_v39, %v98_v38 }
  0x68   :  { %1748 = vmatmul.bf16.gmra.mxu0 %v5182_v55  ;;  %2024 = vmatpush.bf16.msra.mxu1 %v3800_v45  ;;  %v4721_v9 = vld [vmem:[#allocation5 + $0x384] sm:$0xf]  ;;  %v3656_v10 = vor.u32 %v4625_v7, %v3653_v8  ;;  %v4037_v11 = vld [vmem:[#allocation5 + $0x390] sm:$0xf0]  ;;  %v5224_v52 = vpack.c.bf16 %v108_v44, %v100_v42 }
  0x69   :  { %1847 = vmatmul.bf16.gmra.mxu3 %v5188_v59  ;;  %2058 = vmatpush.bf16.msra.mxu2 %v3912_v51  ;;  %v4657_v12 = vld [vmem:[#allocation5 + $0x184] sm:$0xf]  ;;  %v3781_v13 = vld [vmem:[#allocation5 + $0x190] sm:$0xf0]  ;;  %v4040_v14 = vor.u32 %v4721_v9, %v4037_v11 }
  0x6a   :  { %v3784_v15 = vor.u32 %v4657_v12, %v3781_v13  ;;  %v4685_v16 = vld [vmem:[#allocation5 + $0x264] sm:$0xf]  ;;  %v3893_v17 = vld [vmem:[#allocation5 + $0x270] sm:$0xf0]  ;;  %1992 = vmatpush.bf16.msra.mxu0 %v3656_v10  ;;  %v114_v12 = vld [vmem:[#allocation2 + $0x128] sm:$0xff] }
  0x6b   :  { %v4621_v18 = vld [vmem:[#allocation5 + $0x64] sm:$0xf]  ;;  %v3896_v19 = vor.u32 %v4685_v16, %v3893_v17  ;;  %v3637_v20 = vld [vmem:[#allocation5 + $0x70] sm:$0xf0]  ;;  %2091 = vmatpush.bf16.msra.mxu3 %v4040_v14 }
  0x6c   :  { %1814 = vmatmul.bf16.gmra.mxu2 %v5186_v58  ;;  %v4717_v25 = vld [vmem:[#allocation5 + $0x364] sm:$0xf]  ;;  %v4021_v26 = vld [vmem:[#allocation5 + $0x370] sm:$0xf0]  ;;  %2025 = vmatpush.bf16.msra.mxu1 %v3784_v15  ;;  %v3640_v27 = vor.u32 %v4621_v18, %v3637_v20  ;;  %v122_v15 = vld [vmem:[#allocation2 + $0x168] sm:$0xff] }
  0x6d   :  { %v4024_v32 = vor.u32 %v4717_v25, %v4021_v26  ;;  %v4653_v33 = vld [vmem:[#allocation5 + $0x164] sm:$0xf]  ;;  %v3765_v34 = vld [vmem:[#allocation5 + $0x170] sm:$0xf0]  ;;  %2059 = vmatpush.bf16.msra.mxu2 %v3896_v19  ;;  %v116_v18 = vld [vmem:[#allocation2 + $0x138] sm:$0xff]  ;;  %v5232_v25 = vpack.c.bf16 %v122_v15, %v114_v12 }
  0x6e   :  { %v3768_v35 = vor.u32 %v4653_v33, %v3765_v34  ;;  %v97_v36 = vld [vmem:[#allocation2 + $0xa0] sm:$0xff]  ;;  %1993 = vmatpush.bf16.msra.mxu0 %v3640_v27  ;;  %v99_v40 = vld [vmem:[#allocation2 + $0xb0] sm:$0xff]  ;;  %v124_v19 = vld [vmem:[#allocation2 + $0x178] sm:$0xff] }
  0x6f   :  { %v105_v37 = vld [vmem:[#allocation2 + $0xe0] sm:$0xff]  ;;  %v107_v41 = vld [vmem:[#allocation2 + $0xf0] sm:$0xff]  ;;  %2092 = vmatpush.bf16.msra.mxu3 %v4024_v32  ;;  %v5236_v27 = vpack.c.bf16 %v124_v19, %v116_v18  ;;  %v132_v18 = vld [vmem:[#allocation2 + $0x1b8] sm:$0xff] }
  0x70   :  { %2026 = vmatpush.bf16.msra.mxu1 %v3768_v35  ;;  %v5218_v45 = vpack.c.bf16 %v105_v37, %v97_v36  ;;  %v5222_v51 = vpack.c.bf16 %v107_v41, %v99_v40  ;;  %v4681_v60 = vld [vmem:[#allocation5 + $0x244] sm:$0xf]  ;;  %v3877_v61 = vld [vmem:[#allocation5 + $0x250] sm:$0xf0]  ;;  %v140_v19 = vld [vmem:[#allocation2 + $0x1f8] sm:$0xff] }
  0x71   :  { %v3880_v62 = vor.u32 %v4681_v60, %v3877_v61  ;;  %v4617_v63 = vld [vmem:[#allocation5 + $0x44] sm:$0xf]  ;;  %v3621_v0 = vld [vmem:[#allocation5 + $0x50] sm:$0xf0] }
  0x72   :  { %v4713_v1 = vld [vmem:[#allocation5 + $0x344] sm:$0xf]  ;;  %v3624_v2 = vor.u32 %v4617_v63, %v3621_v0  ;;  %v4005_v7 = vld [vmem:[#allocation5 + $0x350] sm:$0xf0] }
  0x73   :  { %2060 = vmatpush.bf16.msra.mxu2 %v3880_v62  ;;  %v4649_v8 = vld [vmem:[#allocation5 + $0x144] sm:$0xf]  ;;  %v3749_v9 = vld [vmem:[#allocation5 + $0x150] sm:$0xf0]  ;;  %v4008_v13 = vor.u32 %v4713_v1, %v4005_v7 }
  0x74   :  { %v113_v10 = vld [vmem:[#allocation2 + $0x120] sm:$0xff]  ;;  %v3752_v14 = vor.u32 %v4649_v8, %v3749_v9  ;;  %v115_v16 = vld [vmem:[#allocation2 + $0x130] sm:$0xff]  ;;  %1994 = vmatpush.bf16.msra.mxu0 %v3624_v2  ;;  %v130_v9 = vld [vmem:[#allocation2 + $0x1a8] sm:$0xff] }
  0x75   :  { %v121_v11 = vld [vmem:[#allocation2 + $0x160] sm:$0xff]  ;;  %v123_v17 = vld [vmem:[#allocation2 + $0x170] sm:$0xff]  ;;  %2093 = vmatpush.bf16.msra.mxu3 %v4008_v13 }
  0x76   :  { %2027 = vmatpush.bf16.msra.mxu1 %v3752_v14  ;;  %v5230_v20 = vpack.c.bf16 %v121_v11, %v113_v10  ;;  %v5234_v26 = vpack.c.bf16 %v123_v17, %v115_v16  ;;  %v4677_v32 = vld [vmem:[#allocation5 + $0x224] sm:$0xf]  ;;  %v3861_v33 = vld [vmem:[#allocation5 + $0x230] sm:$0xf0]  ;;  %v138_v14 = vld [vmem:[#allocation2 + $0x1e8] sm:$0xff] }
  0x77   :  { %1786 = vmatmul.bf16.gmra.mxu1 %v5196_v29  ;;  %v4613_v34 = vld [vmem:[#allocation5 + $0x24] sm:$0xf]  ;;  %v3864_v35 = vor.u32 %v4677_v32, %v3861_v33  ;;  %v3605_v36 = vld [vmem:[#allocation5 + $0x30] sm:$0xf0] }
  0x78   :  { %1753 = vmatmul.bf16.gmra.mxu0 %v5194_v28  ;;  %v4709_v37 = vld [vmem:[#allocation5 + $0x324] sm:$0xf]  ;;  %v3989_v38 = vld [vmem:[#allocation5 + $0x330] sm:$0xf0]  ;;  %v3608_v39 = vor.u32 %v4613_v34, %v3605_v36  ;;  %v5244_v34 = vpack.c.bf16 %v138_v14, %v130_v9 }
  0x79   :  { %1852 = vmatmul.bf16.gmra.mxu3 %v5200_v31  ;;  %v3992_v40 = vor.u32 %v4709_v37, %v3989_v38  ;;  %2061 = vmatpush.bf16.msra.mxu2 %v3864_v35  ;;  %v4645_v41 = vld [vmem:[#allocation5 + $0x124] sm:$0xf]  ;;  %v3733_v42 = vld [vmem:[#allocation5 + $0x130] sm:$0xf0]  ;;  %v5248_v37 = vpack.c.bf16 %v140_v19, %v132_v18  ;;  %v146_v18 = vld [vmem:[#allocation2 + $0x228] sm:$0xf] }
  0x7a   :  { %1995 = vmatpush.bf16.msra.mxu0 %v3608_v39  ;;  %v3736_v44 = vor.u32 %v4645_v41, %v3733_v42  ;;  %v129_v60 = vld [vmem:[#allocation2 + $0x1a0] sm:$0xff]  ;;  %v3845_v63 = vld [vmem:[#allocation5 + $0x210] sm:$0xf0]  ;;  %v147_v19 = vld [vmem:[#allocation2 + $0x230] sm:$0xf] }
  0x7b   :  { %2094 = vmatpush.bf16.msra.mxu3 %v3992_v40  ;;  %v137_v61 = vld [vmem:[#allocation2 + $0x1e0] sm:$0xff]  ;;  %v3589_v2 = vld [vmem:[#allocation5 + $0x10] sm:$0xf0] }
  0x7c   :  { %1819 = vmatmul.bf16.gmra.mxu2 %v5198_v30  ;;  %2028 = vmatpush.bf16.msra.mxu1 %v3736_v44  ;;  %v4673_v62 = vld [vmem:[#allocation5 + $0x204] sm:$0xf]  ;;  %v3973_v8 = vld [vmem:[#allocation5 + $0x310] sm:$0xf0]  ;;  %v5242_v32 = vpack.c.bf16 %v137_v61, %v129_v60 }
  0x7d   :  { %v4609_v0 = vld [vmem:[#allocation5 + $0x4] sm:$0xf]  ;;  %v3848_v1 = vor.u32 %v4673_v62, %v3845_v63  ;;  %v3717_v13 = vld [vmem:[#allocation5 + $0x110] sm:$0xf0] }
  0x7e   :  { %v4705_v7 = vld [vmem:[#allocation5 + $0x304] sm:$0xf]  ;;  %v3592_v10 = vor.u32 %v4609_v0, %v3589_v2  ;;  %v131_v15 = vld [vmem:[#allocation2 + $0x1b0] sm:$0xff] }
  0x7f   :  { %v3976_v11 = vor.u32 %v4705_v7, %v3973_v8  ;;  %v4641_v12 = vld [vmem:[#allocation5 + $0x104] sm:$0xf]  ;;  %v139_v16 = vld [vmem:[#allocation2 + $0x1f0] sm:$0xff]  ;;  %2062 = vmatpush.bf16.msra.mxu2 %v3848_v1 }
  0x80   :  { %v3720_v17 = vor.u32 %v4641_v12, %v3717_v13  ;;  %1996 = vmatpush.bf16.msra.mxu0 %v3592_v10  ;;  %v5246_v35 = vpack.c.bf16 %v139_v16, %v131_v15  ;;  %v4829_v39 = vld [vmem:[#allocation5 + $0x6e4] sm:$0xf]  ;;  %v4469_v40 = vld [vmem:[#allocation5 + $0x6f0] sm:$0xf0]  ;;  %v145_v16 = vld [vmem:[#allocation2 + $0x220] sm:$0xf] }
  0x81   :  { %2095 = vmatpush.bf16.msra.mxu3 %v3976_v11  ;;  %v4765_v41 = vld [vmem:[#allocation5 + $0x4e4] sm:$0xf]  ;;  %v4472_v42 = vor.u32 %v4829_v39, %v4469_v40  ;;  %v4213_v44 = vld [vmem:[#allocation5 + $0x4f0] sm:$0xf0] }
  0x82   :  { %2029 = vmatpush.bf16.msra.mxu1 %v3720_v17  ;;  %v4861_v60 = vld [vmem:[#allocation5 + $0x7e4] sm:$0xf]  ;;  %v4597_v61 = vld [vmem:[#allocation5 + $0x7f0] sm:$0xf0]  ;;  %v4216_v63 = vor.u32 %v4765_v41, %v4213_v44  ;;  %v5260_v44 = vpack.c.bf16 %v147_v19, %v147_v19 }
  0x83   :  { %v4600_v0 = vor.u32 %v4861_v60, %v4597_v61  ;;  %v4797_v11 = vld [vmem:[#allocation5 + $0x5e4] sm:$0xf]  ;;  %v4341_v12 = vld [vmem:[#allocation5 + $0x5f0] sm:$0xf0] }
  0x84   :  { %v4825_v13 = vld [vmem:[#allocation5 + $0x6c4] sm:$0xf]  ;;  %v4344_v14 = vor.u32 %v4797_v11, %v4341_v12  ;;  %v4453_v15 = vld [vmem:[#allocation5 + $0x6d0] sm:$0xf0] }
  0x85   :  { %v4456_v17 = vor.u32 %v4825_v13, %v4453_v15  ;;  %v4325_v11 = vld [vmem:[#allocation5 + $0x5d0] sm:$0xf0] }
  0x87   :  { %1898 = vmatmul.bf16.vlgmr.msrb.gmra.mxu1 %v5208_v4 }
  0x88   :  { %1865 = vmatmul.bf16.vlgmr.msrb.gmra.mxu0 %v5206_v3  ;;  %2154 = vmatpush.bf16.msrb.mxu1 %v4344_v14 }
  0x89   :  { %1964 = vmatmul.bf16.vlgmr.msrb.gmra.mxu3 %v5212_v6  ;;  %2121 = vmatpush.bf16.msrb.mxu0 %v4216_v63 }
  0x8a   :  { %2220 = vmatpush.bf16.msrb.mxu3 %v4600_v0  ;;  %v4761_v0 = vld [vmem:[#allocation5 + $0x4c4] sm:$0xf] }
  0x8c   :  { %1931 = vmatmul.bf16.vlgmr.msrb.gmra.mxu2 %v5210_v5 }
  0x8d   :  { %2187 = vmatpush.bf16.msrb.mxu2 %v4472_v42  ;;  %v5258_v42 = vpack.c.bf16 %v146_v18, %v146_v18 }
  0x91   :  { %2188 = vmatpush.bf16.msrb.mxu2 %v4456_v17 }
  0x97   :  { %1903 = vmatmul.bf16.gmra.mxu1 %v5220_v46 }
  0x98   :  { %1870 = vmatmul.bf16.gmra.mxu0 %v5218_v45 }
  0x99   :  { %1969 = vmatmul.bf16.gmra.mxu3 %v5224_v52 }
  0x9c   :  { %1936 = vmatmul.bf16.gmra.mxu2 %v5222_v51 }
  0xa7   :  { %1908 = vmatmul.bf16.gmra.mxu1 %v5232_v25 }
  0xa8   :  { %1875 = vmatmul.bf16.gmra.mxu0 %v5230_v20 }
  0xa9   :  { %1974 = vmatmul.bf16.gmra.mxu3 %v5236_v27 }
  0xac   :  { %1941 = vmatmul.bf16.gmra.mxu2 %v5234_v26 }
  0xb4   :  { %v1767_v36 = vpop.f32.mrf.mxu1 }
  0xb5   :  { %v1734_v33 = vpop.f32.mrf.mxu0 }
  0xb6   :  { %v1768_v38 = vadd.f32 %v1767_v36, %v1734_v33  ;;  %v148_v33 = vld [vmem:[#allocation2 + $0x238] sm:$0xf] }
  0xb7   :  { %1913 = vmatmul.bf16.gmra.mxu1 %v5244_v34  ;;  %v5262_v61 = vpack.c.bf16 %v148_v33, %v148_v33 }
  0xb8   :  { %1880 = vmatmul.bf16.gmra.mxu0 %v5242_v32 }
  0xb9   :  { %1979 = vmatmul.bf16.gmra.mxu3 %v5248_v37 }
  0xbc   :  { %1946 = vmatmul.bf16.gmra.mxu2 %v5246_v35  ;;  %v1833_v2 = vpop.f32.mrf.mxu3  ;;  %v1769_v8 = vpop.f32.mrf.mxu1 }
  0xbd   :  { %v1800_v62 = vpop.f32.mrf.mxu2  ;;  %v1736_v7 = vpop.f32.mrf.mxu0 }
  0xbe   :  { %v1801_v1 = vadd.f32 %v1800_v62, %v1768_v38  ;;  %v1770_v10 = vadd.f32 %v1769_v8, %v1736_v7  ;;  %v5256_v38 = vpack.c.bf16 %v145_v16, %v145_v16  ;;  %v4581_v8 = vld [vmem:[#allocation5 + $0x7d0] sm:$0xf0] }
  0xc0   :  { %v5254_v9 = vadd.f32 %v1833_v2, %v1801_v1  ;;  %v4197_v1 = vld [vmem:[#allocation5 + $0x4d0] sm:$0xf0]  ;;  %v4857_v2 = vld [vmem:[#allocation5 + $0x7c4] sm:$0xf] }
  0xc1   :  { %v4200_v7 = vor.u32 %v4761_v0, %v4197_v1  ;;  %v4584_v12 = vor.u32 %v4857_v2, %v4581_v8  ;;  %v4853_v0 = vld [vmem:[#allocation5 + $0x7a4] sm:$0xf]  ;;  %v4565_v1 = vld [vmem:[#allocation5 + $0x7b0] sm:$0xf0] }
  0xc2   :  { %v4568_v8 = vor.u32 %v4853_v0, %v4565_v1  ;;  %v4549_v0 = vld [vmem:[#allocation5 + $0x790] sm:$0xf0]  ;;  %v4785_v1 = vld [vmem:[#allocation5 + $0x584] sm:$0xf] }
  0xc3   :  { %2122 = vmatpush.bf16.msrb.mxu0 %v4200_v7  ;;  %2221 = vmatpush.bf16.msrb.mxu3 %v4584_v12  ;;  %v4789_v7 = vld [vmem:[#allocation5 + $0x5a4] sm:$0xf] }
  0xc4   :  { %v1835_v40 = vpop.f32.mrf.mxu3  ;;  %v1772_v60 = vpop.f32.mrf.mxu1 }
  0xc5   :  { %v1802_v36 = vpop.f32.mrf.mxu2  ;;  %v1739_v41 = vpop.f32.mrf.mxu0 }
  0xc6   :  { %v1803_v39 = vadd.f32 %v1802_v36, %v1770_v10  ;;  %v1773_v63 = vadd.f32 %v1772_v60, %v1739_v41  ;;  %v4793_v10 = vld [vmem:[#allocation5 + $0x5c4] sm:$0xf]  ;;  %v4181_v60 = vld [vmem:[#allocation5 + $0x4b0] sm:$0xf0] }
  0xc7   :  { %1918 = vmatmul.bf16.gmra.mxu1 %v5258_v42  ;;  %v4328_v13 = vor.u32 %v4793_v10, %v4325_v11  ;;  %v4821_v36 = vld [vmem:[#allocation5 + $0x6a4] sm:$0xf]  ;;  %v4309_v10 = vld [vmem:[#allocation5 + $0x5b0] sm:$0xf0]  ;;  %2222 = vmatpush.bf16.msrb.mxu3 %v4568_v8 }
  0xc8   :  { %v5264_v62 = vadd.f32 %v1835_v40, %v1803_v39  ;;  %1885 = vmatmul.bf16.gmra.mxu0 %v5256_v38  ;;  %v4437_v39 = vld [vmem:[#allocation5 + $0x6b0] sm:$0xf0]  ;;  %v4757_v40 = vld [vmem:[#allocation5 + $0x4a4] sm:$0xf]  ;;  %v4312_v11 = vor.u32 %v4789_v7, %v4309_v10 }
  0xc9   :  { %1984 = vmatmul.bf16.gmra.mxu3 %v5262_v61  ;;  %2155 = vmatpush.bf16.msrb.mxu1 %v4328_v13  ;;  %v4440_v41 = vor.u32 %v4821_v36, %v4437_v39  ;;  %v4184_v2 = vor.u32 %v4757_v40, %v4181_v60  ;;  %v4421_v36 = vld [vmem:[#allocation5 + $0x690] sm:$0xf0]  ;;  %v4753_v40 = vld [vmem:[#allocation5 + $0x484] sm:$0xf] }
  0xcb   :  { %2189 = vmatpush.bf16.msrb.mxu2 %v4440_v41  ;;  %2123 = vmatpush.bf16.msrb.mxu0 %v4184_v2  ;;  %v4849_v41 = vld [vmem:[#allocation5 + $0x784] sm:$0xf]  ;;  %v4293_v2 = vld [vmem:[#allocation5 + $0x590] sm:$0xf0] }
  0xcc   :  { %1951 = vmatmul.bf16.gmra.mxu2 %v5260_v44  ;;  %v1838_v16 = vpop.f32.mrf.mxu3  ;;  %v1774_v18 = vpop.f32.mrf.mxu1  ;;  %v4552_v7 = vor.u32 %v4849_v41, %v4549_v0  ;;  %v4296_v10 = vor.u32 %v4785_v1, %v4293_v2  ;;  %v4781_v2 = vld [vmem:[#allocation5 + $0x564] sm:$0xf] }
  0xcd   :  { %v1741_v17 = vpop.f32.mrf.mxu0  ;;  %2156 = vmatpush.bf16.msrb.mxu1 %v4312_v11 }
  0xce   :  { %v1775_v33 = vadd.f32 %v1774_v18, %v1741_v17  ;;  %v4817_v18 = vld [vmem:[#allocation5 + $0x684] sm:$0xf]  ;;  %2223 = vmatpush.bf16.msrb.mxu3 %v4552_v7 }
  0xcf   :  { %v1805_v14 = vpop.f32.mrf.mxu2  ;;  %v4424_v39 = vor.u32 %v4817_v18, %v4421_v36  ;;  %v4813_v18 = vld [vmem:[#allocation5 + $0x664] sm:$0xf]  ;;  %v4405_v36 = vld [vmem:[#allocation5 + $0x670] sm:$0xf0] }
  0xd0   :  { %v1806_v15 = vadd.f32 %v1805_v14, %v1773_v63 }
  0xd1   :  { %2190 = vmatpush.bf16.msrb.mxu2 %v4424_v39  ;;  %2157 = vmatpush.bf16.msrb.mxu1 %v4296_v10  ;;  %v4749_v39 = vld [vmem:[#allocation5 + $0x464] sm:$0xf] }
  0xd2   :  { %v5270_v19 = vadd.f32 %v1838_v16, %v1806_v15 }
  0xd4   :  { %v1840_v13 = vpop.f32.mrf.mxu3  ;;  %v1777_v15 = vpop.f32.mrf.mxu1 }
  0xd5   :  { %v1744_v14 = vpop.f32.mrf.mxu0 }
  0xd6   :  { %v1778_v17 = vadd.f32 %v1777_v15, %v1744_v14 }
  0xd7   :  { %v1807_v63 = vpop.f32.mrf.mxu2  ;;  %2030 = vmatmul.bf16.vlgmr.msra.gmra.mxu1 %v5148_v53 }
  0xd8   :  { %v1808_v12 = vadd.f32 %v1807_v63, %v1775_v33  ;;  %1997 = vmatmul.bf16.vlgmr.msra.gmra.mxu0 %v5146_v48  ;;  %v4165_v33 = vld [vmem:[#allocation5 + $0x490] sm:$0xf0] }
  0xd9   :  { %2096 = vmatmul.bf16.vlgmr.msra.gmra.mxu3 %v5152_v57  ;;  %v4168_v60 = vor.u32 %v4753_v40, %v4165_v33  ;;  %v4408_v40 = vor.u32 %v4813_v18, %v4405_v36  ;;  %v4149_v33 = vld [vmem:[#allocation5 + $0x470] sm:$0xf0]  ;;  %v4845_v57 = vld [vmem:[#allocation5 + $0x764] sm:$0xf] }
  0xda   :  { %v5272_v16 = vadd.f32 %v1840_v13, %v1808_v12  ;;  %v4152_v53 = vor.u32 %v4749_v39, %v4149_v33  ;;  %v4745_v33 = vld [vmem:[#allocation5 + $0x444] sm:$0xf] }
  0xdb   :  { %2124 = vmatpush.bf16.msrb.mxu0 %v4168_v60  ;;  %2191 = vmatpush.bf16.msrb.mxu2 %v4408_v40 }
  0xdc   :  { %2063 = vmatmul.bf16.vlgmr.msra.gmra.mxu2 %v5150_v54  ;;  %v1843_v63 = vpop.f32.mrf.mxu3  ;;  %v1779_v13 = vpop.f32.mrf.mxu1  ;;  %v4533_v54 = vld [vmem:[#allocation5 + $0x770] sm:$0xf0] }
  0xdd   :  { %v1746_v12 = vpop.f32.mrf.mxu0  ;;  %v4536_v41 = vor.u32 %v4845_v57, %v4533_v54  ;;  %v4389_v54 = vld [vmem:[#allocation5 + $0x650] sm:$0xf0] }
  0xde   :  { %v1780_v15 = vadd.f32 %v1779_v13, %v1746_v12 }
  0xdf   :  { %v1810_v8 = vpop.f32.mrf.mxu2  ;;  %2125 = vmatpush.bf16.msrb.mxu0 %v4152_v53  ;;  %2224 = vmatpush.bf16.msrb.mxu3 %v4536_v41  ;;  %v4809_v53 = vld [vmem:[#allocation5 + $0x644] sm:$0xf]  ;;  %v4133_v41 = vld [vmem:[#allocation5 + $0x450] sm:$0xf0] }
  0xe0   :  { %v1811_v11 = vadd.f32 %v1810_v8, %v1778_v17  ;;  %v4277_v8 = vld [vmem:[#allocation5 + $0x570] sm:$0xf0]  ;;  %v4392_v57 = vor.u32 %v4809_v53, %v4389_v54 }
  0xe1   :  { %v4280_v10 = vor.u32 %v4781_v2, %v4277_v8  ;;  %v4261_v2 = vld [vmem:[#allocation5 + $0x550] sm:$0xf0] }
  0xe2   :  { %v5278_v14 = vadd.f32 %v1843_v63, %v1811_v11  ;;  %2192 = vmatpush.bf16.msrb.mxu2 %v4392_v57 }
  0xe3   :  { %2158 = vmatpush.bf16.msrb.mxu1 %v4280_v10 }
  0xe4   :  { %v1845_v0 = vpop.f32.mrf.mxu3  ;;  %v1782_v7 = vpop.f32.mrf.mxu1 }
  0xe5   :  { %v1749_v1 = vpop.f32.mrf.mxu0 }
  0xe6   :  { %v1783_v63 = vadd.f32 %v1782_v7, %v1749_v1  ;;  %v4777_v1 = vld [vmem:[#allocation5 + $0x544] sm:$0xf] }
  0xe7   :  { %v1812_v17 = vpop.f32.mrf.mxu2  ;;  %2035 = vmatmul.bf16.gmra.mxu1 %v5160_v47  ;;  %v4264_v7 = vor.u32 %v4777_v1, %v4261_v2  ;;  %v4773_v1 = vld [vmem:[#allocation5 + $0x524] sm:$0xf]  ;;  %v4245_v2 = vld [vmem:[#allocation5 + $0x530] sm:$0xf0] }
  0xe8   :  { %v1813_v60 = vadd.f32 %v1812_v17, %v1780_v15  ;;  %2002 = vmatmul.bf16.gmra.mxu0 %v5158_v43  ;;  %v4841_v17 = vld [vmem:[#allocation5 + $0x744] sm:$0xf] }
  0xe9   :  { %2101 = vmatmul.bf16.gmra.mxu3 %v5164_v50  ;;  %2159 = vmatpush.bf16.msrb.mxu1 %v4264_v7 }
  0xea   :  { %v5280_v11 = vadd.f32 %v1845_v0, %v1813_v60  ;;  %v4136_v60 = vor.u32 %v4745_v33, %v4133_v41  ;;  %v4517_v0 = vld [vmem:[#allocation5 + $0x750] sm:$0xf0]  ;;  %v4741_v33 = vld [vmem:[#allocation5 + $0x424] sm:$0xf] }
  0xeb   :  { %v4520_v8 = vor.u32 %v4841_v17, %v4517_v0  ;;  %v4117_v41 = vld [vmem:[#allocation5 + $0x430] sm:$0xf0]  ;;  %v4837_v17 = vld [vmem:[#allocation5 + $0x724] sm:$0xf] }
  0xec   :  { %2068 = vmatmul.bf16.gmra.mxu2 %v5162_v49  ;;  %v1848_v15 = vpop.f32.mrf.mxu3  ;;  %v1784_v36 = vpop.f32.mrf.mxu1  ;;  %2126 = vmatpush.bf16.msrb.mxu0 %v4136_v60  ;;  %v4120_v60 = vor.u32 %v4741_v33, %v4117_v41  ;;  %v4737_v33 = vld [vmem:[#allocation5 + $0x404] sm:$0xf] }
  0xed   :  { %v1751_v18 = vpop.f32.mrf.mxu0  ;;  %2225 = vmatpush.bf16.msrb.mxu3 %v4520_v8  ;;  %v4248_v8 = vor.u32 %v4773_v1, %v4245_v2  ;;  %v4229_v1 = vld [vmem:[#allocation5 + $0x510] sm:$0xf0] }
  0xee   :  { %v1785_v40 = vadd.f32 %v1784_v36, %v1751_v18  ;;  %v4373_v18 = vld [vmem:[#allocation5 + $0x630] sm:$0xf0] }
  0xef   :  { %v1815_v12 = vpop.f32.mrf.mxu2  ;;  %2160 = vmatpush.bf16.msrb.mxu1 %v4248_v8 }
  0xf0   :  { %v1816_v13 = vadd.f32 %v1815_v12, %v1783_v63  ;;  %2127 = vmatpush.bf16.msrb.mxu0 %v4120_v60  ;;  %v4769_v60 = vld [vmem:[#allocation5 + $0x504] sm:$0xf] }
  0xf2   :  { %v5286_v39 = vadd.f32 %v1848_v15, %v1816_v13  ;;  %v4805_v15 = vld [vmem:[#allocation5 + $0x624] sm:$0xf] }
  0xf3   :  { %v4376_v36 = vor.u32 %v4805_v15, %v4373_v18  ;;  %v4801_v15 = vld [vmem:[#allocation5 + $0x604] sm:$0xf]  ;;  %v4357_v18 = vld [vmem:[#allocation5 + $0x610] sm:$0xf0] }
  0xf4   :  { %v1850_v53 = vpop.f32.mrf.mxu3  ;;  %v1787_v57 = vpop.f32.mrf.mxu1  ;;  %v4360_v41 = vor.u32 %v4801_v15, %v4357_v18  ;;  %v4091_v18 = vld [vmem:[#allocation5 + $0x3e8] sm:$0xf] }
  0xf5   :  { %v1754_v54 = vpop.f32.mrf.mxu0  ;;  %2193 = vmatpush.bf16.msrb.mxu2 %v4376_v36  ;;  %v4833_v36 = vld [vmem:[#allocation5 + $0x704] sm:$0xf] }
  0xf6   :  { %v1788_v13 = vadd.f32 %v1787_v57, %v1754_v54 }
  0xf7   :  { %v1817_v10 = vpop.f32.mrf.mxu2  ;;  %2040 = vmatmul.bf16.gmra.mxu1 %v5172_v22 }
  0xf8   :  { %v1818_v63 = vadd.f32 %v1817_v10, %v1785_v40  ;;  %2007 = vmatmul.bf16.gmra.mxu0 %v5170_v21  ;;  %v4501_v40 = vld [vmem:[#allocation5 + $0x730] sm:$0xf0] }
  0xf9   :  { %2106 = vmatmul.bf16.gmra.mxu3 %v5176_v24  ;;  %v4504_v0 = vor.u32 %v4837_v17, %v4501_v40  ;;  %v4101_v24 = vld [vmem:[#allocation5 + $0x410] sm:$0xf0]  ;;  %2194 = vmatpush.bf16.msrb.mxu2 %v4360_v41 }
  0xfa   :  { %v5288_v12 = vadd.f32 %v1850_v53, %v1818_v63  ;;  %v4485_v17 = vld [vmem:[#allocation5 + $0x710] sm:$0xf0]  ;;  %v4104_v40 = vor.u32 %v4737_v33, %v4101_v24  ;;  %v3963_v24 = vld [vmem:[#allocation5 + $0x2e8] sm:$0xf]  ;;  %v4736_v33 = vld [vmem:[#allocation5 + $0x3f4] sm:$0xf0] }
  0xfb   :  { %2226 = vmatpush.bf16.msrb.mxu3 %v4504_v0  ;;  %v4232_v0 = vor.u32 %v4769_v60, %v4229_v1 }
  0xfc   :  { %2073 = vmatmul.bf16.gmra.mxu2 %v5174_v23  ;;  %v1853_v63 = vpop.f32.mrf.mxu3  ;;  %v1789_v54 = vpop.f32.mrf.mxu1  ;;  %v4488_v23 = vor.u32 %v4833_v36, %v4485_v17  ;;  %2128 = vmatpush.bf16.msrb.mxu0 %v4104_v40 }
  0xfd   :  { %v1756_v53 = vpop.f32.mrf.mxu0  ;;  %2161 = vmatpush.bf16.msrb.mxu1 %v4232_v0  ;;  %v3707_v54 = vld [vmem:[#allocation5 + $0xe8] sm:$0xf] }
  0xfe   :  { %v4704_v53 = vld [vmem:[#allocation5 + $0x2f4] sm:$0xf0] }
  0xff   :  { %v1820_v7 = vpop.f32.mrf.mxu2  ;;  %2227 = vmatpush.bf16.msrb.mxu3 %v4488_v23  ;;  %v3964_v15 = vor.u32 %v4704_v53, %v3963_v24  ;;  %v4640_v23 = vld [vmem:[#allocation5 + $0xf4] sm:$0xf0]  ;;  %v3947_v24 = vld [vmem:[#allocation5 + $0x2c8] sm:$0xf] }
 0x100   :  { %v1821_v10 = vadd.f32 %v1820_v7, %v1788_v13  ;;  %v3708_v36 = vor.u32 %v4640_v23, %v3707_v54  ;;  %v4700_v53 = vld [vmem:[#allocation5 + $0x2d4] sm:$0xf0] }
 0x101   :  { %2319 = vmatpush.bf16.msra.mxu2 %v3964_v15 }
 0x102   :  { %v5294_v57 = vadd.f32 %v1853_v63, %v1821_v10  ;;  %2253 = vmatpush.bf16.msra.mxu0 %v3708_v36  ;;  %v4636_v36 = vld [vmem:[#allocation5 + $0xd4] sm:$0xf0] }
 0x104   :  { %v1855_v2 = vpop.f32.mrf.mxu3  ;;  %v1899_v10 = vpop.f32.mrf.mxu1 }
 0x105   :  { %v1866_v8 = vpop.f32.mrf.mxu0  ;;  %v3835_v2 = vld [vmem:[#allocation5 + $0x1e8] sm:$0xf] }
 0x106   :  { %v1867_v7 = vadd.f32 %v1866_v8, %v5254_v9  ;;  %v4092_v9 = vor.u32 %v4736_v33, %v4091_v18  ;;  %v4672_v8 = vld [vmem:[#allocation5 + $0x1f4] sm:$0xf0] }
 0x107   :  { %v1822_v13 = vpop.f32.mrf.mxu2  ;;  %2045 = vmatmul.bf16.gmra.mxu1 %v5184_v56 }
 0x108   :  { %v1900_v63 = vadd.f32 %v1899_v10, %v1867_v7  ;;  %2012 = vmatmul.bf16.gmra.mxu0 %v5182_v55  ;;  %2352 = vmatpush.bf16.msra.mxu3 %v4092_v9  ;;  %v3836_v10 = vor.u32 %v4672_v8, %v3835_v2  ;;  %v4075_v9 = vld [vmem:[#allocation5 + $0x3c8] sm:$0xf] }
 0x109   :  { %2111 = vmatmul.bf16.gmra.mxu3 %v5188_v59  ;;  %v3948_v59 = vor.u32 %v4700_v53, %v3947_v24 }
 0x10a   :  { %2286 = vmatpush.bf16.msra.mxu1 %v3836_v10 }
 0x10b   :  { %2320 = vmatpush.bf16.msra.mxu2 %v3948_v59 }
 0x10c   :  { %2078 = vmatmul.bf16.gmra.mxu2 %v5186_v58  ;;  %v1965_v40 = vpop.f32.mrf.mxu3  ;;  %v1901_v0 = vpop.f32.mrf.mxu1 }
 0x10d   :  { %v1868_v60 = vpop.f32.mrf.mxu0 }
 0x10e   :  { %v1869_v1 = vadd.f32 %v1868_v60, %v5264_v62  ;;  %v4732_v60 = vld [vmem:[#allocation5 + $0x3d4] sm:$0xf0] }
 0x10f   :  { %v1932_v41 = vpop.f32.mrf.mxu2  ;;  %v4076_v59 = vor.u32 %v4732_v60, %v4075_v9  ;;  %v3803_v60 = vld [vmem:[#allocation5 + $0x1a8] sm:$0xf] }
 0x110   :  { %v1933_v17 = vadd.f32 %v1932_v41, %v1900_v63  ;;  %v1902_v7 = vadd.f32 %v1901_v0, %v1869_v1  ;;  %v3691_v41 = vld [vmem:[#allocation5 + $0xc8] sm:$0xf]  ;;  %v4668_v0 = vld [vmem:[#allocation5 + $0x1d4] sm:$0xf0] }
 0x111   :  { %v3819_v1 = vld [vmem:[#allocation5 + $0x1c8] sm:$0xf]  ;;  %2353 = vmatpush.bf16.msra.mxu3 %v4076_v59 }
 0x112   :  { %v5302_v13 = vadd.f32 %v1965_v40, %v1933_v17  ;;  %v3692_v40 = vor.u32 %v4636_v36, %v3691_v41  ;;  %v3820_v2 = vor.u32 %v4668_v0, %v3819_v1  ;;  %v4632_v41 = vld [vmem:[#allocation5 + $0xb4] sm:$0xf0]  ;;  %v4059_v36 = vld [vmem:[#allocation5 + $0x3a8] sm:$0xf] }
 0x113   :  { %v4664_v1 = vld [vmem:[#allocation5 + $0x1b4] sm:$0xf0] }
 0x114   :  { %6298 = vst [vmem:[#allocation24_spill] sm:$0xff] %v5302_v13  ;;  %v1967_v23 = vpop.f32.mrf.mxu3  ;;  %v1904_v18 = vpop.f32.mrf.mxu1  ;;  %2254 = vmatpush.bf16.msra.mxu0 %v3692_v40  ;;  %2287 = vmatpush.bf16.msra.mxu1 %v3820_v2  ;;  %v4728_v40 = vld [vmem:[#allocation5 + $0x3b4] sm:$0xf0]  ;;  %v3804_v0 = vor.u32 %v4664_v1, %v3803_v60 }
 0x115   :  { %v1871_v15 = vpop.f32.mrf.mxu0 }
 0x116   :  { %v1872_v62 = vadd.f32 %v1871_v15, %v5270_v19 }
 0x117   :  { %v1934_v63 = vpop.f32.mrf.mxu2  ;;  %2050 = vmatmul.bf16.gmra.mxu1 %v5196_v29 }
 0x118   :  { %v1935_v54 = vadd.f32 %v1934_v63, %v1902_v7  ;;  %v1905_v17 = vadd.f32 %v1904_v18, %v1872_v62  ;;  %2017 = vmatmul.bf16.gmra.mxu0 %v5194_v28  ;;  %v3675_v18 = vld [vmem:[#allocation5 + $0xa8] sm:$0xf]  ;;  %2288 = vmatpush.bf16.msra.mxu1 %v3804_v0 }
 0x119   :  { %2116 = vmatmul.bf16.gmra.mxu3 %v5200_v31  ;;  %v3676_v9 = vor.u32 %v4632_v41, %v3675_v18  ;;  %v4043_v18 = vld [vmem:[#allocation5 + $0x388] sm:$0xf]  ;;  %v4724_v41 = vld [vmem:[#allocation5 + $0x394] sm:$0xf0] }
 0x11a   :  { %v5305_v33 = vadd.f32 %v1967_v23, %v1935_v54  ;;  %v3931_v54 = vld [vmem:[#allocation5 + $0x2a8] sm:$0xf]  ;;  %v4696_v23 = vld [vmem:[#allocation5 + $0x2b4] sm:$0xf0]  ;;  %v4044_v60 = vor.u32 %v4724_v41, %v4043_v18 }
 0x11b   :  { %v3932_v62 = vor.u32 %v4696_v23, %v3931_v54  ;;  %2255 = vmatpush.bf16.msra.mxu0 %v3676_v9  ;;  %v4692_v54 = vld [vmem:[#allocation5 + $0x294] sm:$0xf0] }
 0x11c   :  { %6299 = vst [vmem:[#allocation25_spill] sm:$0xff] %v5305_v33  ;;  %2083 = vmatmul.bf16.gmra.mxu2 %v5198_v30  ;;  %v1970_v7 = vpop.f32.mrf.mxu3  ;;  %v1906_v53 = vpop.f32.mrf.mxu1  ;;  %v4660_v9 = vld [vmem:[#allocation5 + $0x194] sm:$0xf0] }
 0x11d   :  { %v1873_v10 = vpop.f32.mrf.mxu0  ;;  %2321 = vmatpush.bf16.msra.mxu2 %v3932_v62  ;;  %v4628_v62 = vld [vmem:[#allocation5 + $0x94] sm:$0xf0] }
 0x11e   :  { %v1874_v24 = vadd.f32 %v1873_v10, %v5272_v16  ;;  %v4720_v18 = vld [vmem:[#allocation5 + $0x374] sm:$0xf0] }
 0x11f   :  { %v1937_v19 = vpop.f32.mrf.mxu2  ;;  %v4848_v33 = vld [vmem:[#allocation5 + $0x774] sm:$0xf0] }
 0x120   :  { %v1938_v8 = vadd.f32 %v1937_v19, %v1905_v17  ;;  %v1907_v15 = vadd.f32 %v1906_v53, %v1874_v24  ;;  %v4060_v17 = vor.u32 %v4728_v40, %v4059_v36  ;;  %v3915_v53 = vld [vmem:[#allocation5 + $0x288] sm:$0xf] }
 0x121   :  { %v3916_v23 = vor.u32 %v4692_v54, %v3915_v53  ;;  %v3787_v36 = vld [vmem:[#allocation5 + $0x188] sm:$0xf]  ;;  %v4688_v53 = vld [vmem:[#allocation5 + $0x274] sm:$0xf0] }
 0x122   :  { %v5312_v63 = vadd.f32 %v1970_v7, %v1938_v8  ;;  %2354 = vmatpush.bf16.msra.mxu3 %v4060_v17  ;;  %v3788_v1 = vor.u32 %v4660_v9, %v3787_v36  ;;  %v3643_v54 = vld [vmem:[#allocation5 + $0x68] sm:$0xf] }
 0x123   :  { %2322 = vmatpush.bf16.msra.mxu2 %v3916_v23 }
 0x124   :  { %6300 = vst [vmem:[#allocation26_spill] sm:$0xff] %v5312_v63  ;;  %v1972_v2 = vpop.f32.mrf.mxu3  ;;  %v1909_v7 = vpop.f32.mrf.mxu1  ;;  %2289 = vmatpush.bf16.msra.mxu1 %v3788_v1  ;;  %v4539_v63 = vld [vmem:[#allocation5 + $0x768] sm:$0xf] }
 0x125   :  { %v1876_v19 = vpop.f32.mrf.mxu0 }
 0x126   :  { %v1877_v8 = vadd.f32 %v1876_v19, %v5278_v14  ;;  %2355 = vmatpush.bf16.msra.mxu3 %v4044_v60  ;;  %v4656_v60 = vld [vmem:[#allocation5 + $0x174] sm:$0xf0] }
 0x127   :  { %v1939_v59 = vpop.f32.mrf.mxu2  ;;  %2162 = vmatmul.bf16.vlgmr.msrb.gmra.mxu1 %v5208_v4 }
 0x128   :  { %v1940_v16 = vadd.f32 %v1939_v59, %v1907_v15  ;;  %v1910_v24 = vadd.f32 %v1909_v7, %v1877_v8  ;;  %2129 = vmatmul.bf16.vlgmr.msrb.gmra.mxu0 %v5206_v3  ;;  %v3659_v15 = vld [vmem:[#allocation5 + $0x88] sm:$0xf] }
 0x129   :  { %2228 = vmatmul.bf16.vlgmr.msrb.gmra.mxu3 %v5212_v6  ;;  %v3660_v14 = vor.u32 %v4628_v62, %v3659_v15  ;;  %v3899_v7 = vld [vmem:[#allocation5 + $0x268] sm:$0xf]  ;;  %v4624_v15 = vld [vmem:[#allocation5 + $0x74] sm:$0xf0] }
 0x12a   :  { %v5315_v10 = vadd.f32 %v1972_v2, %v1940_v16  ;;  %v3900_v23 = vor.u32 %v4688_v53, %v3899_v7  ;;  %v4027_v62 = vld [vmem:[#allocation5 + $0x368] sm:$0xf]  ;;  %v3644_v41 = vor.u32 %v4624_v15, %v3643_v54 }
 0x12b   :  { %2256 = vmatpush.bf16.msra.mxu0 %v3660_v14 }
 0x12c   :  { %6301 = vst [vmem:[#allocation27_spill] sm:$0xff] %v5315_v10  ;;  %2195 = vmatmul.bf16.vlgmr.msrb.gmra.mxu2 %v5210_v5  ;;  %v1975_v0 = vpop.f32.mrf.mxu3  ;;  %v1911_v2 = vpop.f32.mrf.mxu1  ;;  %v4155_v10 = vld [vmem:[#allocation5 + $0x468] sm:$0xf] }
 0x12d   :  { %v1878_v59 = vpop.f32.mrf.mxu0  ;;  %2323 = vmatpush.bf16.msra.mxu2 %v3900_v23 }
 0x12e   :  { %v1879_v16 = vadd.f32 %v1878_v59, %v5280_v11 }
 0x12f   :  { %v1942_v40 = vpop.f32.mrf.mxu2  ;;  %2257 = vmatpush.bf16.msra.mxu0 %v3644_v41  ;;  %v3627_v41 = vld [vmem:[#allocation5 + $0x48] sm:$0xf] }
 0x130   :  { %v1943_v17 = vadd.f32 %v1942_v40, %v1910_v24  ;;  %v1912_v8 = vadd.f32 %v1911_v2, %v1879_v16  ;;  %v4028_v24 = vor.u32 %v4720_v18, %v4027_v62  ;;  %v3771_v40 = vld [vmem:[#allocation5 + $0x168] sm:$0xf] }
 0x131   :  { %v3883_v2 = vld [vmem:[#allocation5 + $0x248] sm:$0xf] }
 0x132   :  { %v5322_v19 = vadd.f32 %v1975_v0, %v1943_v17  ;;  %2356 = vmatpush.bf16.msra.mxu3 %v4028_v24  ;;  %v3772_v0 = vor.u32 %v4656_v60, %v3771_v40  ;;  %v4620_v24 = vld [vmem:[#allocation5 + $0x54] sm:$0xf0]  ;;  %v3755_v40 = vld [vmem:[#allocation5 + $0x148] sm:$0xf] }
 0x133   :  { %v4652_v60 = vld [vmem:[#allocation5 + $0x154] sm:$0xf0] }
 0x134   :  { %6302 = vst [vmem:[#allocation28_spill] sm:$0xff] %v5322_v19  ;;  %v1977_v9 = vpop.f32.mrf.mxu3  ;;  %v1914_v17 = vpop.f32.mrf.mxu1  ;;  %2290 = vmatpush.bf16.msra.mxu1 %v3772_v0  ;;  %v4816_v19 = vld [vmem:[#allocation5 + $0x674] sm:$0xf0] }
 0x135   :  { %v1881_v11 = vpop.f32.mrf.mxu0 }
 0x136   :  { %v1882_v1 = vadd.f32 %v1881_v11, %v5286_v39  ;;  %v4716_v11 = vld [vmem:[#allocation5 + $0x354] sm:$0xf0] }
 0x137   :  { %v1944_v36 = vpop.f32.mrf.mxu2  ;;  %2167 = vmatmul.bf16.gmra.mxu1 %v5220_v46 }
 0x138   :  { %v1945_v14 = vadd.f32 %v1944_v36, %v1912_v8  ;;  %v1915_v16 = vadd.f32 %v1914_v17, %v1882_v1  ;;  %2134 = vmatmul.bf16.gmra.mxu0 %v5218_v45  ;;  %v4684_v8 = vld [vmem:[#allocation5 + $0x254] sm:$0xf0]  ;;  %v4011_v36 = vld [vmem:[#allocation5 + $0x348] sm:$0xf]  ;;  %v3756_v17 = vor.u32 %v4652_v60, %v3755_v40 }
 0x139   :  { %2233 = vmatmul.bf16.gmra.mxu3 %v5224_v52  ;;  %v3884_v7 = vor.u32 %v4684_v8, %v3883_v2  ;;  %v4012_v1 = vor.u32 %v4716_v11, %v4011_v36  ;;  %v4712_v36 = vld [vmem:[#allocation5 + $0x334] sm:$0xf0] }
 0x13a   :  { %v5325_v59 = vadd.f32 %v1977_v9, %v1945_v14  ;;  %v3628_v9 = vor.u32 %v4620_v24, %v3627_v41  ;;  %2291 = vmatpush.bf16.msra.mxu1 %v3756_v17  ;;  %v4616_v41 = vld [vmem:[#allocation5 + $0x34] sm:$0xf0]  ;;  %v3995_v24 = vld [vmem:[#allocation5 + $0x328] sm:$0xf] }
 0x13b   :  { %2324 = vmatpush.bf16.msra.mxu2 %v3884_v7  ;;  %2357 = vmatpush.bf16.msra.mxu3 %v4012_v1  ;;  %v4648_v11 = vld [vmem:[#allocation5 + $0x134] sm:$0xf0] }
 0x13c   :  { %6303 = vst [vmem:[#allocation29_spill] sm:$0xff] %v5325_v59  ;;  %2200 = vmatmul.bf16.gmra.mxu2 %v5222_v51  ;;  %v1980_v39 = vpop.f32.mrf.mxu3  ;;  %v1916_v62 = vpop.f32.mrf.mxu1  ;;  %2258 = vmatpush.bf16.msra.mxu0 %v3628_v9  ;;  %v3996_v9 = vor.u32 %v4712_v36, %v3995_v24  ;;  %v3723_v36 = vld [vmem:[#allocation5 + $0x108] sm:$0xf]  ;;  %v4760_v59 = vld [vmem:[#allocation5 + $0x4b4] sm:$0xf0] }
 0x13d   :  { %v1883_v23 = vpop.f32.mrf.mxu0 }
 0x13e   :  { %v1884_v15 = vadd.f32 %v1883_v23, %v5288_v12  ;;  %v3611_v23 = vld [vmem:[#allocation5 + $0x28] sm:$0xf] }
 0x13f   :  { %v1947_v53 = vpop.f32.mrf.mxu2  ;;  %2358 = vmatpush.bf16.msra.mxu3 %v3996_v9 }
 0x140   :  { %v1948_v54 = vadd.f32 %v1947_v53, %v1915_v16  ;;  %v1917_v14 = vadd.f32 %v1916_v62, %v1884_v15 }
 0x142   :  { %v5332_v18 = vadd.f32 %v1980_v39, %v1948_v54  ;;  %v3867_v54 = vld [vmem:[#allocation5 + $0x228] sm:$0xf]  ;;  %v4680_v39 = vld [vmem:[#allocation5 + $0x234] sm:$0xf0] }
 0x143   :  { %v3868_v62 = vor.u32 %v4680_v39, %v3867_v54  ;;  %v4612_v39 = vld [vmem:[#allocation5 + $0x14] sm:$0xf0] }
 0x144   :  { %6304 = vst [vmem:[#allocation30_spill] sm:$0xff] %v5332_v18  ;;  %v1982_v2 = vpop.f32.mrf.mxu3  ;;  %v1919_v7 = vpop.f32.mrf.mxu1  ;;  %v4411_v18 = vld [vmem:[#allocation5 + $0x668] sm:$0xf] }
 0x145   :  { %v1886_v12 = vpop.f32.mrf.mxu0  ;;  %2325 = vmatpush.bf16.msra.mxu2 %v3868_v62  ;;  %v4708_v62 = vld [vmem:[#allocation5 + $0x314] sm:$0xf0] }
 0x146   :  { %v1887_v8 = vadd.f32 %v1886_v12, %v5294_v57  ;;  %v3739_v57 = vld [vmem:[#allocation5 + $0x128] sm:$0xf] }
 0x147   :  { %v1949_v0 = vpop.f32.mrf.mxu2  ;;  %2172 = vmatmul.bf16.gmra.mxu1 %v5232_v25  ;;  %v3740_v40 = vor.u32 %v4648_v11, %v3739_v57  ;;  %v3851_v12 = vld [vmem:[#allocation5 + $0x208] sm:$0xf] }
 0x148   :  { %v1950_v16 = vadd.f32 %v1949_v0, %v1917_v14  ;;  %v1920_v15 = vadd.f32 %v1919_v7, %v1887_v8  ;;  %2139 = vmatmul.bf16.gmra.mxu0 %v5230_v20  ;;  %v3612_v14 = vor.u32 %v4616_v41, %v3611_v23  ;;  %v4676_v8 = vld [vmem:[#allocation5 + $0x214] sm:$0xf0]  ;;  %v3595_v7 = vld [vmem:[#allocation5 + $0x8] sm:$0xf] }
 0x149   :  { %2238 = vmatmul.bf16.gmra.mxu3 %v5236_v27  ;;  %2292 = vmatpush.bf16.msra.mxu1 %v3740_v40  ;;  %v3852_v54 = vor.u32 %v4676_v8, %v3851_v12  ;;  %v3979_v23 = vld [vmem:[#allocation5 + $0x308] sm:$0xf]  ;;  %v3596_v41 = vor.u32 %v4612_v39, %v3595_v7  ;;  %v4768_v12 = vld [vmem:[#allocation5 + $0x4f4] sm:$0xf0] }
 0x14a   :  { %v5335_v53 = vadd.f32 %v1982_v2, %v1950_v16  ;;  %2259 = vmatpush.bf16.msra.mxu0 %v3612_v14  ;;  %v3980_v24 = vor.u32 %v4708_v62, %v3979_v23  ;;  %v4644_v14 = vld [vmem:[#allocation5 + $0x114] sm:$0xf0]  ;;  %v4603_v8 = vld [vmem:[#allocation5 + $0x7e8] sm:$0xf] }
 0x14b   :  { %2326 = vmatpush.bf16.msra.mxu2 %v3852_v54  ;;  %v3724_v9 = vor.u32 %v4644_v14, %v3723_v36  ;;  %v4864_v7 = vld [vmem:[#allocation5 + $0x7f4] sm:$0xf0] }
 0x14c   :  { %6305 = vst [vmem:[#allocation31_spill] sm:$0xff] %v5335_v53  ;;  %2205 = vmatmul.bf16.gmra.mxu2 %v5234_v26  ;;  %v1985_v17 = vpop.f32.mrf.mxu3  ;;  %v1921_v16 = vpop.f32.mrf.mxu1  ;;  %2359 = vmatpush.bf16.msra.mxu3 %v3980_v24  ;;  %v4604_v23 = vor.u32 %v4864_v7, %v4603_v8 }
 0x14d   :  { %v1888_v0 = vpop.f32.mrf.mxu0  ;;  %2293 = vmatpush.bf16.msra.mxu1 %v3724_v9 }
 0x14e   :  { %2260 = vmatpush.bf16.msra.mxu0 %v3596_v41  ;;  %v4219_v0 = vld [vmem:[#allocation5 + $0x4e8] sm:$0xf] }
 0x14f   :  { %v1952_v60 = vpop.f32.mrf.mxu2  ;;  %v4220_v39 = vor.u32 %v4768_v12, %v4219_v0 }
 0x150   :  { %v1953_v1 = vadd.f32 %v1952_v60, %v1920_v15  ;;  %2484 = vmatpush.bf16.msrb.mxu3 %v4604_v23  ;;  %v4764_v23 = vld [vmem:[#allocation5 + $0x4d4] sm:$0xf0] }
 0x152   :  { %v5341_v2 = vadd.f32 %v1985_v17, %v1953_v1  ;;  %v4475_v1 = vld [vmem:[#allocation5 + $0x6e8] sm:$0xf]  ;;  %v4832_v17 = vld [vmem:[#allocation5 + $0x6f4] sm:$0xf0]  ;;  %2385 = vmatpush.bf16.msrb.mxu0 %v4220_v39 }
 0x153   :  { %v4476_v16 = vor.u32 %v4832_v17, %v4475_v1  ;;  %v4828_v1 = vld [vmem:[#allocation5 + $0x6d4] sm:$0xf0]  ;;  %v4203_v39 = vld [vmem:[#allocation5 + $0x4c8] sm:$0xf] }
 0x154   :  { %6306 = vst [vmem:[#allocation32_spill] sm:$0xff] %v5341_v2  ;;  %v1987_v57 = vpop.f32.mrf.mxu3  ;;  %v2031_v40 = vpop.f32.mrf.mxu1  ;;  %v4820_v2 = vld [vmem:[#allocation5 + $0x694] sm:$0xf0] }
 0x155   :  { %v1998_v11 = vpop.f32.mrf.mxu0  ;;  %2451 = vmatpush.bf16.msrb.mxu2 %v4476_v16  ;;  %v4800_v57 = vld [vmem:[#allocation5 + $0x5f4] sm:$0xf0] }
 0x156   :  { %v2032_v60 = vadd.f32 %v2031_v40, %v1998_v11  ;;  %v4459_v11 = vld [vmem:[#allocation5 + $0x6c8] sm:$0xf] }
 0x157   :  { %v1954_v15 = vpop.f32.mrf.mxu2  ;;  %2177 = vmatmul.bf16.gmra.mxu1 %v5244_v34  ;;  %v4460_v17 = vor.u32 %v4828_v1, %v4459_v11 }
 0x158   :  { %2144 = vmatmul.bf16.gmra.mxu0 %v5242_v32  ;;  %v4347_v15 = vld [vmem:[#allocation5 + $0x5e8] sm:$0xf] }
 0x159   :  { %2243 = vmatmul.bf16.gmra.mxu3 %v5248_v37  ;;  %v4348_v40 = vor.u32 %v4800_v57, %v4347_v15  ;;  %2452 = vmatpush.bf16.msrb.mxu2 %v4460_v17  ;;  %v4796_v15 = vld [vmem:[#allocation5 + $0x5d4] sm:$0xf0] }
 0x15b   :  { %2418 = vmatpush.bf16.msrb.mxu1 %v4348_v40 }
 0x15c   :  { %2210 = vmatmul.bf16.gmra.mxu2 %v5246_v35  ;;  %v2097_v41 = vpop.f32.mrf.mxu3  ;;  %v2033_v36 = vpop.f32.mrf.mxu1 }
 0x15d   :  { %v2000_v24 = vpop.f32.mrf.mxu0 }
 0x15e   :  { %v2034_v9 = vadd.f32 %v2033_v36, %v2000_v24  ;;  %v4860_v24 = vld [vmem:[#allocation5 + $0x7d4] sm:$0xf0]  ;;  %v4331_v36 = vld [vmem:[#allocation5 + $0x5c8] sm:$0xf] }
 0x15f   :  { %v2064_v54 = vpop.f32.mrf.mxu2  ;;  %v4332_v57 = vor.u32 %v4796_v15, %v4331_v36 }
 0x160   :  { %v2065_v62 = vadd.f32 %v2064_v54, %v2032_v60 }
 0x161   :  { %2419 = vmatpush.bf16.msrb.mxu1 %v4332_v57 }
 0x162   :  { %v5347_v14 = vadd.f32 %v2097_v41, %v2065_v62  ;;  %v4587_v62 = vld [vmem:[#allocation5 + $0x7c8] sm:$0xf]  ;;  %v4204_v41 = vor.u32 %v4764_v23, %v4203_v39 }
 0x163   :  { %v4187_v39 = vld [vmem:[#allocation5 + $0x4a8] sm:$0xf] }
 0x164   :  { %v2099_v60 = vpop.f32.mrf.mxu3  ;;  %v2036_v7 = vpop.f32.mrf.mxu1  ;;  %2386 = vmatpush.bf16.msrb.mxu0 %v4204_v41  ;;  %v4188_v36 = vor.u32 %v4760_v59, %v4187_v39  ;;  %v4315_v41 = vld [vmem:[#allocation5 + $0x5a8] sm:$0xf] }
 0x165   :  { %v2003_v8 = vpop.f32.mrf.mxu0  ;;  %v6307_v39 = vld [vmem:[#allocation15_spill] sm:$0xff] }
 0x166   :  { %v2037_v54 = vadd.f32 %v2036_v7, %v2003_v8  ;;  %v4443_v8 = vld [vmem:[#allocation5 + $0x6a8] sm:$0xf]  ;;  %v4824_v7 = vld [vmem:[#allocation5 + $0x6b4] sm:$0xf0] }
 0x167   :  { %v2066_v0 = vpop.f32.mrf.mxu2  ;;  %2182 = vmatmul.bf16.gmra.mxu1 %v5258_v42  ;;  %v4444_v23 = vor.u32 %v4824_v7, %v4443_v8  ;;  %v4427_v7 = vld [vmem:[#allocation5 + $0x688] sm:$0xf] }
 0x168   :  { %v2067_v12 = vadd.f32 %v2066_v0, %v2034_v9  ;;  %2149 = vmatmul.bf16.gmra.mxu0 %v5256_v38  ;;  %v4588_v9 = vor.u32 %v4860_v24, %v4587_v62  ;;  %v4571_v62 = vld [vmem:[#allocation5 + $0x7a8] sm:$0xf]  ;;  %v4856_v24 = vld [vmem:[#allocation5 + $0x7b4] sm:$0xf0]  ;;  %v4428_v59 = vor.u32 %v4820_v2, %v4427_v7 }
 0x169   :  { %2248 = vmatmul.bf16.gmra.mxu3 %v5262_v61  ;;  %v4572_v15 = vor.u32 %v4856_v24, %v4571_v62  ;;  %2453 = vmatpush.bf16.msrb.mxu2 %v4444_v23  ;;  %v6308_v23 = vld [vmem:[#allocation16_spill] sm:$0xff]  ;;  %v6309_v62 = vld [vmem:[#allocation17_spill] sm:$0xff]  ;;  %v4171_v24 = vld [vmem:[#allocation5 + $0x488] sm:$0xf] }
 0x16a   :  { %v5349_v16 = vadd.f32 %v2099_v60, %v2067_v12  ;;  %2485 = vmatpush.bf16.msrb.mxu3 %v4588_v9  ;;  %v4792_v9 = vld [vmem:[#allocation5 + $0x5b4] sm:$0xf0]  ;;  %2387 = vmatpush.bf16.msrb.mxu0 %v4188_v36  ;;  %v4555_v36 = vld [vmem:[#allocation5 + $0x788] sm:$0xf] }
 0x16b   :  { %v4316_v57 = vor.u32 %v4792_v9, %v4315_v41  ;;  %v4852_v41 = vld [vmem:[#allocation5 + $0x794] sm:$0xf0]  ;;  %v4299_v9 = vld [vmem:[#allocation5 + $0x588] sm:$0xf] }
 0x16c   :  { %2215 = vmatmul.bf16.gmra.mxu2 %v5260_v44  ;;  %v2102_v1 = vpop.f32.mrf.mxu3  ;;  %v2038_v0 = vpop.f32.mrf.mxu1 }
 0x16d   :  { %v2005_v17 = vpop.f32.mrf.mxu0  ;;  %2420 = vmatpush.bf16.msrb.mxu1 %v4316_v57  ;;  %2454 = vmatpush.bf16.msrb.mxu2 %v4428_v59  ;;  %v4788_v57 = vld [vmem:[#allocation5 + $0x594] sm:$0xf0] }
 0x16e   :  { %v2039_v60 = vadd.f32 %v2038_v0, %v2005_v17  ;;  %2486 = vmatpush.bf16.msrb.mxu3 %v4572_v15 }
 0x16f   :  { %v2069_v11 = vpop.f32.mrf.mxu2 }
 0x170   :  { %v2070_v40 = vadd.f32 %v2069_v11, %v2037_v54 }
 0x172   :  { %v5355_v12 = vadd.f32 %v2102_v1, %v2070_v40 }
 0x174   :  { %v2104_v40 = vpop.f32.mrf.mxu3  ;;  %v2041_v17 = vpop.f32.mrf.mxu1 }
 0x175   :  { %v2008_v1 = vpop.f32.mrf.mxu0 }
 0x176   :  { %v2042_v8 = vadd.f32 %v2041_v17, %v2008_v1 }
 0x177   :  { %v2071_v54 = vpop.f32.mrf.mxu2  ;;  %2294 = vmatmul.bf16.vlgmr.msra.gmra.mxu1 %v6307_v39 }
 0x178   :  { %v2072_v11 = vadd.f32 %v2071_v54, %v2039_v60  ;;  %2261 = vmatmul.bf16.vlgmr.msra.gmra.mxu0 %v5146_v48  ;;  %v4756_v60 = vld [vmem:[#allocation5 + $0x494] sm:$0xf0] }
 0x179   :  { %2360 = vmatmul.bf16.vlgmr.msra.gmra.mxu3 %v6309_v62  ;;  %v4172_v15 = vor.u32 %v4756_v60, %v4171_v24  ;;  %v4412_v24 = vor.u32 %v4816_v19, %v4411_v18  ;;  %v4752_v60 = vld [vmem:[#allocation5 + $0x474] sm:$0xf0] }
 0x17a   :  { %v5357_v0 = vadd.f32 %v2104_v40, %v2072_v11  ;;  %v4556_v11 = vor.u32 %v4852_v41, %v4555_v36  ;;  %v4300_v40 = vor.u32 %v4788_v57, %v4299_v9  ;;  %v4156_v13 = vor.u32 %v4752_v60, %v4155_v10  ;;  %v4283_v57 = vld [vmem:[#allocation5 + $0x568] sm:$0xf] }
 0x17b   :  { %2388 = vmatpush.bf16.msrb.mxu0 %v4172_v15  ;;  %v4540_v36 = vor.u32 %v4848_v33, %v4539_v63  ;;  %2455 = vmatpush.bf16.msrb.mxu2 %v4412_v24  ;;  %v4812_v33 = vld [vmem:[#allocation5 + $0x654] sm:$0xf0]  ;;  %v4139_v60 = vld [vmem:[#allocation5 + $0x448] sm:$0xf] }
 0x17c   :  { %2327 = vmatmul.bf16.vlgmr.msra.gmra.mxu2 %v6308_v23  ;;  %v2107_v17 = vpop.f32.mrf.mxu3  ;;  %v2043_v7 = vpop.f32.mrf.mxu1  ;;  %2487 = vmatpush.bf16.msrb.mxu3 %v4556_v11 }
 0x17d   :  { %v2010_v2 = vpop.f32.mrf.mxu0  ;;  %2421 = vmatpush.bf16.msrb.mxu1 %v4300_v40 }
 0x17e   :  { %v2044_v59 = vadd.f32 %v2043_v7, %v2010_v2 }
 0x17f   :  { %v2074_v54 = vpop.f32.mrf.mxu2  ;;  %2389 = vmatpush.bf16.msrb.mxu0 %v4156_v13  ;;  %v4395_v13 = vld [vmem:[#allocation5 + $0x648] sm:$0xf] }
 0x180   :  { %v2075_v1 = vadd.f32 %v2074_v54, %v2042_v8  ;;  %2488 = vmatpush.bf16.msrb.mxu3 %v4540_v36  ;;  %v4784_v54 = vld [vmem:[#allocation5 + $0x574] sm:$0xf0]  ;;  %v4396_v63 = vor.u32 %v4812_v33, %v4395_v13 }
 0x181   :  { %v4284_v40 = vor.u32 %v4784_v54, %v4283_v57  ;;  %v4748_v36 = vld [vmem:[#allocation5 + $0x454] sm:$0xf0] }
 0x182   :  { %v5363_v53 = vadd.f32 %v2107_v17, %v2075_v1  ;;  %2456 = vmatpush.bf16.msrb.mxu2 %v4396_v63  ;;  %v4780_v57 = vld [vmem:[#allocation5 + $0x554] sm:$0xf0] }
 0x183   :  { %2422 = vmatpush.bf16.msrb.mxu1 %v4284_v40 }
 0x184   :  { %v2109_v41 = vpop.f32.mrf.mxu3  ;;  %v2046_v11 = vpop.f32.mrf.mxu1 }
 0x185   :  { %v2013_v9 = vpop.f32.mrf.mxu0 }
 0x186   :  { %v2047_v17 = vadd.f32 %v2046_v11, %v2013_v9  ;;  %v4267_v9 = vld [vmem:[#allocation5 + $0x548] sm:$0xf] }
 0x187   :  { %v2076_v8 = vpop.f32.mrf.mxu2  ;;  %2299 = vmatmul.bf16.gmra.mxu1 %v5160_v47  ;;  %v4268_v11 = vor.u32 %v4780_v57, %v4267_v9 }
 0x188   :  { %v2077_v15 = vadd.f32 %v2076_v8, %v2044_v59  ;;  %2266 = vmatmul.bf16.gmra.mxu0 %v5158_v43  ;;  %v4523_v8 = vld [vmem:[#allocation5 + $0x748] sm:$0xf] }
 0x189   :  { %2365 = vmatmul.bf16.gmra.mxu3 %v5164_v50  ;;  %2423 = vmatpush.bf16.msrb.mxu1 %v4268_v11  ;;  %v4776_v11 = vld [vmem:[#allocation5 + $0x534] sm:$0xf0] }
 0x18a   :  { %v5365_v1 = vadd.f32 %v2109_v41, %v2077_v15  ;;  %v4140_v15 = vor.u32 %v4748_v36, %v4139_v60  ;;  %v4844_v41 = vld [vmem:[#allocation5 + $0x754] sm:$0xf0]  ;;  %v4123_v60 = vld [vmem:[#allocation5 + $0x428] sm:$0xf]  ;;  %v6311_v36 = vld [vmem:[#allocation22_spill] sm:$0xff] }
 0x18b   :  { %v4524_v54 = vor.u32 %v4844_v41, %v4523_v8  ;;  %v4744_v8 = vld [vmem:[#allocation5 + $0x434] sm:$0xf0] }
 0x18c   :  { %2332 = vmatmul.bf16.gmra.mxu2 %v5162_v49  ;;  %v2112_v18 = vpop.f32.mrf.mxu3  ;;  %v2048_v7 = vpop.f32.mrf.mxu1  ;;  %2390 = vmatpush.bf16.msrb.mxu0 %v4140_v15  ;;  %v4507_v15 = vld [vmem:[#allocation5 + $0x728] sm:$0xf]  ;;  %v4840_v41 = vld [vmem:[#allocation5 + $0x734] sm:$0xf0]  ;;  %v4124_v9 = vor.u32 %v4744_v8, %v4123_v60 }
 0x18d   :  { %v2015_v2 = vpop.f32.mrf.mxu0  ;;  %2489 = vmatpush.bf16.msrb.mxu3 %v4524_v54  ;;  %v4508_v57 = vor.u32 %v4840_v41, %v4507_v15  ;;  %v4251_v54 = vld [vmem:[#allocation5 + $0x528] sm:$0xf]  ;;  %v4740_v60 = vld [vmem:[#allocation5 + $0x414] sm:$0xf0] }
 0x18e   :  { %v2049_v24 = vadd.f32 %v2048_v7, %v2015_v2  ;;  %v4379_v2 = vld [vmem:[#allocation5 + $0x628] sm:$0xf]  ;;  %v4808_v7 = vld [vmem:[#allocation5 + $0x634] sm:$0xf0] }
 0x18f   :  { %v2079_v10 = vpop.f32.mrf.mxu2  ;;  %v4491_v8 = vld [vmem:[#allocation5 + $0x708] sm:$0xf]  ;;  %v4836_v15 = vld [vmem:[#allocation5 + $0x714] sm:$0xf0] }
 0x190   :  { %v2080_v19 = vadd.f32 %v2079_v10, %v2047_v17  ;;  %2391 = vmatpush.bf16.msrb.mxu0 %v4124_v9  ;;  %v4492_v50 = vor.u32 %v4836_v15, %v4491_v8 }
 0x191   :  { %2490 = vmatpush.bf16.msrb.mxu3 %v4508_v57 }
 0x192   :  { %v5371_v59 = vadd.f32 %v2112_v18, %v2080_v19  ;;  %v6310_v18 = vld [vmem:[#allocation21_spill] sm:$0xff] }
 0x194   :  { %v2114_v17 = vpop.f32.mrf.mxu3  ;;  %v2051_v63 = vpop.f32.mrf.mxu1 }
 0x195   :  { %v2018_v33 = vpop.f32.mrf.mxu0  ;;  %2491 = vmatpush.bf16.msrb.mxu3 %v4492_v50  ;;  %v4093_v50 = vld [vmem:[#allocation5 + $0x3f8] sm:$0xf0] }
 0x196   :  { %v2052_v19 = vadd.f32 %v2051_v63, %v2018_v33 }
 0x197   :  { %v2081_v40 = vpop.f32.mrf.mxu2  ;;  %2304 = vmatmul.bf16.gmra.mxu1 %v5172_v22 }
 0x198   :  { %v2082_v13 = vadd.f32 %v2081_v40, %v2049_v24  ;;  %2271 = vmatmul.bf16.gmra.mxu0 %v5170_v21  ;;  %v4380_v24 = vor.u32 %v4808_v7, %v4379_v2  ;;  %v4363_v2 = vld [vmem:[#allocation5 + $0x608] sm:$0xf]  ;;  %v4804_v7 = vld [vmem:[#allocation5 + $0x614] sm:$0xf0] }
 0x199   :  { %2370 = vmatmul.bf16.gmra.mxu3 %v6311_v36  ;;  %v4107_v36 = vld [vmem:[#allocation5 + $0x408] sm:$0xf]  ;;  %v4364_v21 = vor.u32 %v4804_v7, %v4363_v2  ;;  %v3709_v2 = vld [vmem:[#allocation5 + $0xf8] sm:$0xf0]  ;;  %v4734_v7 = vld [vmem:[#allocation5 + $0x3ec] sm:$0xf] }
 0x19a   :  { %v5373_v10 = vadd.f32 %v2114_v17, %v2082_v13  ;;  %2457 = vmatpush.bf16.msrb.mxu2 %v4380_v24  ;;  %v4252_v13 = vor.u32 %v4776_v11, %v4251_v54  ;;  %v4108_v41 = vor.u32 %v4740_v60, %v4107_v36  ;;  %v4235_v24 = vld [vmem:[#allocation5 + $0x508] sm:$0xf]  ;;  %v4772_v54 = vld [vmem:[#allocation5 + $0x514] sm:$0xf0]  ;;  %v4096_v8 = vor.u32 %v4734_v7, %v4093_v50 }
 0x19b   :  { %v4236_v11 = vor.u32 %v4772_v54, %v4235_v24  ;;  %v6312_v36 = vld [vmem:[#allocation23_spill] sm:$0xff] }
 0x19c   :  { %2337 = vmatmul.bf16.gmra.mxu2 %v6310_v18  ;;  %v2117_v33 = vpop.f32.mrf.mxu3  ;;  %v2053_v18 = vpop.f32.mrf.mxu1  ;;  %2424 = vmatpush.bf16.msrb.mxu1 %v4252_v13 }
 0x19d   :  { %v2020_v63 = vpop.f32.mrf.mxu0  ;;  %2392 = vmatpush.bf16.msrb.mxu0 %v4108_v41  ;;  %2616 = vmatpush.bf16.msra.mxu3 %v4096_v8  ;;  %v3693_v8 = vld [vmem:[#allocation5 + $0xd8] sm:$0xf0] }
 0x19e   :  { %2458 = vmatpush.bf16.msrb.mxu2 %v4364_v21  ;;  %v3965_v21 = vld [vmem:[#allocation5 + $0x2f8] sm:$0xf0] }
 0x19f   :  { %v2084_v40 = vpop.f32.mrf.mxu2 }
 0x1a0   :  { %v2085_v17 = vadd.f32 %v2084_v40, %v2052_v19  ;;  %2425 = vmatpush.bf16.msrb.mxu1 %v4236_v11 }
 0x1a2   :  { %v5379_v22 = vadd.f32 %v2117_v33, %v2085_v17  ;;  %v4702_v17 = vld [vmem:[#allocation5 + $0x2ec] sm:$0xf] }
 0x1a3   :  { %v4638_v33 = vld [vmem:[#allocation5 + $0xec] sm:$0xf]  ;;  %v3968_v63 = vor.u32 %v4702_v17, %v3965_v21  ;;  %v3949_v21 = vld [vmem:[#allocation5 + $0x2d8] sm:$0xf0] }
 0x1a4   :  { %v2119_v9 = vpop.f32.mrf.mxu3  ;;  %v2163_v40 = vpop.f32.mrf.mxu1 }
 0x1a5   :  { %v2130_v57 = vpop.f32.mrf.mxu0  ;;  %2583 = vmatpush.bf16.msra.mxu2 %v3968_v63 }
 0x1a6   :  { %v2131_v18 = vadd.f32 %v2130_v57, %v5347_v14  ;;  %v3712_v14 = vor.u32 %v4638_v33, %v3709_v2  ;;  %v4670_v57 = vld [vmem:[#allocation5 + $0x1ec] sm:$0xf] }
 0x1a7   :  { %v2086_v19 = vpop.f32.mrf.mxu2  ;;  %2309 = vmatmul.bf16.gmra.mxu1 %v5184_v56 }
 0x1a8   :  { %v2164_v13 = vadd.f32 %v2163_v40, %v2131_v18  ;;  %2276 = vmatmul.bf16.gmra.mxu0 %v5182_v55  ;;  %v3837_v18 = vld [vmem:[#allocation5 + $0x1f8] sm:$0xf0]  ;;  %v4698_v40 = vld [vmem:[#allocation5 + $0x2cc] sm:$0xf] }
 0x1a9   :  { %2375 = vmatmul.bf16.gmra.mxu3 %v6312_v36  ;;  %2517 = vmatpush.bf16.msra.mxu0 %v3712_v14  ;;  %v3840_v17 = vor.u32 %v4670_v57, %v3837_v18  ;;  %v3952_v36 = vor.u32 %v4698_v40, %v3949_v21  ;;  %v4634_v14 = vld [vmem:[#allocation5 + $0xcc] sm:$0xf] }
 0x1ab   :  { %2550 = vmatpush.bf16.msra.mxu1 %v3840_v17  ;;  %2584 = vmatpush.bf16.msra.mxu2 %v3952_v36  ;;  %v4666_v36 = vld [vmem:[#allocation5 + $0x1cc] sm:$0xf] }
 0x1ac   :  { %2342 = vmatmul.bf16.gmra.mxu2 %v5186_v58  ;;  %v2229_v41 = vpop.f32.mrf.mxu3  ;;  %v2165_v19 = vpop.f32.mrf.mxu1 }
 0x1ad   :  { %v2132_v24 = vpop.f32.mrf.mxu0 }
 0x1ae   :  { %v2133_v54 = vadd.f32 %v2132_v24, %v5349_v16  ;;  %v4077_v24 = vld [vmem:[#allocation5 + $0x3d8] sm:$0xf0] }
 0x1af   :  { %v2196_v60 = vpop.f32.mrf.mxu2 }
 0x1b0   :  { %v2197_v15 = vadd.f32 %v2196_v60, %v2164_v13  ;;  %v2166_v9 = vadd.f32 %v2165_v19, %v2133_v54  ;;  %v3821_v54 = vld [vmem:[#allocation5 + $0x1d8] sm:$0xf0] }
 0x1b1   :  { %v3824_v19 = vor.u32 %v4666_v36, %v3821_v54  ;;  %v3805_v36 = vld [vmem:[#allocation5 + $0x1b8] sm:$0xf0] }
 0x1b2   :  { %v5387_v11 = vadd.f32 %v2229_v41, %v2197_v15  ;;  %v4730_v15 = vld [vmem:[#allocation5 + $0x3cc] sm:$0xf]  ;;  %v3696_v41 = vor.u32 %v4634_v14, %v3693_v8  ;;  %v3677_v14 = vld [vmem:[#allocation5 + $0xb8] sm:$0xf0] }
 0x1b3   :  { %2551 = vmatpush.bf16.msra.mxu1 %v3824_v19  ;;  %v4726_v8 = vld [vmem:[#allocation5 + $0x3ac] sm:$0xf] }
 0x1b4   :  { %v2231_v2 = vpop.f32.mrf.mxu3  ;;  %v2168_v63 = vpop.f32.mrf.mxu1  ;;  %2518 = vmatpush.bf16.msra.mxu0 %v3696_v41 }
 0x1b5   :  { %v2135_v7 = vpop.f32.mrf.mxu0 }
 0x1b6   :  { %v2136_v16 = vadd.f32 %v2135_v7, %v5355_v12  ;;  %v4080_v12 = vor.u32 %v4730_v15, %v4077_v24  ;;  %v3933_v7 = vld [vmem:[#allocation5 + $0x2b8] sm:$0xf0] }
 0x1b7   :  { %v2198_v33 = vpop.f32.mrf.mxu2  ;;  %2314 = vmatmul.bf16.gmra.mxu1 %v5196_v29  ;;  %v4061_v15 = vld [vmem:[#allocation5 + $0x3b8] sm:$0xf0] }
 0x1b8   :  { %v2199_v13 = vadd.f32 %v2198_v33, %v2166_v9  ;;  %v2169_v60 = vadd.f32 %v2168_v63, %v2136_v16  ;;  %2281 = vmatmul.bf16.gmra.mxu0 %v5194_v28  ;;  %2617 = vmatpush.bf16.msra.mxu3 %v4080_v12  ;;  %v4630_v16 = vld [vmem:[#allocation5 + $0xac] sm:$0xf]  ;;  %v4064_v41 = vor.u32 %v4726_v8, %v4061_v15  ;;  %v3789_v15 = vld [vmem:[#allocation5 + $0x198] sm:$0xf0] }
 0x1b9   :  { %2380 = vmatmul.bf16.gmra.mxu3 %v5200_v31  ;;  %v3680_v24 = vor.u32 %v4630_v16, %v3677_v14  ;;  %v3661_v16 = vld [vmem:[#allocation5 + $0x98] sm:$0xf0]  ;;  %v4658_v8 = vld [vmem:[#allocation5 + $0x18c] sm:$0xf] }
 0x1ba   :  { %v5390_v50 = vadd.f32 %v2231_v2, %v2199_v13  ;;  %v4694_v2 = vld [vmem:[#allocation5 + $0x2ac] sm:$0xf]  ;;  %v4045_v14 = vld [vmem:[#allocation5 + $0x398] sm:$0xf0] }
 0x1bb   :  { %v3936_v63 = vor.u32 %v4694_v2, %v3933_v7  ;;  %2519 = vmatpush.bf16.msra.mxu0 %v3680_v24  ;;  %v3917_v2 = vld [vmem:[#allocation5 + $0x298] sm:$0xf0]  ;;  %v4626_v7 = vld [vmem:[#allocation5 + $0x8c] sm:$0xf] }
 0x1bc   :  { %2347 = vmatmul.bf16.gmra.mxu2 %v5198_v30  ;;  %v2234_v18 = vpop.f32.mrf.mxu3  ;;  %v2170_v21 = vpop.f32.mrf.mxu1  ;;  %2618 = vmatpush.bf16.msra.mxu3 %v4064_v41 }
 0x1bd   :  { %v2137_v40 = vpop.f32.mrf.mxu0  ;;  %2585 = vmatpush.bf16.msra.mxu2 %v3936_v63  ;;  %v4722_v63 = vld [vmem:[#allocation5 + $0x38c] sm:$0xf] }
 0x1be   :  { %v2138_v17 = vadd.f32 %v2137_v40, %v5357_v0  ;;  %v4048_v41 = vor.u32 %v4722_v63, %v4045_v14  ;;  %v4029_v63 = vld [vmem:[#allocation5 + $0x378] sm:$0xf0] }
 0x1bf   :  { %v2201_v9 = vpop.f32.mrf.mxu2 }
 0x1c0   :  { %v2202_v57 = vadd.f32 %v2201_v9, %v2169_v60  ;;  %v2171_v13 = vadd.f32 %v2170_v21, %v2138_v17  ;;  %v4662_v60 = vld [vmem:[#allocation5 + $0x1ac] sm:$0xf]  ;;  %2619 = vmatpush.bf16.msra.mxu3 %v4048_v41  ;;  %v3773_v41 = vld [vmem:[#allocation5 + $0x178] sm:$0xf0] }
 0x1c1   :  { %v3808_v12 = vor.u32 %v4662_v60, %v3805_v36  ;;  %v4690_v21 = vld [vmem:[#allocation5 + $0x28c] sm:$0xf]  ;;  %v3792_v60 = vor.u32 %v4658_v8, %v3789_v15 }
 0x1c2   :  { %v5397_v33 = vadd.f32 %v2234_v18, %v2202_v57 }
 0x1c3   :  { %2552 = vmatpush.bf16.msra.mxu1 %v3808_v12 }
 0x1c4   :  { %v2236_v0 = vpop.f32.mrf.mxu3  ;;  %v2173_v18 = vpop.f32.mrf.mxu1 }
 0x1c5   :  { %v2140_v9 = vpop.f32.mrf.mxu0 }
 0x1c6   :  { %v2141_v57 = vadd.f32 %v2140_v9, %v5363_v53  ;;  %v3664_v53 = vor.u32 %v4626_v7, %v3661_v16  ;;  %v3645_v16 = vld [vmem:[#allocation5 + $0x78] sm:$0xf0] }
 0x1c7   :  { %v2203_v54 = vpop.f32.mrf.mxu2  ;;  %2426 = vmatmul.bf16.vlgmr.msrb.gmra.mxu1 %v5208_v4 }
 0x1c8   :  { %v2204_v19 = vadd.f32 %v2203_v54, %v2171_v13  ;;  %v2174_v17 = vadd.f32 %v2173_v18, %v2141_v57  ;;  %2393 = vmatmul.bf16.vlgmr.msrb.gmra.mxu0 %v5206_v3  ;;  %v3920_v13 = vor.u32 %v4690_v21, %v3917_v2  ;;  %2553 = vmatpush.bf16.msra.mxu1 %v3792_v60  ;;  %v4686_v18 = vld [vmem:[#allocation5 + $0x26c] sm:$0xf]  ;;  %v3901_v21 = vld [vmem:[#allocation5 + $0x278] sm:$0xf0] }
 0x1c9   :  { %2492 = vmatmul.bf16.vlgmr.msrb.gmra.mxu3 %v5212_v6  ;;  %2520 = vmatpush.bf16.msra.mxu0 %v3664_v53  ;;  %v4622_v2 = vld [vmem:[#allocation5 + $0x6c] sm:$0xf]  ;;  %v3904_v7 = vor.u32 %v4686_v18, %v3901_v21 }
 0x1ca   :  { %v5400_v40 = vadd.f32 %v2236_v0, %v2204_v19  ;;  %2586 = vmatpush.bf16.msra.mxu2 %v3920_v13  ;;  %v4718_v13 = vld [vmem:[#allocation5 + $0x36c] sm:$0xf] }
 0x1cb   :  { %v4032_v8 = vor.u32 %v4718_v13, %v4029_v63 }
 0x1cc   :  { %2459 = vmatmul.bf16.vlgmr.msrb.gmra.mxu2 %v5210_v5  ;;  %v2239_v54 = vpop.f32.mrf.mxu3  ;;  %v2175_v0 = vpop.f32.mrf.mxu1 }
 0x1cd   :  { %v2142_v12 = vpop.f32.mrf.mxu0  ;;  %2620 = vmatpush.bf16.msra.mxu3 %v4032_v8  ;;  %v4714_v8 = vld [vmem:[#allocation5 + $0x34c] sm:$0xf] }
 0x1ce   :  { %v2143_v19 = vadd.f32 %v2142_v12, %v5365_v1  ;;  %2587 = vmatpush.bf16.msra.mxu2 %v3904_v7  ;;  %v4654_v1 = vld [vmem:[#allocation5 + $0x16c] sm:$0xf] }
 0x1cf   :  { %v2206_v24 = vpop.f32.mrf.mxu2 }
 0x1d0   :  { %v2207_v36 = vadd.f32 %v2206_v24, %v2174_v17  ;;  %v2176_v57 = vadd.f32 %v2175_v0, %v2143_v19  ;;  %v3648_v17 = vor.u32 %v4622_v2, %v3645_v16  ;;  %v4682_v0 = vld [vmem:[#allocation5 + $0x24c] sm:$0xf] }
 0x1d2   :  { %v5407_v9 = vadd.f32 %v2239_v54, %v2207_v36  ;;  %2521 = vmatpush.bf16.msra.mxu0 %v3648_v17  ;;  %v3776_v54 = vor.u32 %v4654_v1, %v3773_v41  ;;  %v3629_v17 = vld [vmem:[#allocation5 + $0x58] sm:$0xf0]  ;;  %v4650_v1 = vld [vmem:[#allocation5 + $0x14c] sm:$0xf] }
 0x1d3   :  { %v3757_v41 = vld [vmem:[#allocation5 + $0x158] sm:$0xf0] }
 0x1d4   :  { %v2241_v53 = vpop.f32.mrf.mxu3  ;;  %v2178_v36 = vpop.f32.mrf.mxu1  ;;  %2554 = vmatpush.bf16.msra.mxu1 %v3776_v54 }
 0x1d5   :  { %v2145_v24 = vpop.f32.mrf.mxu0 }
 0x1d6   :  { %v2146_v60 = vadd.f32 %v2145_v24, %v5371_v59  ;;  %v4013_v24 = vld [vmem:[#allocation5 + $0x358] sm:$0xf0] }
 0x1d7   :  { %v2208_v14 = vpop.f32.mrf.mxu2  ;;  %2431 = vmatmul.bf16.gmra.mxu1 %v5220_v46 }
 0x1d8   :  { %v2209_v15 = vadd.f32 %v2208_v14, %v2176_v57  ;;  %v2179_v19 = vadd.f32 %v2178_v36, %v2146_v60  ;;  %2398 = vmatmul.bf16.gmra.mxu0 %v5218_v45  ;;  %v3885_v57 = vld [vmem:[#allocation5 + $0x258] sm:$0xf0]  ;;  %v4618_v14 = vld [vmem:[#allocation5 + $0x4c] sm:$0xf]  ;;  %v4016_v60 = vor.u32 %v4714_v8, %v4013_v24  ;;  %v3760_v36 = vor.u32 %v4650_v1, %v3757_v41 }
 0x1d9   :  { %2497 = vmatmul.bf16.gmra.mxu3 %v5224_v52  ;;  %v3888_v18 = vor.u32 %v4682_v0, %v3885_v57  ;;  %v3997_v8 = vld [vmem:[#allocation5 + $0x338] sm:$0xf0] }
 0x1da   :  { %v5410_v12 = vadd.f32 %v2241_v53, %v2209_v15  ;;  %v3632_v53 = vor.u32 %v4618_v14, %v3629_v17  ;;  %2621 = vmatpush.bf16.msra.mxu3 %v4016_v60  ;;  %2555 = vmatpush.bf16.msra.mxu1 %v3760_v36  ;;  %v3613_v14 = vld [vmem:[#allocation5 + $0x38] sm:$0xf0]  ;;  %v4710_v17 = vld [vmem:[#allocation5 + $0x32c] sm:$0xf] }
 0x1db   :  { %2588 = vmatpush.bf16.msra.mxu2 %v3888_v18  ;;  %v3741_v24 = vld [vmem:[#allocation5 + $0x138] sm:$0xf0] }
 0x1dc   :  { %6313 = vst [vmem:[#allocation15_spill] sm:$0xff] %v5410_v12  ;;  %2464 = vmatmul.bf16.gmra.mxu2 %v5222_v51  ;;  %v2244_v2 = vpop.f32.mrf.mxu3  ;;  %v2180_v13 = vpop.f32.mrf.mxu1  ;;  %2522 = vmatpush.bf16.msra.mxu0 %v3632_v53  ;;  %v4000_v53 = vor.u32 %v4710_v17, %v3997_v8  ;;  %v4642_v8 = vld [vmem:[#allocation5 + $0x10c] sm:$0xf]  ;;  %v4189_v12 = vld [vmem:[#allocation5 + $0x4b8] sm:$0xf0] }
 0x1dd   :  { %v2147_v7 = vpop.f32.mrf.mxu0 }
 0x1de   :  { %v2148_v16 = vadd.f32 %v2147_v7, %v5373_v10  ;;  %v4614_v7 = vld [vmem:[#allocation5 + $0x2c] sm:$0xf]  ;;  %2622 = vmatpush.bf16.msra.mxu3 %v4000_v53 }
 0x1df   :  { %v2211_v59 = vpop.f32.mrf.mxu2 }
 0x1e0   :  { %v2212_v21 = vadd.f32 %v2211_v59, %v2179_v19  ;;  %v2181_v15 = vadd.f32 %v2180_v13, %v2148_v16 }
 0x1e2   :  { %v5417_v63 = vadd.f32 %v2244_v2, %v2212_v21  ;;  %v4678_v21 = vld [vmem:[#allocation5 + $0x22c] sm:$0xf]  ;;  %v3869_v2 = vld [vmem:[#allocation5 + $0x238] sm:$0xf0] }
 0x1e3   :  { %v3872_v13 = vor.u32 %v4678_v21, %v3869_v2  ;;  %v3597_v2 = vld [vmem:[#allocation5 + $0x18] sm:$0xf0] }
 0x1e4   :  { %v2246_v0 = vpop.f32.mrf.mxu3  ;;  %v2183_v18 = vpop.f32.mrf.mxu1 }
 0x1e5   :  { %v2150_v10 = vpop.f32.mrf.mxu0  ;;  %2589 = vmatpush.bf16.msra.mxu2 %v3872_v13  ;;  %v3981_v13 = vld [vmem:[#allocation5 + $0x318] sm:$0xf0] }
 0x1e6   :  { %v2151_v57 = vadd.f32 %v2150_v10, %v5379_v22  ;;  %v4646_v22 = vld [vmem:[#allocation5 + $0x12c] sm:$0xf] }
 0x1e7   :  { %v2213_v54 = vpop.f32.mrf.mxu2  ;;  %2436 = vmatmul.bf16.gmra.mxu1 %v5232_v25  ;;  %v3744_v1 = vor.u32 %v4646_v22, %v3741_v24  ;;  %v4674_v10 = vld [vmem:[#allocation5 + $0x20c] sm:$0xf] }
 0x1e8   :  { %v2214_v19 = vadd.f32 %v2213_v54, %v2181_v15  ;;  %v2184_v16 = vadd.f32 %v2183_v18, %v2151_v57  ;;  %2403 = vmatmul.bf16.gmra.mxu0 %v5230_v20  ;;  %v3616_v15 = vor.u32 %v4614_v7, %v3613_v14  ;;  %v3853_v57 = vld [vmem:[#allocation5 + $0x218] sm:$0xf0]  ;;  %v4610_v18 = vld [vmem:[#allocation5 + $0xc] sm:$0xf] }
 0x1e9   :  { %2502 = vmatmul.bf16.gmra.mxu3 %v5236_v27  ;;  %2556 = vmatpush.bf16.msra.mxu1 %v3744_v1  ;;  %v3856_v21 = vor.u32 %v4674_v10, %v3853_v57  ;;  %v4706_v7 = vld [vmem:[#allocation5 + $0x30c] sm:$0xf]  ;;  %v3600_v14 = vor.u32 %v4610_v18, %v3597_v2  ;;  %v4221_v10 = vld [vmem:[#allocation5 + $0x4f8] sm:$0xf0] }
 0x1ea   :  { %v5420_v59 = vadd.f32 %v2246_v0, %v2214_v19  ;;  %2523 = vmatpush.bf16.msra.mxu0 %v3616_v15  ;;  %v3984_v17 = vor.u32 %v4706_v7, %v3981_v13  ;;  %v3725_v15 = vld [vmem:[#allocation5 + $0x118] sm:$0xf0]  ;;  %v4862_v57 = vld [vmem:[#allocation5 + $0x7ec] sm:$0xf] }
 0x1eb   :  { %2590 = vmatpush.bf16.msra.mxu2 %v3856_v21  ;;  %v3728_v53 = vor.u32 %v4642_v8, %v3725_v15  ;;  %v4605_v18 = vld [vmem:[#allocation5 + $0x7f8] sm:$0xf0] }
 0x1ec   :  { %2469 = vmatmul.bf16.gmra.mxu2 %v5234_v26  ;;  %v2249_v36 = vpop.f32.mrf.mxu3  ;;  %v2185_v19 = vpop.f32.mrf.mxu1  ;;  %2623 = vmatpush.bf16.msra.mxu3 %v3984_v17  ;;  %v4608_v7 = vor.u32 %v4862_v57, %v4605_v18 }
 0x1ed   :  { %v2152_v54 = vpop.f32.mrf.mxu0  ;;  %2557 = vmatpush.bf16.msra.mxu1 %v3728_v53 }
 0x1ee   :  { %2524 = vmatpush.bf16.msra.mxu0 %v3600_v14  ;;  %v4766_v54 = vld [vmem:[#allocation5 + $0x4ec] sm:$0xf] }
 0x1ef   :  { %v2216_v41 = vpop.f32.mrf.mxu2  ;;  %v4224_v2 = vor.u32 %v4766_v54, %v4221_v10 }
 0x1f0   :  { %v2217_v60 = vadd.f32 %v2216_v41, %v2184_v16  ;;  %2748 = vmatpush.bf16.msrb.mxu3 %v4608_v7  ;;  %v4205_v7 = vld [vmem:[#allocation5 + $0x4d8] sm:$0xf0] }
 0x1f2   :  { %v5426_v0 = vadd.f32 %v2249_v36, %v2217_v60  ;;  %v4830_v60 = vld [vmem:[#allocation5 + $0x6ec] sm:$0xf]  ;;  %v4477_v36 = vld [vmem:[#allocation5 + $0x6f8] sm:$0xf0]  ;;  %2649 = vmatpush.bf16.msrb.mxu0 %v4224_v2 }
 0x1f3   :  { %v4480_v19 = vor.u32 %v4830_v60, %v4477_v36  ;;  %v4461_v60 = vld [vmem:[#allocation5 + $0x6d8] sm:$0xf0]  ;;  %v4762_v2 = vld [vmem:[#allocation5 + $0x4cc] sm:$0xf] }
 0x1f4   :  { %6314 = vst [vmem:[#allocation16_spill] sm:$0xff] %v5426_v0  ;;  %v2251_v22 = vpop.f32.mrf.mxu3  ;;  %v2295_v1 = vpop.f32.mrf.mxu1  ;;  %v4429_v0 = vld [vmem:[#allocation5 + $0x698] sm:$0xf0] }
 0x1f5   :  { %v2262_v24 = vpop.f32.mrf.mxu0  ;;  %2715 = vmatpush.bf16.msrb.mxu2 %v4480_v19  ;;  %v4349_v22 = vld [vmem:[#allocation5 + $0x5f8] sm:$0xf0] }
 0x1f6   :  { %v2296_v41 = vadd.f32 %v2295_v1, %v2262_v24  ;;  %v4826_v24 = vld [vmem:[#allocation5 + $0x6cc] sm:$0xf] }
 0x1f7   :  { %v2218_v16 = vpop.f32.mrf.mxu2  ;;  %2441 = vmatmul.bf16.gmra.mxu1 %v5244_v34  ;;  %v4464_v36 = vor.u32 %v4826_v24, %v4461_v60 }
 0x1f8   :  { %2408 = vmatmul.bf16.gmra.mxu0 %v5242_v32  ;;  %v4798_v16 = vld [vmem:[#allocation5 + $0x5ec] sm:$0xf] }
 0x1f9   :  { %2507 = vmatmul.bf16.gmra.mxu3 %v5248_v37  ;;  %v4352_v1 = vor.u32 %v4798_v16, %v4349_v22  ;;  %2716 = vmatpush.bf16.msrb.mxu2 %v4464_v36  ;;  %v4333_v16 = vld [vmem:[#allocation5 + $0x5d8] sm:$0xf0] }
 0x1fb   :  { %2682 = vmatpush.bf16.msrb.mxu1 %v4352_v1 }
 0x1fc   :  { %2474 = vmatmul.bf16.gmra.mxu2 %v5246_v35  ;;  %v2361_v14 = vpop.f32.mrf.mxu3  ;;  %v2297_v8 = vpop.f32.mrf.mxu1 }
 0x1fd   :  { %v2264_v17 = vpop.f32.mrf.mxu0 }
 0x1fe   :  { %v2298_v53 = vadd.f32 %v2297_v8, %v2264_v17  ;;  %v4589_v17 = vld [vmem:[#allocation5 + $0x7d8] sm:$0xf0]  ;;  %v4794_v8 = vld [vmem:[#allocation5 + $0x5cc] sm:$0xf] }
 0x1ff   :  { %v2328_v21 = vpop.f32.mrf.mxu2  ;;  %v4336_v22 = vor.u32 %v4794_v8, %v4333_v16 }
 0x200   :  { %v2329_v13 = vadd.f32 %v2328_v21, %v2296_v41 }
 0x201   :  { %2683 = vmatpush.bf16.msrb.mxu1 %v4336_v22 }
 0x202   :  { %v5432_v15 = vadd.f32 %v2361_v14, %v2329_v13  ;;  %v4858_v13 = vld [vmem:[#allocation5 + $0x7cc] sm:$0xf]  ;;  %v4208_v14 = vor.u32 %v4762_v2, %v4205_v7 }
 0x203   :  { %v4758_v2 = vld [vmem:[#allocation5 + $0x4ac] sm:$0xf] }
 0x204   :  { %v2363_v41 = vpop.f32.mrf.mxu3  ;;  %v2300_v18 = vpop.f32.mrf.mxu1  ;;  %2650 = vmatpush.bf16.msrb.mxu0 %v4208_v14  ;;  %v4192_v8 = vor.u32 %v4758_v2, %v4189_v12  ;;  %v4790_v14 = vld [vmem:[#allocation5 + $0x5ac] sm:$0xf] }
 0x205   :  { %v2267_v57 = vpop.f32.mrf.mxu0  ;;  %v4754_v2 = vld [vmem:[#allocation5 + $0x48c] sm:$0xf] }
 0x206   :  { %v2301_v21 = vadd.f32 %v2300_v18, %v2267_v57  ;;  %v4822_v57 = vld [vmem:[#allocation5 + $0x6ac] sm:$0xf]  ;;  %v4445_v18 = vld [vmem:[#allocation5 + $0x6b8] sm:$0xf0] }
 0x207   :  { %v2330_v54 = vpop.f32.mrf.mxu2  ;;  %2446 = vmatmul.bf16.gmra.mxu1 %v5258_v42  ;;  %v4448_v7 = vor.u32 %v4822_v57, %v4445_v18  ;;  %v4818_v18 = vld [vmem:[#allocation5 + $0x68c] sm:$0xf] }
 0x208   :  { %v2331_v10 = vadd.f32 %v2330_v54, %v2298_v53  ;;  %2413 = vmatmul.bf16.gmra.mxu0 %v5256_v38  ;;  %v4592_v53 = vor.u32 %v4858_v13, %v4589_v17  ;;  %v4854_v13 = vld [vmem:[#allocation5 + $0x7ac] sm:$0xf]  ;;  %v4573_v17 = vld [vmem:[#allocation5 + $0x7b8] sm:$0xf0]  ;;  %v4432_v12 = vor.u32 %v4818_v18, %v4429_v0 }
 0x209   :  { %2512 = vmatmul.bf16.gmra.mxu3 %v5262_v61  ;;  %v4576_v16 = vor.u32 %v4854_v13, %v4573_v17  ;;  %2717 = vmatpush.bf16.msrb.mxu2 %v4448_v7  ;;  %v4850_v7 = vld [vmem:[#allocation5 + $0x78c] sm:$0xf]  ;;  %v4557_v17 = vld [vmem:[#allocation5 + $0x798] sm:$0xf0] }
 0x20a   :  { %v5434_v19 = vadd.f32 %v2363_v41, %v2331_v10  ;;  %2749 = vmatpush.bf16.msrb.mxu3 %v4592_v53  ;;  %v4317_v53 = vld [vmem:[#allocation5 + $0x5b8] sm:$0xf0]  ;;  %2651 = vmatpush.bf16.msrb.mxu0 %v4192_v8  ;;  %v4786_v8 = vld [vmem:[#allocation5 + $0x58c] sm:$0xf] }
 0x20b   :  { %v4320_v22 = vor.u32 %v4790_v14, %v4317_v53  ;;  %v4560_v53 = vor.u32 %v4850_v7, %v4557_v17  ;;  %v4157_v18 = vld [vmem:[#allocation5 + $0x478] sm:$0xf0] }
 0x20c   :  { %2479 = vmatmul.bf16.gmra.mxu2 %v5260_v44  ;;  %v2366_v60 = vpop.f32.mrf.mxu3  ;;  %v2302_v54 = vpop.f32.mrf.mxu1 }
 0x20d   :  { %v2269_v36 = vpop.f32.mrf.mxu0  ;;  %2684 = vmatpush.bf16.msrb.mxu1 %v4320_v22  ;;  %2718 = vmatpush.bf16.msrb.mxu2 %v4432_v12  ;;  %v4846_v12 = vld [vmem:[#allocation5 + $0x76c] sm:$0xf] }
 0x20e   :  { %v2303_v41 = vadd.f32 %v2302_v54, %v2269_v36  ;;  %2750 = vmatpush.bf16.msrb.mxu3 %v4576_v16  ;;  %v4301_v16 = vld [vmem:[#allocation5 + $0x598] sm:$0xf0] }
 0x20f   :  { %v2333_v24 = vpop.f32.mrf.mxu2  ;;  %v4304_v22 = vor.u32 %v4786_v8, %v4301_v16  ;;  %v4782_v16 = vld [vmem:[#allocation5 + $0x56c] sm:$0xf] }
 0x210   :  { %v2334_v1 = vadd.f32 %v2333_v24, %v2301_v21 }
 0x211   :  { %2685 = vmatpush.bf16.msrb.mxu1 %v4304_v22 }
 0x212   :  { %v5440_v10 = vadd.f32 %v2366_v60, %v2334_v1  ;;  %2751 = vmatpush.bf16.msrb.mxu3 %v4560_v53 }
 0x214   :  { %v2368_v1 = vpop.f32.mrf.mxu3  ;;  %v2305_v36 = vpop.f32.mrf.mxu1 }
 0x215   :  { %v2272_v60 = vpop.f32.mrf.mxu0 }
 0x216   :  { %v2306_v57 = vadd.f32 %v2305_v36, %v2272_v60  ;;  %v4750_v60 = vld [vmem:[#allocation5 + $0x46c] sm:$0xf] }
 0x217   :  { %v2335_v21 = vpop.f32.mrf.mxu2  ;;  %2558 = vmatmul.bf16.vlgmr.msra.gmra.mxu1 %v6307_v39 }
 0x218   :  { %v2336_v24 = vadd.f32 %v2335_v21, %v2303_v41  ;;  %2525 = vmatmul.bf16.vlgmr.msra.gmra.mxu0 %v5146_v48  ;;  %v4173_v41 = vld [vmem:[#allocation5 + $0x498] sm:$0xf0] }
 0x219   :  { %2624 = vmatmul.bf16.vlgmr.msra.gmra.mxu3 %v6309_v62  ;;  %v4176_v13 = vor.u32 %v4754_v2, %v4173_v41  ;;  %v4541_v2 = vld [vmem:[#allocation5 + $0x778] sm:$0xf0]  ;;  %v4160_v41 = vor.u32 %v4750_v60, %v4157_v18 }
 0x21a   :  { %v5442_v54 = vadd.f32 %v2368_v1, %v2336_v24  ;;  %v4814_v24 = vld [vmem:[#allocation5 + $0x66c] sm:$0xf]  ;;  %v4413_v1 = vld [vmem:[#allocation5 + $0x678] sm:$0xf0]  ;;  %v4544_v7 = vor.u32 %v4846_v12, %v4541_v2 }
 0x21b   :  { %2652 = vmatpush.bf16.msrb.mxu0 %v4176_v13  ;;  %v4416_v36 = vor.u32 %v4814_v24, %v4413_v1 }
 0x21c   :  { %2591 = vmatmul.bf16.vlgmr.msra.gmra.mxu2 %v6308_v23  ;;  %v2371_v48 = vpop.f32.mrf.mxu3  ;;  %v2307_v39 = vpop.f32.mrf.mxu1  ;;  %2752 = vmatpush.bf16.msrb.mxu3 %v4544_v7  ;;  %v4141_v7 = vld [vmem:[#allocation5 + $0x458] sm:$0xf0] }
 0x21d   :  { %v2274_v0 = vpop.f32.mrf.mxu0  ;;  %2719 = vmatpush.bf16.msrb.mxu2 %v4416_v36 }
 0x21e   :  { %v2308_v62 = vadd.f32 %v2307_v39, %v2274_v0  ;;  %v6315_v0 = vld [vmem:[#allocation18_spill] sm:$0xff]  ;;  %v4810_v39 = vld [vmem:[#allocation5 + $0x64c] sm:$0xf] }
 0x21f   :  { %v2338_v14 = vpop.f32.mrf.mxu2  ;;  %2653 = vmatpush.bf16.msrb.mxu0 %v4160_v41 }
 0x220   :  { %v2339_v21 = vadd.f32 %v2338_v14, %v2306_v57  ;;  %v4285_v14 = vld [vmem:[#allocation5 + $0x578] sm:$0xf0] }
 0x221   :  { %v4288_v22 = vor.u32 %v4782_v16, %v4285_v14 }
 0x222   :  { %v5448_v23 = vadd.f32 %v2371_v48, %v2339_v21 }
 0x223   :  { %2686 = vmatpush.bf16.msrb.mxu1 %v4288_v22 }
 0x224   :  { %v2373_v17 = vpop.f32.mrf.mxu3  ;;  %v2310_v53 = vpop.f32.mrf.mxu1 }
 0x225   :  { %v2277_v8 = vpop.f32.mrf.mxu0 }
 0x226   :  { %v2311_v48 = vadd.f32 %v2310_v53, %v2277_v8 }
 0x227   :  { %v2340_v57 = vpop.f32.mrf.mxu2  ;;  %2563 = vmatmul.bf16.gmra.mxu1 %v5160_v47 }
 0x228   :  { %v2341_v13 = vadd.f32 %v2340_v57, %v2308_v62  ;;  %2530 = vmatmul.bf16.gmra.mxu0 %v5158_v43  ;;  %v4397_v62 = vld [vmem:[#allocation5 + $0x658] sm:$0xf0]  ;;  %v4746_v43 = vld [vmem:[#allocation5 + $0x44c] sm:$0xf] }
 0x229   :  { %2629 = vmatmul.bf16.gmra.mxu3 %v6315_v0  ;;  %v4400_v24 = vor.u32 %v4810_v39, %v4397_v62  ;;  %v4842_v57 = vld [vmem:[#allocation5 + $0x74c] sm:$0xf]  ;;  %v4144_v47 = vor.u32 %v4746_v43, %v4141_v7  ;;  %v6317_v7 = vld [vmem:[#allocation20_spill] sm:$0xff] }
 0x22a   :  { %v5450_v21 = vadd.f32 %v2373_v17, %v2341_v13  ;;  %v4525_v13 = vld [vmem:[#allocation5 + $0x758] sm:$0xf0]  ;;  %v4838_v43 = vld [vmem:[#allocation5 + $0x72c] sm:$0xf] }
 0x22b   :  { %2720 = vmatpush.bf16.msrb.mxu2 %v4400_v24  ;;  %v4269_v17 = vld [vmem:[#allocation5 + $0x558] sm:$0xf0]  ;;  %v4528_v8 = vor.u32 %v4842_v57, %v4525_v13  ;;  %2654 = vmatpush.bf16.msrb.mxu0 %v4144_v47  ;;  %v4806_v24 = vld [vmem:[#allocation5 + $0x62c] sm:$0xf]  ;;  %v6319_v13 = vld [vmem:[#allocation22_spill] sm:$0xff] }
 0x22c   :  { %2596 = vmatmul.bf16.gmra.mxu2 %v5162_v49  ;;  %v2376_v36 = vpop.f32.mrf.mxu3  ;;  %v2312_v12 = vpop.f32.mrf.mxu1  ;;  %v4778_v49 = vld [vmem:[#allocation5 + $0x54c] sm:$0xf]  ;;  %v6318_v57 = vld [vmem:[#allocation21_spill] sm:$0xff] }
 0x22d   :  { %v2279_v18 = vpop.f32.mrf.mxu0  ;;  %v4272_v16 = vor.u32 %v4778_v49, %v4269_v17  ;;  %2753 = vmatpush.bf16.msrb.mxu3 %v4528_v8  ;;  %v4774_v17 = vld [vmem:[#allocation5 + $0x52c] sm:$0xf]  ;;  %v4253_v8 = vld [vmem:[#allocation5 + $0x538] sm:$0xf0] }
 0x22e   :  { %v2313_v41 = vadd.f32 %v2312_v12, %v2279_v18  ;;  %v4742_v18 = vld [vmem:[#allocation5 + $0x42c] sm:$0xf]  ;;  %v4125_v12 = vld [vmem:[#allocation5 + $0x438] sm:$0xf0] }
 0x22f   :  { %v2343_v1 = vpop.f32.mrf.mxu2  ;;  %2687 = vmatpush.bf16.msrb.mxu1 %v4272_v16  ;;  %v4128_v47 = vor.u32 %v4742_v18, %v4125_v12  ;;  %v4256_v16 = vor.u32 %v4774_v17, %v4253_v8  ;;  %v4738_v18 = vld [vmem:[#allocation5 + $0x40c] sm:$0xf] }
 0x230   :  { %v2344_v60 = vadd.f32 %v2343_v1, %v2311_v48  ;;  %v4381_v1 = vld [vmem:[#allocation5 + $0x638] sm:$0xf0] }
 0x231   :  { %2655 = vmatpush.bf16.msrb.mxu0 %v4128_v47  ;;  %v4770_v47 = vld [vmem:[#allocation5 + $0x50c] sm:$0xf] }
 0x232   :  { %v5456_v2 = vadd.f32 %v2376_v36, %v2344_v60  ;;  %v6316_v60 = vld [vmem:[#allocation19_spill] sm:$0xff]  ;;  %v4384_v36 = vor.u32 %v4806_v24, %v4381_v1 }
 0x233   :  { %2688 = vmatpush.bf16.msrb.mxu1 %v4256_v16  ;;  %v4802_v1 = vld [vmem:[#allocation5 + $0x60c] sm:$0xf] }
 0x234   :  { %v2378_v22 = vpop.f32.mrf.mxu3  ;;  %v2315_v0 = vpop.f32.mrf.mxu1  ;;  %2721 = vmatpush.bf16.msrb.mxu2 %v4384_v36  ;;  %v4834_v36 = vld [vmem:[#allocation5 + $0x70c] sm:$0xf] }
 0x235   :  { %v2282_v48 = vpop.f32.mrf.mxu0 }
 0x236   :  { %v2316_v62 = vadd.f32 %v2315_v0, %v2282_v48 }
 0x237   :  { %v2345_v14 = vpop.f32.mrf.mxu2  ;;  %2568 = vmatmul.bf16.gmra.mxu1 %v6317_v7  ;;  %v4109_v7 = vld [vmem:[#allocation5 + $0x418] sm:$0xf0] }
 0x238   :  { %v2346_v53 = vadd.f32 %v2345_v14, %v2313_v41  ;;  %2535 = vmatmul.bf16.gmra.mxu0 %v6316_v60  ;;  %v4509_v41 = vld [vmem:[#allocation5 + $0x738] sm:$0xf0] }
 0x239   :  { %2634 = vmatmul.bf16.gmra.mxu3 %v6319_v13  ;;  %v4512_v49 = vor.u32 %v4838_v43, %v4509_v41  ;;  %v4365_v60 = vld [vmem:[#allocation5 + $0x618] sm:$0xf0] }
 0x23a   :  { %v5458_v39 = vadd.f32 %v2378_v22, %v2346_v53  ;;  %v4368_v12 = vor.u32 %v4802_v1, %v4365_v60  ;;  %v4493_v43 = vld [vmem:[#allocation5 + $0x718] sm:$0xf0] }
 0x23b   :  { %2754 = vmatpush.bf16.msrb.mxu3 %v4512_v49  ;;  %v4496_v41 = vor.u32 %v4834_v36, %v4493_v43  ;;  %v4237_v13 = vld [vmem:[#allocation5 + $0x518] sm:$0xf0] }
 0x23c   :  { %2601 = vmatmul.bf16.gmra.mxu2 %v6318_v57  ;;  %v2381_v22 = vpop.f32.mrf.mxu3  ;;  %v2317_v0 = vpop.f32.mrf.mxu1  ;;  %v4112_v57 = vor.u32 %v4738_v18, %v4109_v7 }
 0x23d   :  { %v2284_v48 = vpop.f32.mrf.mxu0  ;;  %2722 = vmatpush.bf16.msrb.mxu2 %v4368_v12 }
 0x23e   :  { %2656 = vmatpush.bf16.msrb.mxu0 %v4112_v57 }
 0x23f   :  { %v2348_v14 = vpop.f32.mrf.mxu2  ;;  %2755 = vmatpush.bf16.msrb.mxu3 %v4496_v41 }
 0x240   :  { %v2349_v53 = vadd.f32 %v2348_v14, %v2316_v62  ;;  %v4240_v62 = vor.u32 %v4770_v47, %v4237_v13 }
 0x242   :  { %v5464_v24 = vadd.f32 %v2381_v22, %v2349_v53  ;;  %2689 = vmatpush.bf16.msrb.mxu1 %v4240_v62  ;;  %v6320_v22 = vld [vmem:[#allocation23_spill] sm:$0xff] }
 0x244   :  { %v2383_v49 = vpop.f32.mrf.mxu3  ;;  %v2427_v14 = vpop.f32.mrf.mxu1 }
 0x245   :  { %v2394_v8 = vpop.f32.mrf.mxu0 }
 0x246   :  { %v2395_v16 = vadd.f32 %v2394_v8, %v5432_v15 }
 0x247   :  { %v2350_v17 = vpop.f32.mrf.mxu2  ;;  %2573 = vmatmul.bf16.gmra.mxu1 %v5184_v56 }
 0x248   :  { %v2428_v53 = vadd.f32 %v2427_v14, %v2395_v16  ;;  %2540 = vmatmul.bf16.gmra.mxu0 %v5182_v55 }
 0x249   :  { %2639 = vmatmul.bf16.gmra.mxu3 %v6320_v22 }
 0x24c   :  { %2606 = vmatmul.bf16.gmra.mxu2 %v5186_v58  ;;  %v2493_v1 = vpop.f32.mrf.mxu3  ;;  %v2429_v12 = vpop.f32.mrf.mxu1 }
 0x24d   :  { %v2396_v60 = vpop.f32.mrf.mxu0 }
 0x24e   :  { %v2397_v18 = vadd.f32 %v2396_v60, %v5434_v19 }
 0x24f   :  { %v2460_v48 = vpop.f32.mrf.mxu2 }
 0x250   :  { %v2461_v0 = vadd.f32 %v2460_v48, %v2428_v53  ;;  %v2430_v15 = vadd.f32 %v2429_v12, %v2397_v18 }
 0x252   :  { %v5472_v7 = vadd.f32 %v2493_v1, %v2461_v0 }
 0x254   :  { %v2495_v57 = vpop.f32.mrf.mxu3  ;;  %v2432_v41 = vpop.f32.mrf.mxu1 }
 0x255   :  { %v2399_v55 = vpop.f32.mrf.mxu0 }
 0x256   :  { %v2400_v56 = vadd.f32 %v2399_v55, %v5440_v10 }
 0x257   :  { %v2462_v36 = vpop.f32.mrf.mxu2  ;;  %2578 = vmatmul.bf16.gmra.mxu1 %v5196_v29 }
 0x258   :  { %v2463_v43 = vadd.f32 %v2462_v36, %v2430_v15  ;;  %v2433_v47 = vadd.f32 %v2432_v41, %v2400_v56  ;;  %2545 = vmatmul.bf16.gmra.mxu0 %v5194_v28 }
 0x259   :  { %2644 = vmatmul.bf16.gmra.mxu3 %v5200_v31 }
 0x25a   :  { %v5475_v58 = vadd.f32 %v2495_v57, %v2463_v43 }
 0x25c   :  { %2611 = vmatmul.bf16.gmra.mxu2 %v5198_v30  ;;  %v2498_v17 = vpop.f32.mrf.mxu3  ;;  %v2434_v8 = vpop.f32.mrf.mxu1 }
 0x25d   :  { %v2401_v62 = vpop.f32.mrf.mxu0 }
 0x25e   :  { %v2402_v49 = vadd.f32 %v2401_v62, %v5442_v54 }
 0x25f   :  { %v2465_v19 = vpop.f32.mrf.mxu2 }
 0x260   :  { %v2466_v13 = vadd.f32 %v2465_v19, %v2433_v47  ;;  %v2435_v16 = vadd.f32 %v2434_v8, %v2402_v49 }
 0x262   :  { %v5482_v10 = vadd.f32 %v2498_v17, %v2466_v13 }
 0x264   :  { %v2500_v22 = vpop.f32.mrf.mxu3  ;;  %v2437_v48 = vpop.f32.mrf.mxu1 }
 0x265   :  { %v2404_v28 = vpop.f32.mrf.mxu0 }
 0x266   :  { %v2405_v29 = vadd.f32 %v2404_v28, %v5448_v23 }
 0x267   :  { %v2467_v14 = vpop.f32.mrf.mxu2  ;;  %2690 = vmatmul.bf16.vlgmr.msrb.gmra.mxu1 %v5208_v4 }
 0x268   :  { %v2468_v53 = vadd.f32 %v2467_v14, %v2435_v16  ;;  %v2438_v31 = vadd.f32 %v2437_v48, %v2405_v29  ;;  %2657 = vmatmul.bf16.vlgmr.msrb.gmra.mxu0 %v5206_v3 }
 0x269   :  { %2756 = vmatmul.bf16.vlgmr.msrb.gmra.mxu3 %v5212_v6 }
 0x26a   :  { %v5485_v30 = vadd.f32 %v2500_v22, %v2468_v53 }
 0x26c   :  { %2723 = vmatmul.bf16.vlgmr.msrb.gmra.mxu2 %v5210_v5  ;;  %v2503_v1 = vpop.f32.mrf.mxu3  ;;  %v2439_v12 = vpop.f32.mrf.mxu1 }
 0x26d   :  { %v2406_v60 = vpop.f32.mrf.mxu0 }
 0x26e   :  { %v2407_v18 = vadd.f32 %v2406_v60, %v5450_v21 }
 0x26f   :  { %v2470_v54 = vpop.f32.mrf.mxu2 }
 0x270   :  { %v2471_v0 = vadd.f32 %v2470_v54, %v2438_v31  ;;  %v2440_v15 = vadd.f32 %v2439_v12, %v2407_v18 }
 0x272   :  { %v5492_v23 = vadd.f32 %v2503_v1, %v2471_v0 }
 0x274   :  { %v2505_v57 = vpop.f32.mrf.mxu3  ;;  %v2442_v55 = vpop.f32.mrf.mxu1 }
 0x275   :  { %v2409_v3 = vpop.f32.mrf.mxu0 }
 0x276   :  { %v2410_v4 = vadd.f32 %v2409_v3, %v5456_v2 }
 0x277   :  { %v2472_v36 = vpop.f32.mrf.mxu2  ;;  %2695 = vmatmul.bf16.gmra.mxu1 %v5220_v46 }
 0x278   :  { %v2473_v43 = vadd.f32 %v2472_v36, %v2440_v15  ;;  %v2443_v6 = vadd.f32 %v2442_v55, %v2410_v4  ;;  %2662 = vmatmul.bf16.gmra.mxu0 %v5218_v45 }
 0x279   :  { %2761 = vmatmul.bf16.gmra.mxu3 %v5224_v52 }
 0x27a   :  { %v5495_v5 = vadd.f32 %v2505_v57, %v2473_v43 }
 0x27c   :  { %2728 = vmatmul.bf16.gmra.mxu2 %v5222_v51  ;;  %v2508_v41 = vpop.f32.mrf.mxu3  ;;  %v2444_v13 = vpop.f32.mrf.mxu1 }
 0x27d   :  { %v2411_v47 = vpop.f32.mrf.mxu0 }
 0x27e   :  { %v2412_v19 = vadd.f32 %v2411_v47, %v5458_v39 }
 0x27f   :  { %v2475_v21 = vpop.f32.mrf.mxu2 }
 0x280   :  { %v2476_v56 = vadd.f32 %v2475_v21, %v2443_v6  ;;  %v2445_v17 = vadd.f32 %v2444_v13, %v2412_v19 }
 0x282   :  { %v5502_v2 = vadd.f32 %v2508_v41, %v2476_v56 }
 0x284   :  { %v2510_v8 = vpop.f32.mrf.mxu3  ;;  %v2447_v16 = vpop.f32.mrf.mxu1 }
 0x285   :  { %v2414_v45 = vpop.f32.mrf.mxu0 }
 0x286   :  { %v2415_v46 = vadd.f32 %v2414_v45, %v5464_v24 }
 0x287   :  { %v2477_v62 = vpop.f32.mrf.mxu2  ;;  %2700 = vmatmul.bf16.gmra.mxu1 %v5232_v25 }
 0x288   :  { %v2478_v49 = vadd.f32 %v2477_v62, %v2445_v17  ;;  %v2448_v52 = vadd.f32 %v2447_v16, %v2415_v46  ;;  %2667 = vmatmul.bf16.gmra.mxu0 %v5230_v20 }
 0x289   :  { %2766 = vmatmul.bf16.gmra.mxu3 %v5236_v27 }
 0x28a   :  { %v5505_v51 = vadd.f32 %v2510_v8, %v2478_v49 }
 0x28c   :  { %2733 = vmatmul.bf16.gmra.mxu2 %v5234_v26  ;;  %v2513_v53 = vpop.f32.mrf.mxu3  ;;  %v2449_v28 = vpop.f32.mrf.mxu1 }
 0x28d   :  { %v2416_v22 = vpop.f32.mrf.mxu0 }
 0x28f   :  { %v2480_v39 = vpop.f32.mrf.mxu2 }
 0x290   :  { %v2481_v14 = vadd.f32 %v2480_v39, %v2448_v52 }
 0x292   :  { %v5511_v29 = vadd.f32 %v2513_v53, %v2481_v14 }
 0x294   :  { %v2515_v48 = vpop.f32.mrf.mxu3  ;;  %v2559_v54 = vpop.f32.mrf.mxu1 }
 0x295   :  { %v2526_v31 = vpop.f32.mrf.mxu0 }
 0x296   :  { %v2560_v0 = vadd.f32 %v2559_v54, %v2526_v31 }
 0x297   :  { %v2482_v24 = vpop.f32.mrf.mxu2  ;;  %2705 = vmatmul.bf16.gmra.mxu1 %v5244_v34 }
 0x298   :  { %2672 = vmatmul.bf16.gmra.mxu0 %v5242_v32 }
 0x299   :  { %2771 = vmatmul.bf16.gmra.mxu3 %v5248_v37 }
 0x29c   :  { %2738 = vmatmul.bf16.gmra.mxu2 %v5246_v35  ;;  %v2625_v26 = vpop.f32.mrf.mxu3  ;;  %v2561_v1 = vpop.f32.mrf.mxu1 }
 0x29d   :  { %v2528_v27 = vpop.f32.mrf.mxu0 }
 0x29e   :  { %v2562_v18 = vadd.f32 %v2561_v1, %v2528_v27 }
 0x29f   :  { %v2592_v20 = vpop.f32.mrf.mxu2 }
 0x2a0   :  { %v2593_v25 = vadd.f32 %v2592_v20, %v2560_v0 }
 0x2a2   :  { %v5517_v60 = vadd.f32 %v2625_v26, %v2593_v25 }
 0x2a4   :  { %v2627_v36 = vpop.f32.mrf.mxu3  ;;  %v2564_v57 = vpop.f32.mrf.mxu1 }
 0x2a5   :  { %v2531_v43 = vpop.f32.mrf.mxu0 }
 0x2a6   :  { %v2565_v34 = vadd.f32 %v2564_v57, %v2531_v43 }
 0x2a7   :  { %v2594_v12 = vpop.f32.mrf.mxu2  ;;  %2710 = vmatmul.bf16.gmra.mxu1 %v5258_v42 }
 0x2a8   :  { %v2595_v15 = vadd.f32 %v2594_v12, %v2562_v18  ;;  %2677 = vmatmul.bf16.gmra.mxu0 %v5256_v38 }
 0x2a9   :  { %2776 = vmatmul.bf16.gmra.mxu3 %v5262_v61 }
 0x2aa   :  { %v5519_v32 = vadd.f32 %v2627_v36, %v2595_v15 }
 0x2ac   :  { %2743 = vmatmul.bf16.gmra.mxu2 %v5260_v44  ;;  %v2630_v3 = vpop.f32.mrf.mxu3  ;;  %v2566_v55 = vpop.f32.mrf.mxu1 }
 0x2ad   :  { %v2533_v4 = vpop.f32.mrf.mxu0 }
 0x2ae   :  { %v2567_v21 = vadd.f32 %v2566_v55, %v2533_v4 }
 0x2af   :  { %v2597_v35 = vpop.f32.mrf.mxu2 }
 0x2b0   :  { %v2598_v37 = vadd.f32 %v2597_v35, %v2565_v34 }
 0x2b2   :  { %v5525_v6 = vadd.f32 %v2630_v3, %v2598_v37 }
 0x2b4   :  { %v2632_v47 = vpop.f32.mrf.mxu3  ;;  %v2569_v13 = vpop.f32.mrf.mxu1 }
 0x2b5   :  { %v2536_v19 = vpop.f32.mrf.mxu0 }
 0x2b6   :  { %v2570_v42 = vadd.f32 %v2569_v13, %v2536_v19  ;;  %v6321_v19 = vld [vmem:[#allocation24_spill] sm:$0xff] }
 0x2b7   :  { %v2599_v56 = vpop.f32.mrf.mxu2  ;;  %v2783_v13 = vadd.f32 %v5387_v11, %v6321_v19 }
 0x2b8   :  { %v2600_v41 = vadd.f32 %v2599_v56, %v2567_v21 }
 0x2ba   :  { %v5527_v38 = vadd.f32 %v2632_v47, %v2600_v41 }
 0x2bc   :  { %v2635_v62 = vpop.f32.mrf.mxu3  ;;  %v2571_v49 = vpop.f32.mrf.mxu1 }
 0x2bd   :  { %v2538_v61 = vpop.f32.mrf.mxu0 }
 0x2be   :  { %v2572_v45 = vadd.f32 %v2571_v49, %v2538_v61 }
 0x2bf   :  { %v2602_v17 = vpop.f32.mrf.mxu2 }
 0x2c0   :  { %v2603_v44 = vadd.f32 %v2602_v17, %v2570_v42 }
 0x2c2   :  { %v5529_v8 = vadd.f32 %v2635_v62, %v2603_v44 }
 0x2c4   :  { %v2637_v52 = vpop.f32.mrf.mxu3  ;;  %v2574_v14 = vpop.f32.mrf.mxu1 }
 0x2c5   :  { %v2541_v39 = vpop.f32.mrf.mxu0 }
 0x2c6   :  { %v2575_v22 = vadd.f32 %v2574_v14, %v2541_v39 }
 0x2c7   :  { %v2604_v46 = vpop.f32.mrf.mxu2 }
 0x2c8   :  { %v2605_v16 = vadd.f32 %v2604_v46, %v2572_v45  ;;  %v2784_v45 = vadd.f32 %v2783_v13, %v5472_v7 }
 0x2ca   :  { %v5531_v53 = vadd.f32 %v2637_v52, %v2605_v16  ;;  %v6322_v52 = vld [vmem:[#allocation25_spill] sm:$0xff] }
 0x2cb   :  { %v2788_v39 = vadd.f32 %v5390_v50, %v6322_v52 }
 0x2cc   :  { %v2640_v48 = vpop.f32.mrf.mxu3  ;;  %v2576_v54 = vpop.f32.mrf.mxu1 }
 0x2cd   :  { %v2543_v31 = vpop.f32.mrf.mxu0 }
 0x2ce   :  { %v2577_v20 = vadd.f32 %v2576_v54, %v2543_v31 }
 0x2cf   :  { %v2607_v28 = vpop.f32.mrf.mxu2 }
 0x2d0   :  { %v2608_v24 = vadd.f32 %v2607_v28, %v2575_v22 }
 0x2d2   :  { %v5533_v0 = vadd.f32 %v2640_v48, %v2608_v24 }
 0x2d4   :  { %v2642_v27 = vpop.f32.mrf.mxu3  ;;  %v2579_v18 = vpop.f32.mrf.mxu1 }
 0x2d5   :  { %v2546_v1 = vpop.f32.mrf.mxu0 }
 0x2d6   :  { %v2580_v15 = vadd.f32 %v2579_v18, %v2546_v1 }
 0x2d7   :  { %v2609_v25 = vpop.f32.mrf.mxu2 }
 0x2d8   :  { %v2610_v26 = vadd.f32 %v2609_v25, %v2577_v20 }
 0x2da   :  { %v5535_v12 = vadd.f32 %v2642_v27, %v2610_v26  ;;  %v6323_v26 = vld [vmem:[#allocation26_spill] sm:$0xff] }
 0x2db   :  { %v2793_v27 = vadd.f32 %v5397_v33, %v6323_v26 }
 0x2dc   :  { %v2645_v57 = vpop.f32.mrf.mxu3  ;;  %v2581_v35 = vpop.f32.mrf.mxu1 }
 0x2dd   :  { %v2548_v34 = vpop.f32.mrf.mxu0 }
 0x2df   :  { %v2612_v36 = vpop.f32.mrf.mxu2 }
 0x2e0   :  { %v2613_v43 = vadd.f32 %v2612_v36, %v2580_v15 }
 0x2e2   :  { %v5537_v37 = vadd.f32 %v2645_v57, %v2613_v43  ;;  %v2794_v43 = vadd.f32 %v2793_v27, %v5482_v10  ;;  %v6326_v27 = vld [vmem:[#allocation30_spill] sm:$0xff] }
 0x2e4   :  { %v2647_v4 = vpop.f32.mrf.mxu3  ;;  %v2691_v21 = vpop.f32.mrf.mxu1 }
 0x2e5   :  { %v2658_v55 = vpop.f32.mrf.mxu0  ;;  %v6324_v4 = vld [vmem:[#allocation27_spill] sm:$0xff] }
 0x2e6   :  { %v2659_v56 = vadd.f32 %v2658_v55, %v5517_v60  ;;  %v2798_v55 = vadd.f32 %v5400_v40, %v6324_v4 }
 0x2e7   :  { %v2614_v3 = vpop.f32.mrf.mxu2 }
 0x2e8   :  { %v2692_v41 = vadd.f32 %v2691_v21, %v2659_v56 }
 0x2ec   :  { %v2757_v17 = vpop.f32.mrf.mxu3  ;;  %v2693_v62 = vpop.f32.mrf.mxu1 }
 0x2ed   :  { %v2660_v44 = vpop.f32.mrf.mxu0 }
 0x2ee   :  { %v2661_v49 = vadd.f32 %v2660_v44, %v5519_v32  ;;  %v2789_v32 = vadd.f32 %v2788_v39, %v5475_v58 }
 0x2ef   :  { %v2724_v47 = vpop.f32.mrf.mxu2 }
 0x2f0   :  { %v2725_v42 = vadd.f32 %v2724_v47, %v2692_v41  ;;  %v2694_v16 = vadd.f32 %v2693_v62, %v2661_v49  ;;  %v6325_v49 = vld [vmem:[#allocation28_spill] sm:$0xff] }
 0x2f2   :  { %v5542_v61 = vadd.f32 %v2757_v17, %v2725_v42  ;;  %v2799_v17 = vadd.f32 %v2798_v55, %v5485_v30 }
 0x2f4   :  { %v2785_v46 = vadd.f32 %v2784_v45, %v5542_v61  ;;  %v2759_v22 = vpop.f32.mrf.mxu3  ;;  %v2696_v24 = vpop.f32.mrf.mxu1  ;;  %v2803_v45 = vadd.f32 %v5407_v9, %v6325_v49 }
 0x2f5   :  { %v2663_v28 = vpop.f32.mrf.mxu0 }
 0x2f6   :  { %2786 = vadd.xlane.f32.xlu0 %v2785_v46  ;;  %v2664_v31 = vadd.f32 %v2663_v28, %v5525_v6 }
 0x2f7   :  { %v2726_v60 = vpop.f32.mrf.mxu2 }
 0x2f8   :  { %v2727_v14 = vadd.f32 %v2726_v60, %v2694_v16  ;;  %v2697_v20 = vadd.f32 %v2696_v24, %v2664_v31 }
 0x2fa   :  { %v5549_v48 = vadd.f32 %v2759_v22, %v2727_v14  ;;  %v2804_v14 = vadd.f32 %v2803_v45, %v5492_v23  ;;  %v6328_v45 = vld [vmem:[#allocation16_spill] sm:$0xff] }
 0x2fc   :  { %v2790_v54 = vadd.f32 %v2789_v32, %v5549_v48  ;;  %v2762_v18 = vpop.f32.mrf.mxu3  ;;  %v2698_v36 = vpop.f32.mrf.mxu1 }
 0x2fd   :  { %v2665_v15 = vpop.f32.mrf.mxu0 }
 0x2fe   :  { %2791 = vadd.xlane.f32.xlu1 %v2790_v54  ;;  %v2666_v6 = vadd.f32 %v2665_v15, %v5527_v38 }
 0x2ff   :  { %v2729_v25 = vpop.f32.mrf.mxu2 }
 0x300   :  { %v2730_v1 = vadd.f32 %v2729_v25, %v2697_v20  ;;  %v2699_v35 = vadd.f32 %v2698_v36, %v2666_v6 }
 0x302   :  { %v5557_v57 = vadd.f32 %v2762_v18, %v2730_v1  ;;  %v2813_v1 = vadd.f32 %v5417_v63, %v6326_v27 }
 0x304   :  { %v2795_v34 = vadd.f32 %v2794_v43, %v5557_v57  ;;  %v2764_v56 = vpop.f32.mrf.mxu3  ;;  %v2701_v47 = vpop.f32.mrf.mxu1  ;;  %v2814_v6 = vadd.f32 %v2813_v1, %v5502_v2 }
 0x305   :  { %v2668_v41 = vpop.f32.mrf.mxu0 }
 0x306   :  { %2796 = vadd.xlane.f32.xlu1 %v2795_v34  ;;  %v2669_v42 = vadd.f32 %v2668_v41, %v5529_v8 }
 0x307   :  { %v2731_v3 = vpop.f32.mrf.mxu2 }
 0x308   :  { %v2732_v21 = vadd.f32 %v2731_v3, %v2699_v35  ;;  %v2702_v44 = vadd.f32 %v2701_v47, %v2669_v42 }
 0x30a   :  { %v5563_v13 = vadd.f32 %v2764_v56, %v2732_v21  ;;  %v6327_v21 = vld [vmem:[#allocation31_spill] sm:$0xff] }
 0x30b   :  { %v2818_v56 = vadd.f32 %v5420_v59, %v6327_v21 }
 0x30c   :  { %v2800_v38 = vadd.f32 %v2799_v17, %v5563_v13  ;;  %v2767_v16 = vpop.f32.mrf.mxu3  ;;  %v2703_v39 = vpop.f32.mrf.mxu1 }
 0x30d   :  { %v2670_v60 = vpop.f32.mrf.mxu0 }
 0x30e   :  { %2801 = vadd.xlane.f32.xlu2 %v2800_v38  ;;  %v2819_v38 = vadd.f32 %v2818_v56, %v5505_v51 }
 0x30f   :  { %v2734_v62 = vpop.f32.mrf.mxu2 }
 0x310   :  { %v2735_v46 = vadd.f32 %v2734_v62, %v2702_v44 }
 0x312   :  { %v5571_v22 = vadd.f32 %v2767_v16, %v2735_v46  ;;  %v2825_v46 = vsel %vm2823_vm0, %v6328_v45, 0.0 }
 0x314   :  { %v2805_v8 = vadd.f32 %v2804_v14, %v5571_v22  ;;  %v2769_v24 = vpop.f32.mrf.mxu3  ;;  %v2706_v32 = vpop.f32.mrf.mxu1  ;;  %v2671_v14 = vadd.f32 %v2670_v60, %v5531_v53 }
 0x315   :  { %v2673_v31 = vpop.f32.mrf.mxu0 }
 0x316   :  { %2806 = vadd.xlane.f32.xlu2 %v2805_v8  ;;  %v2674_v54 = vadd.f32 %v2673_v31, %v5533_v0  ;;  %v6329_v31 = vld [vmem:[#allocation32_spill] sm:$0xff] }
 0x317   :  { %v2736_v28 = vpop.f32.mrf.mxu2 }
 0x318   :  { %v2707_v20 = vadd.f32 %v2706_v32, %v2674_v54  ;;  %v2824_v32 = vsel %vm2823_vm0, %v6329_v31, 0.0  ;;  %v2827_v54 = vsel %vm2823_vm0, %v5511_v29, 0.0 }
 0x319   :  { %v2826_v1 = vadd.f32 %v2825_v46, %v2824_v32 }
 0x31c   :  { %v2772_v15 = vpop.f32.mrf.mxu3  ;;  %v2708_v43 = vpop.f32.mrf.mxu1 }
 0x31d   :  { %v2675_v36 = vpop.f32.mrf.mxu0 }
 0x31e   :  { %v2676_v35 = vadd.f32 %v2675_v36, %v5535_v12  ;;  %v2704_v36 = vadd.f32 %v2703_v39, %v2671_v14  ;;  %v5105_v39 = vmov 512.0  }
 0x31f   :  { %v2739_v25 = vpop.f32.mrf.mxu2  ;;  %4877 = vrcp.f32 %v5105_v39 }
 0x320   :  { %v2740_v18 = vadd.f32 %v2739_v25, %v2707_v20  ;;  %v2709_v55 = vadd.f32 %v2708_v43, %v2676_v35  ;;  %v2828_v43 = vadd.f32 %v2827_v54, %v2826_v1  ;;  %v2737_v53 = vadd.f32 %v2736_v28, %v2704_v36 }
 0x322   :  { %v5578_v34 = vadd.f32 %v2772_v15, %v2740_v18 }
 0x324   :  { %v2815_v3 = vadd.f32 %v2814_v6, %v5578_v34  ;;  %v2774_v47 = vpop.f32.mrf.mxu3  ;;  %v2711_v17 = vpop.f32.mrf.mxu1 }
 0x325   :  { %v2678_v42 = vpop.f32.mrf.mxu0 }
 0x326   :  { %2816 = vadd.xlane.f32.xlu1 %v2815_v3  ;;  %v2679_v62 = vadd.f32 %v2678_v42, %v5537_v37 }
 0x327   :  { %v2741_v0 = vpop.f32.mrf.mxu2 }
 0x328   :  { %v2742_v41 = vadd.f32 %v2741_v0, %v2709_v55  ;;  %v2712_v16 = vadd.f32 %v2711_v17, %v2679_v62  ;;  %v6330_v55 = vld [vmem:[#allocation29_spill] sm:$0xff]  ;;  %v6331_v0 = vld [vmem:[#allocation15_spill] sm:$0xff]  ;;  %v4878_v17 = vpop.eup %4877 }
 0x329   :  { %v2808_v56 = vadd.f32 %v6331_v0, %v6330_v55  ;;  %vm2838_vm1 = vweird.f32 %v4878_v17 }
 0x32a   :  { %v5585_v44 = vadd.f32 %v2774_v47, %v2742_v41  ;;  %v5602_v41 = vadd.f32 %v2769_v24, %v2737_v53 }
 0x32b   :  { %v2809_v47 = vadd.f32 %v2808_v56, %v5495_v5 }
 0x32c   :  { %v2820_v12 = vadd.f32 %v2819_v38, %v5585_v44  ;;  %v2777_v25 = vpop.f32.mrf.mxu3  ;;  %v2713_v18 = vpop.f32.mrf.mxu1  ;;  %v2834_v38 = vmul.f32 512.0, %v4878_v17 }
 0x32d   :  { %v2680_v37 = vpop.f32.mrf.mxu0  ;;  %v2810_v42 = vadd.f32 %v2809_v47, %v5602_v41 }
 0x32e   :  { %2821 = vadd.xlane.f32.xlu2 %v2820_v12  ;;  %v2835_v62 = vsub.f32 1.0, %v2834_v38 }
 0x32f   :  { %v2744_v8 = vpop.f32.mrf.mxu2 }
 0x330   :  { %v2745_v20 = vadd.f32 %v2744_v8, %v2712_v16  ;;  %v2836_v28 = vmul.f32 %v4878_v17, %v2835_v62 }
 0x332   :  { %v5596_v15 = vadd.f32 %v2777_v25, %v2745_v20  ;;  %v2837_v12 = vadd.f32 %v4878_v17, %v2836_v28 }
 0x334   :  { %v2829_v6 = vsel %vm2823_vm0, %v5596_v15, 0.0  ;;  %v2779_v3 = vpop.f32.mrf.mxu3  ;;  %v5606_v46 = vsel %vm2838_vm1, %v4878_v17, %v2837_v12 }
 0x335   :  { %v2830_v60 = vadd.f32 %v2829_v6, %v2828_v43 }
 0x337   :  { %v2746_v35 = vpop.f32.mrf.mxu2  ;;  %2831 = vadd.xlane.f32.xlu0 %v2830_v60 }
 0x33f   :  { %2811 = vadd.xlane.f32.xlu0 %v2810_v42 }
 0x369   :  { %v2787_v16 = vpop.xlane.xlu0 %2786 }
 0x36a   :  { %v2840_v14 = vmul.f32 %v5606_v46, %v2787_v16 }
 0x36c   :  { %v5610_v24 = vsub.f32 %v6321_v19, %v2840_v14  ;;  %v5613_v8 = vsub.f32 %v5387_v11, %v2840_v14  ;;  %v5616_v32 = vsub.f32 %v5472_v7, %v2840_v14  ;;  %v5619_v54 = vsub.f32 %v5542_v61, %v2840_v14 }
 0x36e   :  { %v2885_v20 = vmul.f32 %v5610_v24, %v5610_v24  ;;  %v2886_v25 = vmul.f32 %v5613_v8, %v5613_v8  ;;  %v2887_v37 = vmul.f32 %v5616_v32, %v5616_v32  ;;  %v2888_v7 = vmul.f32 %v5619_v54, %v5619_v54 }
 0x370   :  { %v2921_v19 = vadd.f32 %v2886_v25, %v2885_v20 }
 0x371   :  { %v2792_v1 = vpop.xlane.xlu1 %2791 }
 0x372   :  { %v2841_v11 = vmul.f32 %v5606_v46, %v2792_v1  ;;  %v2922_v18 = vadd.f32 %v2921_v19, %v2887_v37 }
 0x374   :  { %v5631_v61 = vsub.f32 %v6322_v52, %v2841_v11  ;;  %v5634_v36 = vsub.f32 %v5390_v50, %v2841_v11  ;;  %v2923_v43 = vadd.f32 %v2922_v18, %v2888_v7  ;;  %v5637_v6 = vsub.f32 %v5475_v58, %v2841_v11 }
 0x375   :  { %v5640_v53 = vsub.f32 %v5549_v48, %v2841_v11 }
 0x376   :  { %2924 = vadd.xlane.f32.xlu0 %v2923_v43  ;;  %v2889_v60 = vmul.f32 %v5631_v61, %v5631_v61  ;;  %v2890_v35 = vmul.f32 %v5634_v36, %v5634_v36  ;;  %v2891_v52 = vmul.f32 %v5637_v6, %v5637_v6 }
 0x377   :  { %v2892_v58 = vmul.f32 %v5640_v53, %v5640_v53 }
 0x378   :  { %v2926_v3 = vadd.f32 %v2890_v35, %v2889_v60 }
 0x379   :  { %v2797_v50 = vpop.xlane.xlu1 %2796 }
 0x37a   :  { %v2842_v56 = vmul.f32 %v5606_v46, %v2797_v50  ;;  %v2927_v47 = vadd.f32 %v2926_v3, %v2891_v52 }
 0x37c   :  { %v5652_v48 = vsub.f32 %v6323_v26, %v2842_v56  ;;  %v5655_v42 = vsub.f32 %v5397_v33, %v2842_v56  ;;  %v2928_v39 = vadd.f32 %v2927_v47, %v2892_v58  ;;  %v5658_v17 = vsub.f32 %v5482_v10, %v2842_v56 }
 0x37d   :  { %v5661_v38 = vsub.f32 %v5557_v57, %v2842_v56 }
 0x37e   :  { %2929 = vadd.xlane.f32.xlu1 %v2928_v39  ;;  %v2893_v62 = vmul.f32 %v5652_v48, %v5652_v48  ;;  %v2894_v28 = vmul.f32 %v5655_v42, %v5655_v42  ;;  %v2895_v26 = vmul.f32 %v5658_v17, %v5658_v17 }
 0x37f   :  { %v2896_v10 = vmul.f32 %v5661_v38, %v5661_v38 }
 0x380   :  { %v2931_v12 = vadd.f32 %v2894_v28, %v2893_v62 }
 0x381   :  { %v2802_v33 = vpop.xlane.xlu2 %2801 }
 0x382   :  { %v2843_v16 = vmul.f32 %v5606_v46, %v2802_v33  ;;  %v2932_v14 = vadd.f32 %v2931_v12, %v2895_v26 }
 0x384   :  { %v5673_v57 = vsub.f32 %v6324_v4, %v2843_v16  ;;  %v5676_v20 = vsub.f32 %v5400_v40, %v2843_v16  ;;  %v2933_v25 = vadd.f32 %v2932_v14, %v2896_v10  ;;  %v5679_v37 = vsub.f32 %v5485_v30, %v2843_v16 }
 0x385   :  { %v5682_v19 = vsub.f32 %v5563_v13, %v2843_v16 }
 0x386   :  { %2934 = vadd.xlane.f32.xlu2 %v2933_v25  ;;  %v2897_v1 = vmul.f32 %v5673_v57, %v5673_v57  ;;  %v2898_v11 = vmul.f32 %v5676_v20, %v5676_v20  ;;  %v2899_v4 = vmul.f32 %v5679_v37, %v5679_v37 }
 0x387   :  { %v2900_v30 = vmul.f32 %v5682_v19, %v5682_v19 }
 0x388   :  { %v2936_v7 = vadd.f32 %v2898_v11, %v2897_v1 }
 0x389   :  { %v2807_v40 = vpop.xlane.xlu2 %2806 }
 0x38a   :  { %v2844_v18 = vmul.f32 %v5606_v46, %v2807_v40  ;;  %v2937_v43 = vadd.f32 %v2936_v7, %v2899_v4 }
 0x38c   :  { %v5694_v13 = vsub.f32 %v6325_v49, %v2844_v18  ;;  %v5697_v60 = vsub.f32 %v5407_v9, %v2844_v18  ;;  %v2938_v35 = vadd.f32 %v2937_v43, %v2900_v30  ;;  %v5700_v52 = vsub.f32 %v5492_v23, %v2844_v18 }
 0x38d   :  { %v5703_v3 = vsub.f32 %v5571_v22, %v2844_v18 }
 0x38e   :  { %2939 = vadd.xlane.f32.xlu0 %v2938_v35  ;;  %v2901_v50 = vmul.f32 %v5694_v13, %v5694_v13  ;;  %v2902_v56 = vmul.f32 %v5697_v60, %v5697_v60  ;;  %v2903_v49 = vmul.f32 %v5700_v52, %v5700_v52 }
 0x38f   :  { %v2904_v9 = vmul.f32 %v5703_v3, %v5703_v3 }
 0x390   :  { %v2941_v58 = vadd.f32 %v2902_v56, %v2901_v50 }
 0x392   :  { %v2942_v47 = vadd.f32 %v2941_v58, %v2903_v49 }
 0x394   :  { %v2943_v23 = vadd.f32 %v2942_v47, %v2904_v9 }
 0x396   :  { %2944 = vadd.xlane.f32.xlu1 %v2943_v23 }
 0x399   :  { %v2817_v39 = vpop.xlane.xlu1 %2816 }
 0x39a   :  { %v2846_v22 = vmul.f32 %v5606_v46, %v2817_v39 }
 0x39c   :  { %v5715_v62 = vsub.f32 %v6326_v27, %v2846_v22  ;;  %v5718_v28 = vsub.f32 %v5417_v63, %v2846_v22  ;;  %v5721_v26 = vsub.f32 %v5502_v2, %v2846_v22  ;;  %v5724_v12 = vsub.f32 %v5578_v34, %v2846_v22 }
 0x39e   :  { %v2909_v33 = vmul.f32 %v5715_v62, %v5715_v62  ;;  %v2910_v16 = vmul.f32 %v5718_v28, %v5718_v28  ;;  %v2911_v10 = vmul.f32 %v5721_v26, %v5721_v26  ;;  %v2912_v2 = vmul.f32 %v5724_v12, %v5724_v12 }
 0x3a0   :  { %v2951_v27 = vadd.f32 %v2910_v16, %v2909_v33 }
 0x3a1   :  { %v2822_v14 = vpop.xlane.xlu2 %2821 }
 0x3a2   :  { %v2847_v63 = vmul.f32 %v5606_v46, %v2822_v14  ;;  %v2952_v25 = vadd.f32 %v2951_v27, %v2911_v10 }
 0x3a4   :  { %v5736_v34 = vsub.f32 %v6327_v21, %v2847_v63  ;;  %v5739_v1 = vsub.f32 %v5420_v59, %v2847_v63  ;;  %v2953_v11 = vadd.f32 %v2952_v25, %v2912_v2  ;;  %v5742_v4 = vsub.f32 %v5505_v51, %v2847_v63 }
 0x3a5   :  { %v5745_v7 = vsub.f32 %v5585_v44, %v2847_v63 }
 0x3a6   :  { %2954 = vadd.xlane.f32.xlu0 %v2953_v11  ;;  %v2913_v40 = vmul.f32 %v5736_v34, %v5736_v34  ;;  %v2914_v18 = vmul.f32 %v5739_v1, %v5739_v1  ;;  %v2915_v21 = vmul.f32 %v5742_v4, %v5742_v4 }
 0x3a7   :  { %v2916_v43 = vmul.f32 %v5745_v7, %v5745_v7 }
 0x3a8   :  { %v2956_v30 = vadd.f32 %v2914_v18, %v2913_v40 }
 0x3aa   :  { %v2832_v59 = vpop.xlane.xlu0 %2831  ;;  %v2957_v51 = vadd.f32 %v2956_v30, %v2915_v21 }
 0x3ab   :  { %v2848_v50 = vmul.f32 %v5606_v46, %v2832_v59 }
 0x3ac   :  { %v2958_v35 = vadd.f32 %v2957_v51, %v2916_v43 }
 0x3ad   :  { %v5757_v44 = vsub.f32 %v6329_v31, %v2848_v50  ;;  %v5760_v56 = vsub.f32 %v6328_v45, %v2848_v50  ;;  %v5793_v14 = vsub.f32 %v5596_v15, %v2848_v50 }
 0x3ae   :  { %2959 = vadd.xlane.f32.xlu1 %v2958_v35 }
 0x3af   :  { %6332 = vst [vmem:[#allocation17_spill] sm:$0xff] %v5757_v44  ;;  %v2917_v39 = vmul.f32 %v5757_v44, %v5757_v44  ;;  %v2918_v31 = vmul.f32 %v5760_v56, %v5760_v56  ;;  %v2920_v25 = vmul.f32 %v5793_v14, %v5793_v14 }
 0x3b0   :  { %6333 = vst [vmem:[#allocation18_spill] sm:$0xff] %v5760_v56 }
 0x3b1   :  { %v2961_v16 = vsel %vm2823_vm0, %v2917_v39, 0.0  ;;  %v2962_v10 = vsel %vm2823_vm0, %v2918_v31, 0.0  ;;  %6338 = vst [vmem:[#allocation23_spill] sm:$0xff] %v5793_v14  ;;  %v2966_v18 = vsel %vm2823_vm0, %v2920_v25, 0.0  ;;  %v2781_v39 = vld [vmem:[#allocation7] sm:$0xf] }
 0x3b2   :  { %v2812_v49 = vpop.xlane.xlu0 %2811  ;;  %v2963_v2 = vadd.f32 %v2962_v10, %v2961_v16  ;;  %v5804_v10 = vperm.slane %v2781_v39, 0  ;;  %v5812_v25 = vperm.slane %v2781_v39, 3 }
 0x3b3   :  { %v2845_v58 = vmul.f32 %v5606_v46, %v2812_v49 }
 0x3b5   :  { %v5764_v9 = vsub.f32 %v6330_v55, %v2845_v58  ;;  %v5767_v47 = vsub.f32 %v6331_v0, %v2845_v58  ;;  %v5770_v23 = vsub.f32 %v5495_v5, %v2845_v58  ;;  %v5777_v45 = vsub.f32 %v5602_v41, %v2845_v58 }
 0x3b6   :  { %v5784_v0 = vsub.f32 %v5511_v29, %v2848_v50 }
 0x3b7   :  { %6334 = vst [vmem:[#allocation19_spill] sm:$0xff] %v5767_v47  ;;  %v2905_v22 = vmul.f32 %v5764_v9, %v5764_v9  ;;  %v2906_v55 = vmul.f32 %v5767_v47, %v5767_v47  ;;  %v2907_v5 = vmul.f32 %v5770_v23, %v5770_v23  ;;  %v2908_v41 = vmul.f32 %v5777_v45, %v5777_v45 }
 0x3b8   :  { %6335 = vst [vmem:[#allocation20_spill] sm:$0xff] %v5770_v23  ;;  %v2919_v63 = vmul.f32 %v5784_v0, %v5784_v0 }
 0x3b9   :  { %6336 = vst [vmem:[#allocation21_spill] sm:$0xff] %v5777_v45  ;;  %v2946_v33 = vadd.f32 %v2906_v55, %v2905_v22 }
 0x3ba   :  { %6337 = vst [vmem:[#allocation22_spill] sm:$0xff] %v5784_v0  ;;  %v2964_v11 = vsel %vm2823_vm0, %v2919_v63, 0.0  ;;  %v5810_v63 = vperm.slane %v2781_v39, 2 }
 0x3bb   :  { %v2947_v27 = vadd.f32 %v2946_v33, %v2907_v5  ;;  %v2965_v40 = vadd.f32 %v2964_v11, %v2963_v2  ;;  %v2782_v5 = vld [vmem:[#allocation8] sm:$0xf] }
 0x3bc   :  { %v5814_v11 = vperm.slane %v2782_v5, 0 }
 0x3bd   :  { %v2948_v29 = vadd.f32 %v2947_v27, %v2908_v41  ;;  %v2967_v21 = vadd.f32 %v2966_v18, %v2965_v40  ;;  %v5806_v41 = vperm.slane %v2781_v39, 1  ;;  %v5816_v40 = vperm.slane %v2782_v5, 1 }
 0x3be   :  { %v5819_v18 = vperm.slane %v2782_v5, 2 }
 0x3bf   :  { %2949 = vadd.xlane.f32.xlu2 %v2948_v29 }
 0x3c7   :  { %2968 = vadd.xlane.f32.xlu2 %v2967_v21  ;;  %v5821_v21 = vperm.slane %v2782_v5, 3 }
 0x3e9   :  { %v2925_v30 = vpop.xlane.xlu0 %2924 }
 0x3ea   :  { %v2970_v15 = vmul.f32 %v2925_v30, %v5606_v46 }
 0x3ec   :  { %v2979_v59 = vadd.f32 1e-05, %v2970_v15 }
 0x3ee   :  { %4879 = vrsqrt.f32 %v2979_v59  ;;  %vm2994_vm3 = vweird.f32 %v2979_v59 }
 0x3f1   :  { %v2930_v43 = vpop.xlane.xlu1 %2929 }
 0x3f2   :  { %v2971_v51 = vmul.f32 %v2930_v43, %v5606_v46 }
 0x3f4   :  { %v4880_v35 = vpop.eup %4879  ;;  %v2980_v50 = vadd.f32 1e-05, %v2971_v51 }
 0x3f5   :  { %v2989_v49 = vmul.f32 %v4880_v35, %v2979_v59  ;;  %vm2995_vm2 = vweird.f32 %v4880_v35 }
 0x3f6   :  { %4881 = vrsqrt.f32 %v2980_v50  ;;  %vm2996_vm4 = vmor %vm2994_vm3, %vm2995_vm2  ;;  %vm3004_vm6 = vweird.f32 %v2980_v50 }
 0x3f7   :  { %v2990_v58 = vmul.f32 %v4880_v35, %v2989_v49 }
 0x3f9   :  { %v2991_v31 = vmul.f32 0.5, %v2990_v58  ;;  %v2935_v22 = vpop.xlane.xlu2 %2934 }
 0x3fa   :  { %v2972_v55 = vmul.f32 %v2935_v22, %v5606_v46 }
 0x3fb   :  { %v2992_v33 = vsub.f32 1.5, %v2991_v31 }
 0x3fc   :  { %v4882_v16 = vpop.eup %4881  ;;  %v5808_v27 = vadd.f32 1e-05, %v2972_v55 }
 0x3fd   :  { %v2993_v29 = vmul.f32 %v4880_v35, %v2992_v33  ;;  %v2999_v2 = vmul.f32 %v4882_v16, %v2980_v50  ;;  %vm3005_vm5 = vweird.f32 %v4882_v16 }
 0x3fe   :  { %4883 = vrsqrt.f32 %v5808_v27  ;;  %vm3006_vm7 = vmor %vm3004_vm6, %vm3005_vm5  ;;  %vm3014_vm8 = vweird.f32 %v5808_v27 }
 0x3ff   :  { %v2997_v30 = vsel %vm2996_vm4, %v4880_v35, %v2993_v29  ;;  %v3000_v15 = vmul.f32 %v4882_v16, %v2999_v2 }
 0x400   :  { %v3078_v43 = vmul.f32 %v2997_v30, %v5610_v24  ;;  %v3079_v59 = vmul.f32 %v2997_v30, %v5613_v8  ;;  %v3080_v51 = vmul.f32 %v2997_v30, %v5616_v32  ;;  %v3081_v49 = vmul.f32 %v2997_v30, %v5619_v54 }
 0x401   :  { %v3001_v58 = vmul.f32 0.5, %v3000_v15  ;;  %v2940_v39 = vpop.xlane.xlu0 %2939 }
 0x402   :  { %v3123_v31 = vmul.f32 %v5804_v10, %v3078_v43  ;;  %v3124_v22 = vmul.f32 %v5806_v41, %v3079_v59  ;;  %v3125_v55 = vmul.f32 %v5810_v63, %v3080_v51  ;;  %v3126_v5 = vmul.f32 %v5812_v25, %v3081_v49 }
 0x403   :  { %v3002_v35 = vsub.f32 1.5, %v3001_v58  ;;  %v2973_v24 = vmul.f32 %v2940_v39, %v5606_v46 }
 0x404   :  { %v5832_v33 = vpop.eup %4883  ;;  %v3168_v8 = vadd.f32 %v5814_v11, %v3123_v31  ;;  %v5836_v32 = vadd.f32 %v5816_v40, %v3124_v22  ;;  %v5839_v54 = vadd.f32 %v5819_v18, %v3125_v55  ;;  %v5842_v29 = vadd.f32 %v5821_v21, %v3126_v5 }
 0x405   :  { %v3003_v2 = vmul.f32 %v4882_v16, %v3002_v35  ;;  %v3009_v30 = vmul.f32 %v5832_v33, %v5808_v27  ;;  %v5846_v15 = vadd.f32 1e-05, %v2973_v24  ;;  %vm3015_vm9 = vweird.f32 %v5832_v33 }
 0x406   :  { %v3240_v43 = vmul.f32 0.044715, %v3168_v8  ;;  %v3241_v59 = vmul.f32 0.044715, %v5836_v32  ;;  %v3242_v51 = vmul.f32 0.044715, %v5839_v54  ;;  %vm3016_vm10 = vmor %vm3014_vm8, %vm3015_vm9 }
 0x407   :  { %v3007_v49 = vsel %vm3006_vm7, %v4882_v16, %v3003_v2  ;;  %v3243_v58 = vmul.f32 0.044715, %v5842_v29  ;;  %4885 = vrsqrt.f32 %v5846_v15  ;;  %v3205_v56 = vmul.f32 0.5, %v5836_v32 }
 0x408   :  { %v3082_v39 = vmul.f32 %v3007_v49, %v5631_v61  ;;  %v3083_v31 = vmul.f32 %v3007_v49, %v5634_v36  ;;  %v3084_v50 = vmul.f32 %v3007_v49, %v5637_v6  ;;  %v3276_v22 = vmul.f32 %v3240_v43, %v3168_v8 }
 0x409   :  { %v3277_v55 = vmul.f32 %v3241_v59, %v5836_v32  ;;  %v3278_v5 = vmul.f32 %v3242_v51, %v5839_v54  ;;  %v3085_v35 = vmul.f32 %v3007_v49, %v5640_v53  ;;  %v3279_v24 = vmul.f32 %v3243_v58, %v5842_v29 }
 0x40a   :  { %v3127_v14 = vmul.f32 %v5804_v10, %v3082_v39  ;;  %v3128_v16 = vmul.f32 %v5806_v41, %v3083_v31  ;;  %v3129_v2 = vmul.f32 %v5810_v63, %v3084_v50  ;;  %v3312_v61 = vmul.f32 %v3276_v22, %v3168_v8 }
 0x40b   :  { %v3313_v36 = vmul.f32 %v3277_v55, %v5836_v32  ;;  %v3314_v6 = vmul.f32 %v3278_v5, %v5839_v54  ;;  %v3130_v43 = vmul.f32 %v5812_v25, %v3085_v35  ;;  %v3315_v59 = vmul.f32 %v3279_v24, %v5842_v29 }
 0x40c   :  { %v5866_v51 = vadd.f32 %v5814_v11, %v3127_v14  ;;  %v5869_v53 = vadd.f32 %v5816_v40, %v3128_v16  ;;  %v5872_v49 = vadd.f32 %v5819_v18, %v3129_v2  ;;  %v3348_v58 = vadd.f32 %v3312_v61, %v3168_v8 }
 0x40d   :  { %v3349_v39 = vadd.f32 %v3313_v36, %v5836_v32  ;;  %v3350_v31 = vadd.f32 %v3314_v6, %v5839_v54  ;;  %v5877_v50 = vadd.f32 %v5821_v21, %v3130_v43  ;;  %v3351_v22 = vadd.f32 %v3315_v59, %v5842_v29  ;;  %v2945_v6 = vpop.xlane.xlu1 %2944 }
 0x40e   :  { %v3384_v14 = vmul.f32 0.7978846, %v3348_v58  ;;  %v3010_v35 = vmul.f32 %v5832_v33, %v3009_v30  ;;  %v3244_v16 = vmul.f32 0.044715, %v5866_v51  ;;  %v3245_v2 = vmul.f32 0.044715, %v5869_v53 }
 0x40f   :  { %v3385_v55 = vmul.f32 0.7978846, %v3349_v39  ;;  %v3386_v5 = vmul.f32 0.7978846, %v3350_v31  ;;  %v3387_v24 = vmul.f32 0.7978846, %v3351_v22  ;;  %v2974_v0 = vmul.f32 %v2945_v6, %v5606_v46 }
 0x410   :  { %4887 = vtanh.f32 %v3384_v14  ;;  %v3246_v61 = vmul.f32 0.044715, %v5872_v49  ;;  %v3247_v36 = vmul.f32 0.044715, %v5877_v50  ;;  %v3204_v43 = vmul.f32 0.5, %v3168_v8 }
 0x411   :  { %4889 = vtanh.f32 %v3385_v55  ;;  %v3280_v59 = vmul.f32 %v3244_v16, %v5866_v51  ;;  %v3011_v30 = vmul.f32 0.5, %v3010_v35  ;;  %v3281_v58 = vmul.f32 %v3245_v2, %v5869_v53  ;;  %v5898_v35 = vpop.eup %4885 }
 0x412   :  { %4891 = vtanh.f32 %v3386_v5  ;;  %v3282_v39 = vmul.f32 %v3246_v61, %v5872_v49  ;;  %v3283_v31 = vmul.f32 %v3247_v36, %v5877_v50  ;;  %v3206_v16 = vmul.f32 0.5, %v5839_v54 }
 0x413   :  { %4893 = vtanh.f32 %v3387_v24  ;;  %v3316_v22 = vmul.f32 %v3280_v59, %v5866_v51  ;;  %v3012_v14 = vsub.f32 1.5, %v3011_v30  ;;  %v3317_v8 = vmul.f32 %v3281_v58, %v5869_v53 }
 0x414   :  { %v3318_v55 = vmul.f32 %v3282_v39, %v5872_v49  ;;  %v3319_v5 = vmul.f32 %v3283_v31, %v5877_v50  ;;  %v3207_v2 = vmul.f32 0.5, %v5842_v29  ;;  %v5911_v30 = vadd.f32 1e-05, %v2974_v0 }
 0x415   :  { %v3352_v24 = vadd.f32 %v3316_v22, %v5866_v51  ;;  %v3013_v61 = vmul.f32 %v5832_v33, %v3012_v14  ;;  %v3353_v6 = vadd.f32 %v3317_v8, %v5869_v53  ;;  %v3019_v31 = vmul.f32 %v5898_v35, %v5846_v15 }
 0x416   :  { %v4888_v36 = vpop.eup %4887  ;;  %v3354_v32 = vadd.f32 %v3318_v55, %v5872_v49  ;;  %v3355_v59 = vadd.f32 %v3319_v5, %v5877_v50  ;;  %vm3024_vm11 = vweird.f32 %v5846_v15  ;;  %vm3025_vm12 = vweird.f32 %v5898_v35 }
 0x417   :  { %v4890_v54 = vpop.eup %4889  ;;  %v3456_v29 = vadd.f32 1.0, %v4888_v36  ;;  %v3388_v58 = vmul.f32 0.7978846, %v3352_v24  ;;  %v3017_v39 = vsel %vm3016_vm10, %v5832_v33, %v3013_v61  ;;  %v3389_v8 = vmul.f32 0.7978846, %v3353_v6  ;;  %vm3026_vm13 = vmor %vm3024_vm11, %vm3025_vm12 }
 0x418   :  { %v4892_v22 = vpop.eup %4891  ;;  %v3457_v14 = vadd.f32 1.0, %v4890_v54  ;;  %v3390_v55 = vmul.f32 0.7978846, %v3354_v32  ;;  %v3086_v5 = vmul.f32 %v3017_v39, %v5652_v48  ;;  %v3391_v23 = vmul.f32 0.7978846, %v3355_v59 }
 0x419   :  { %v4894_v44 = vpop.eup %4893  ;;  %v3458_v45 = vadd.f32 1.0, %v4892_v22  ;;  %v3492_v27 = vmul.f32 %v3456_v29, %v3204_v43  ;;  %4895 = vtanh.f32 %v3388_v58  ;;  %v3087_v24 = vmul.f32 %v3017_v39, %v5655_v42 }
 0x41a   :  { %v3459_v0 = vadd.f32 1.0, %v4894_v44  ;;  %v3493_v47 = vmul.f32 %v3457_v14, %v3205_v56  ;;  %4897 = vtanh.f32 %v3389_v8  ;;  %v3088_v61 = vmul.f32 %v3017_v39, %v5658_v17 }
 0x41b   :  { %v3494_v33 = vmul.f32 %v3458_v45, %v3206_v16  ;;  %3528 = vst [vmem:[#allocation10] sm:$0xff] %v3492_v27  ;;  %4899 = vtanh.f32 %v3390_v55  ;;  %v3089_v36 = vmul.f32 %v3017_v39, %v5661_v38  ;;  %v3131_v48 = vmul.f32 %v5804_v10, %v3086_v5 }
 0x41c   :  { %v3495_v6 = vmul.f32 %v3459_v0, %v3207_v2  ;;  %3529 = vst [vmem:[#allocation10 + $0x8] sm:$0xff] %v3493_v47  ;;  %4901 = vtanh.f32 %v3391_v23  ;;  %v3132_v43 = vmul.f32 %v5806_v41, %v3087_v24  ;;  %v3133_v44 = vmul.f32 %v5810_v63, %v3088_v61 }
 0x41d   :  { %3530 = vst [vmem:[#allocation10 + $0x10] sm:$0xff] %v3494_v33  ;;  %v3134_v56 = vmul.f32 %v5812_v25, %v3089_v36  ;;  %v3020_v42 = vmul.f32 %v5898_v35, %v3019_v31  ;;  %4903 = vrsqrt.f32 %v5911_v30  ;;  %v3208_v17 = vmul.f32 0.5, %v5866_v51  ;;  %v2955_v33 = vpop.xlane.xlu0 %2954 }
 0x41e   :  { %3531 = vst [vmem:[#allocation10 + $0x18] sm:$0xff] %v3495_v6  ;;  %v3176_v38 = vadd.f32 %v5814_v11, %v3131_v48  ;;  %v5929_v47 = vadd.f32 %v5816_v40, %v3132_v43  ;;  %v3209_v45 = vmul.f32 0.5, %v5869_v53  ;;  %v3210_v16 = vmul.f32 0.5, %v5872_v49 }
 0x41f   :  { %v4896_v23 = vpop.eup %4895  ;;  %v5934_v2 = vadd.f32 %v5819_v18, %v3133_v44  ;;  %v5937_v32 = vadd.f32 %v5821_v21, %v3134_v56  ;;  %v3211_v54 = vmul.f32 0.5, %v5877_v50  ;;  %v3021_v58 = vmul.f32 0.5, %v3020_v42 }
 0x420   :  { %v4898_v59 = vpop.eup %4897  ;;  %v3460_v51 = vadd.f32 1.0, %v4896_v23  ;;  %v3248_v29 = vmul.f32 0.044715, %v3176_v38  ;;  %v3249_v22 = vmul.f32 0.044715, %v5929_v47  ;;  %vm3034_vm14 = vweird.f32 %v5911_v30 }
 0x421   :  { %v4900_v39 = vpop.eup %4899  ;;  %v3461_v31 = vadd.f32 1.0, %v4898_v59  ;;  %v3250_v8 = vmul.f32 0.044715, %v5934_v2  ;;  %v3251_v55 = vmul.f32 0.044715, %v5937_v32  ;;  %v3022_v48 = vsub.f32 1.5, %v3021_v58 }
 0x422   :  { %v4902_v53 = vpop.eup %4901  ;;  %v3462_v49 = vadd.f32 1.0, %v4900_v39  ;;  %v3496_v14 = vmul.f32 %v3460_v51, %v3208_v17  ;;  %v3284_v0 = vmul.f32 %v3248_v29, %v3176_v38  ;;  %v3285_v24 = vmul.f32 %v3249_v22, %v5929_v47  ;;  %v2960_v17 = vpop.xlane.xlu1 %2959 }
 0x423   :  { %v5945_v5 = vpop.eup %4903  ;;  %v3463_v50 = vadd.f32 1.0, %v4902_v53  ;;  %v3497_v27 = vmul.f32 %v3461_v31, %v3209_v45  ;;  %v3286_v36 = vmul.f32 %v3250_v8, %v5934_v2  ;;  %v3287_v6 = vmul.f32 %v3251_v55, %v5937_v32 }
 0x424   :  { %v3498_v61 = vmul.f32 %v3462_v49, %v3210_v16  ;;  %3532 = vst [vmem:[#allocation10 + $0x20] sm:$0xff] %v3496_v14  ;;  %v3320_v44 = vmul.f32 %v3284_v0, %v3176_v38  ;;  %v3321_v56 = vmul.f32 %v3285_v24, %v5929_v47  ;;  %v3029_v42 = vmul.f32 %v5945_v5, %v5911_v30 }
 0x425   :  { %v3499_v43 = vmul.f32 %v3463_v50, %v3211_v54  ;;  %3533 = vst [vmem:[#allocation10 + $0x28] sm:$0xff] %v3497_v27  ;;  %v3322_v23 = vmul.f32 %v3286_v36, %v5934_v2  ;;  %v3323_v45 = vmul.f32 %v3287_v6, %v5937_v32  ;;  %v3023_v16 = vmul.f32 %v5898_v35, %v3022_v48 }
 0x426   :  { %3534 = vst [vmem:[#allocation10 + $0x30] sm:$0xff] %v3498_v61  ;;  %v2976_v59 = vmul.f32 %v2955_v33, %v5606_v46  ;;  %v3212_v51 = vmul.f32 0.5, %v3176_v38  ;;  %v3356_v54 = vadd.f32 %v3320_v44, %v3176_v38  ;;  %v3357_v29 = vadd.f32 %v3321_v56, %v5929_v47 }
 0x427   :  { %3535 = vst [vmem:[#allocation10 + $0x38] sm:$0xff] %v3499_v43  ;;  %v3030_v58 = vmul.f32 %v5945_v5, %v3029_v42  ;;  %v3358_v39 = vadd.f32 %v3322_v23, %v5934_v2  ;;  %v3359_v31 = vadd.f32 %v3323_v45, %v5937_v32  ;;  %v3027_v22 = vsel %vm3026_vm13, %v5898_v35, %v3023_v16 }
 0x428   :  { %v2977_v53 = vmul.f32 %v2960_v17, %v5606_v46  ;;  %v3392_v49 = vmul.f32 0.7978846, %v3356_v54  ;;  %v3393_v14 = vmul.f32 0.7978846, %v3357_v29  ;;  %v3090_v38 = vmul.f32 %v3027_v22, %v5673_v57 }
 0x429   :  { %v3091_v8 = vmul.f32 %v3027_v22, %v5676_v20  ;;  %v3394_v15 = vmul.f32 0.7978846, %v3358_v39  ;;  %v3395_v55 = vmul.f32 0.7978846, %v3359_v31  ;;  %v3092_v50 = vmul.f32 %v3027_v22, %v5679_v37 }
 0x42a   :  { %v3093_v27 = vmul.f32 %v3027_v22, %v5682_v19  ;;  %4905 = vtanh.f32 %v3392_v49  ;;  %v3135_v0 = vmul.f32 %v5804_v10, %v3090_v38  ;;  %v3031_v24 = vmul.f32 0.5, %v3030_v58 }
 0x42b   :  { %v3136_v35 = vmul.f32 %v5806_v41, %v3091_v8  ;;  %4907 = vtanh.f32 %v3393_v14  ;;  %v3137_v33 = vmul.f32 %v5810_v63, %v3092_v50  ;;  %v5976_v20 = vadd.f32 1e-05, %v2976_v59 }
 0x42c   :  { %v3138_v57 = vmul.f32 %v5812_v25, %v3093_v27  ;;  %4909 = vtanh.f32 %v3394_v15  ;;  %v5979_v61 = vadd.f32 %v5814_v11, %v3135_v0  ;;  %v3032_v19 = vsub.f32 1.5, %v3031_v24 }
 0x42d   :  { %v5982_v37 = vadd.f32 %v5816_v40, %v3136_v35  ;;  %4911 = vtanh.f32 %v3395_v55  ;;  %v5985_v36 = vadd.f32 %v5819_v18, %v3137_v33  ;;  %v5990_v48 = vadd.f32 1e-05, %v2977_v53 }
 0x42e   :  { %v5988_v6 = vadd.f32 %v5821_v21, %v3138_v57  ;;  %v3213_v43 = vmul.f32 0.5, %v5929_v47  ;;  %v3252_v44 = vmul.f32 0.044715, %v5979_v61  ;;  %vm3035_vm15 = vweird.f32 %v5945_v5 }
 0x42f   :  { %v3253_v56 = vmul.f32 0.044715, %v5982_v37  ;;  %v3214_v42 = vmul.f32 0.5, %v5934_v2  ;;  %v3215_v17 = vmul.f32 0.5, %v5937_v32  ;;  %v3254_v23 = vmul.f32 0.044715, %v5985_v36  ;;  %vm3036_vm0 = vmor %vm3034_vm14, %vm3035_vm15 }
 0x430   :  { %v3255_v45 = vmul.f32 0.044715, %v5988_v6  ;;  %v4906_v16 = vpop.eup %4905  ;;  %v3288_v59 = vmul.f32 %v3252_v44, %v5979_v61  ;;  %v3033_v47 = vmul.f32 %v5945_v5, %v3032_v19  ;;  %4913 = vrsqrt.f32 %v5976_v20 }
 0x431   :  { %v3289_v54 = vmul.f32 %v3253_v56, %v5982_v37  ;;  %v4908_v29 = vpop.eup %4907  ;;  %v3464_v58 = vadd.f32 1.0, %v4906_v16  ;;  %v3290_v39 = vmul.f32 %v3254_v23, %v5985_v36  ;;  %4915 = vrsqrt.f32 %v5990_v48 }
 0x432   :  { %v3291_v2 = vmul.f32 %v3255_v45, %v5988_v6  ;;  %v4910_v32 = vpop.eup %4909  ;;  %v3465_v31 = vadd.f32 1.0, %v4908_v29  ;;  %v3324_v22 = vmul.f32 %v3288_v59, %v5979_v61  ;;  %v3037_v49 = vsel %vm3036_vm0, %v5945_v5, %v3033_v47 }
 0x433   :  { %v3325_v53 = vmul.f32 %v3289_v54, %v5982_v37  ;;  %v4912_v14 = vpop.eup %4911  ;;  %v3466_v38 = vadd.f32 1.0, %v4910_v32  ;;  %v3500_v8 = vmul.f32 %v3464_v58, %v3212_v51  ;;  %v3326_v15 = vmul.f32 %v3290_v39, %v5985_v36 }
 0x434   :  { %v3327_v55 = vmul.f32 %v3291_v2, %v5988_v6  ;;  %v3467_v50 = vadd.f32 1.0, %v4912_v14  ;;  %v3501_v30 = vmul.f32 %v3465_v31, %v3213_v43  ;;  %v3360_v27 = vadd.f32 %v3324_v22, %v5979_v61 }
 0x435   :  { %v3361_v0 = vadd.f32 %v3325_v53, %v5982_v37  ;;  %v3502_v35 = vmul.f32 %v3466_v38, %v3214_v42  ;;  %3536 = vst [vmem:[#allocation10 + $0x40] sm:$0xff] %v3500_v8  ;;  %v3362_v24 = vadd.f32 %v3326_v15, %v5985_v36  ;;  %v3094_v5 = vmul.f32 %v3037_v49, %v5694_v13 }
 0x436   :  { %v3363_v33 = vadd.f32 %v3327_v55, %v5988_v6  ;;  %v6019_v57 = vpop.eup %4913  ;;  %v3503_v51 = vmul.f32 %v3467_v50, %v3215_v17  ;;  %3537 = vst [vmem:[#allocation10 + $0x48] sm:$0xff] %v3501_v30  ;;  %v3396_v19 = vmul.f32 0.7978846, %v3360_v27  ;;  %v3095_v43 = vmul.f32 %v3037_v49, %v5697_v60 }
 0x437   :  { %v3397_v44 = vmul.f32 0.7978846, %v3361_v0  ;;  %v6022_v56 = vpop.eup %4915  ;;  %3538 = vst [vmem:[#allocation10 + $0x50] sm:$0xff] %v3502_v35  ;;  %v3398_v23 = vmul.f32 0.7978846, %v3362_v24  ;;  %v3096_v45 = vmul.f32 %v3037_v49, %v5700_v52  ;;  %v3097_v16 = vmul.f32 %v3037_v49, %v5703_v3 }
 0x438   :  { %v3399_v42 = vmul.f32 0.7978846, %v3363_v33  ;;  %3539 = vst [vmem:[#allocation10 + $0x58] sm:$0xff] %v3503_v51  ;;  %4917 = vtanh.f32 %v3396_v19  ;;  %v3139_v13 = vmul.f32 %v5804_v10, %v3094_v5  ;;  %v3140_v17 = vmul.f32 %v5806_v41, %v3095_v43 }
 0x439   :  { %v3049_v59 = vmul.f32 %v6019_v57, %v5976_v20  ;;  %4919 = vtanh.f32 %v3397_v44  ;;  %v3141_v60 = vmul.f32 %v5810_v63, %v3096_v45  ;;  %v3142_v54 = vmul.f32 %v5812_v25, %v3097_v16 }
 0x43a   :  { %4921 = vtanh.f32 %v3398_v23  ;;  %v6033_v47 = vadd.f32 %v5814_v11, %v3139_v13  ;;  %v6036_v52 = vadd.f32 %v5816_v40, %v3140_v17  ;;  %vm3054_vm1 = vweird.f32 %v5976_v20 }
 0x43b   :  { %v3050_v3 = vmul.f32 %v6019_v57, %v3049_v59  ;;  %4923 = vtanh.f32 %v3399_v42  ;;  %v6040_v29 = vadd.f32 %v5819_v18, %v3141_v60  ;;  %v6043_v58 = vadd.f32 %v5821_v21, %v3142_v54 }
 0x43c   :  { %v3059_v39 = vmul.f32 %v6022_v56, %v5990_v48  ;;  %v3216_v2 = vmul.f32 0.5, %v5979_v61  ;;  %v3217_v32 = vmul.f32 0.5, %v5982_v37  ;;  %v3256_v31 = vmul.f32 0.044715, %v6033_v47 }
 0x43d   :  { %v3257_v22 = vmul.f32 0.044715, %v6036_v52  ;;  %v3218_v53 = vmul.f32 0.5, %v5985_v36  ;;  %v3219_v49 = vmul.f32 0.5, %v5988_v6  ;;  %v3258_v14 = vmul.f32 0.044715, %v6040_v29 }
 0x43e   :  { %v3259_v38 = vmul.f32 0.044715, %v6043_v58  ;;  %v4918_v8 = vpop.eup %4917  ;;  %v3292_v15 = vmul.f32 %v3256_v31, %v6033_v47  ;;  %v3051_v61 = vmul.f32 0.5, %v3050_v3  ;;  %vm3055_vm2 = vweird.f32 %v6019_v57 }
 0x43f   :  { %v3293_v55 = vmul.f32 %v3257_v22, %v6036_v52  ;;  %v4920_v37 = vpop.eup %4919  ;;  %v3468_v50 = vadd.f32 1.0, %v4918_v8  ;;  %v3294_v30 = vmul.f32 %v3258_v14, %v6040_v29  ;;  %v3060_v6 = vmul.f32 %v6022_v56, %v3059_v39  ;;  %vm3056_vm4 = vmor %vm3054_vm1, %vm3055_vm2 }
 0x440   :  { %v3295_v36 = vmul.f32 %v3259_v38, %v6043_v58  ;;  %v4922_v27 = vpop.eup %4921  ;;  %v3469_v0 = vadd.f32 1.0, %v4920_v37  ;;  %v3328_v35 = vmul.f32 %v3292_v15, %v6033_v47  ;;  %v3052_v33 = vsub.f32 1.5, %v3051_v61 }
 0x441   :  { %v3329_v24 = vmul.f32 %v3293_v55, %v6036_v52  ;;  %v4924_v5 = vpop.eup %4923  ;;  %v3470_v51 = vadd.f32 1.0, %v4922_v27  ;;  %v3504_v19 = vmul.f32 %v3468_v50, %v3216_v2  ;;  %v3330_v44 = vmul.f32 %v3294_v30, %v6040_v29 }
 0x442   :  { %v3331_v43 = vmul.f32 %v3295_v36, %v6043_v58  ;;  %vm3064_vm3 = vweird.f32 %v5990_v48  ;;  %v3471_v23 = vadd.f32 1.0, %v4924_v5  ;;  %v3505_v42 = vmul.f32 %v3469_v0, %v3217_v32  ;;  %v2950_v32 = vpop.xlane.xlu2 %2949 }
 0x443   :  { %v3364_v45 = vadd.f32 %v3328_v35, %v6033_v47  ;;  %v3365_v16 = vadd.f32 %v3329_v24, %v6036_v52  ;;  %v3506_v13 = vmul.f32 %v3470_v51, %v3218_v53  ;;  %3540 = vst [vmem:[#allocation10 + $0x60] sm:$0xff] %v3504_v19  ;;  %v3366_v17 = vadd.f32 %v3330_v44, %v6040_v29 }
 0x444   :  { %v3367_v59 = vadd.f32 %v3331_v43, %v6043_v58  ;;  %v3053_v60 = vmul.f32 %v6019_v57, %v3052_v33  ;;  %v3507_v54 = vmul.f32 %v3471_v23, %v3219_v49  ;;  %3541 = vst [vmem:[#allocation10 + $0x68] sm:$0xff] %v3505_v42  ;;  %v3061_v2 = vmul.f32 0.5, %v3060_v6 }
 0x445   :  { %v3400_v3 = vmul.f32 0.7978846, %v3364_v45  ;;  %v3401_v39 = vmul.f32 0.7978846, %v3365_v16  ;;  %3542 = vst [vmem:[#allocation10 + $0x70] sm:$0xff] %v3506_v13  ;;  %vm3065_vm5 = vweird.f32 %v6022_v56  ;;  %v2975_v15 = vmul.f32 %v2950_v32, %v5606_v46 }
 0x446   :  { %v3402_v31 = vmul.f32 0.7978846, %v3366_v17  ;;  %v3403_v22 = vmul.f32 0.7978846, %v3367_v59  ;;  %v3057_v53 = vsel %vm3056_vm4, %v6019_v57, %v3053_v60  ;;  %3543 = vst [vmem:[#allocation10 + $0x78] sm:$0xff] %v3507_v54  ;;  %v3062_v8 = vsub.f32 1.5, %v3061_v2  ;;  %vm3066_vm6 = vmor %vm3064_vm3, %vm3065_vm5 }
 0x447   :  { %4925 = vtanh.f32 %v3400_v3  ;;  %v3102_v49 = vmul.f32 %v3057_v53, %v5715_v62  ;;  %v3103_v14 = vmul.f32 %v3057_v53, %v5718_v28  ;;  %v3104_v38 = vmul.f32 %v3057_v53, %v5721_v26 }
 0x448   :  { %4927 = vtanh.f32 %v3401_v39  ;;  %v3105_v20 = vmul.f32 %v3057_v53, %v5724_v12  ;;  %v3063_v28 = vmul.f32 %v6022_v56, %v3062_v8  ;;  %v6088_v37 = vadd.f32 1e-05, %v2975_v15 }
 0x449   :  { %4929 = vtanh.f32 %v3402_v31  ;;  %v3147_v55 = vmul.f32 %v5804_v10, %v3102_v49  ;;  %v3148_v57 = vmul.f32 %v5806_v41, %v3103_v14  ;;  %v3149_v61 = vmul.f32 %v5810_v63, %v3104_v38 }
 0x44a   :  { %4931 = vtanh.f32 %v3403_v22  ;;  %v3150_v62 = vmul.f32 %v5812_v25, %v3105_v20  ;;  %v3220_v30 = vmul.f32 0.5, %v6033_v47  ;;  %v3067_v6 = vsel %vm3066_vm6, %v6022_v56, %v3063_v28 }
 0x44b   :  { %v6091_v26 = vadd.f32 %v5814_v11, %v3147_v55  ;;  %v6094_v12 = vadd.f32 %v5816_v40, %v3148_v57  ;;  %v6097_v50 = vadd.f32 %v5819_v18, %v3149_v61  ;;  %v3221_v0 = vmul.f32 0.5, %v6036_v52 }
 0x44c   :  { %v6105_v36 = vadd.f32 %v5821_v21, %v3150_v62  ;;  %v3222_v35 = vmul.f32 0.5, %v6040_v29  ;;  %v3223_v24 = vmul.f32 0.5, %v6043_v58  ;;  %4933 = vrsqrt.f32 %v6088_v37 }
 0x44d   :  { %v4926_v27 = vpop.eup %4925  ;;  %v3264_v33 = vmul.f32 0.044715, %v6091_v26  ;;  %v3265_v48 = vmul.f32 0.044715, %v6094_v12  ;;  %v3266_v47 = vmul.f32 0.044715, %v6097_v50  ;;  %v3106_v29 = vmul.f32 %v3067_v6, %v5736_v34 }
 0x44e   :  { %v4928_v5 = vpop.eup %4927  ;;  %v3472_v51 = vadd.f32 1.0, %v4926_v27  ;;  %v3267_v56 = vmul.f32 0.044715, %v6105_v36  ;;  %v3107_v34 = vmul.f32 %v3067_v6, %v5739_v1  ;;  %v3108_v31 = vmul.f32 %v3067_v6, %v5742_v4  ;;  %v2969_v4 = vpop.xlane.xlu2 %2968 }
 0x44f   :  { %v4930_v19 = vpop.eup %4929  ;;  %v3473_v44 = vadd.f32 1.0, %v4928_v5  ;;  %v3300_v52 = vmul.f32 %v3264_v33, %v6091_v26  ;;  %v3301_v42 = vmul.f32 %v3265_v48, %v6094_v12  ;;  %v3302_v45 = vmul.f32 %v3266_v47, %v6097_v50 }
 0x450   :  { %v4932_v43 = vpop.eup %4931  ;;  %v3474_v58 = vadd.f32 1.0, %v4930_v19  ;;  %v3508_v23 = vmul.f32 %v3472_v51, %v3220_v30  ;;  %v3303_v17 = vmul.f32 %v3267_v56, %v6105_v36  ;;  %v3109_v14 = vmul.f32 %v3067_v6, %v5745_v7 }
 0x451   :  { %v3475_v16 = vadd.f32 1.0, %v4932_v43  ;;  %v3509_v13 = vmul.f32 %v3473_v44, %v3221_v0  ;;  %v3336_v59 = vmul.f32 %v3300_v52, %v6091_v26  ;;  %v3337_v54 = vmul.f32 %v3301_v42, %v6094_v12 }
 0x452   :  { %v3510_v60 = vmul.f32 %v3474_v58, %v3222_v35  ;;  %3544 = vst [vmem:[#allocation10 + $0x80] sm:$0xff] %v3508_v23  ;;  %v3338_v3 = vmul.f32 %v3302_v45, %v6097_v50  ;;  %v3339_v2 = vmul.f32 %v3303_v17, %v6105_v36  ;;  %v6128_v22 = vpop.eup %4933  ;;  %v3151_v38 = vmul.f32 %v5804_v10, %v3106_v29 }
 0x453   :  { %v3511_v39 = vmul.f32 %v3475_v16, %v3223_v24  ;;  %3545 = vst [vmem:[#allocation10 + $0x88] sm:$0xff] %v3509_v13  ;;  %v3372_v32 = vadd.f32 %v3336_v59, %v6091_v26  ;;  %v3373_v53 = vadd.f32 %v3337_v54, %v6094_v12  ;;  %v3152_v8 = vmul.f32 %v5806_v41, %v3107_v34 }
 0x454   :  { %3546 = vst [vmem:[#allocation10 + $0x90] sm:$0xff] %v3510_v60  ;;  %v3374_v49 = vadd.f32 %v3338_v3, %v6097_v50  ;;  %v3375_v1 = vadd.f32 %v3339_v2, %v6105_v36  ;;  %v3153_v15 = vmul.f32 %v5810_v63, %v3108_v31  ;;  %v3154_v61 = vmul.f32 %v5812_v25, %v3109_v14 }
 0x455   :  { %3547 = vst [vmem:[#allocation10 + $0x98] sm:$0xff] %v3511_v39  ;;  %v3408_v20 = vmul.f32 0.7978846, %v3372_v32  ;;  %v3409_v55 = vmul.f32 0.7978846, %v3373_v53  ;;  %v6139_v62 = vadd.f32 %v5814_v11, %v3151_v38  ;;  %v6142_v7 = vadd.f32 %v5816_v40, %v3152_v8 }
 0x456   :  { %v3410_v57 = vmul.f32 0.7978846, %v3374_v49  ;;  %v3411_v28 = vmul.f32 0.7978846, %v3375_v1  ;;  %v6145_v30 = vadd.f32 %v5819_v18, %v3153_v15  ;;  %v6148_v6 = vadd.f32 %v5821_v21, %v3154_v61  ;;  %v6339_v61 = vld [vmem:[#allocation19_spill] sm:$0xff] }
 0x457   :  { %4935 = vtanh.f32 %v3408_v20  ;;  %v3268_v27 = vmul.f32 0.044715, %v6139_v62  ;;  %v2978_v0 = vmul.f32 %v2969_v4, %v5606_v46  ;;  %v3228_v35 = vmul.f32 0.5, %v6091_v26 }
 0x458   :  { %4937 = vtanh.f32 %v3409_v55  ;;  %v3269_v24 = vmul.f32 0.044715, %v6142_v7  ;;  %v3229_v33 = vmul.f32 0.5, %v6094_v12  ;;  %v3270_v5 = vmul.f32 0.044715, %v6145_v30 }
 0x459   :  { %4939 = vtanh.f32 %v3410_v57  ;;  %v3271_v51 = vmul.f32 0.044715, %v6148_v6  ;;  %v3230_v48 = vmul.f32 0.5, %v6097_v50  ;;  %v3304_v47 = vmul.f32 %v3268_v27, %v6139_v62  ;;  %v6340_v27 = vld [vmem:[#allocation20_spill] sm:$0xff] }
 0x45a   :  { %4941 = vtanh.f32 %v3411_v28  ;;  %v3305_v19 = vmul.f32 %v3269_v24, %v6142_v7  ;;  %v3039_v46 = vmul.f32 %v6128_v22, %v6088_v37  ;;  %v3231_v26 = vmul.f32 0.5, %v6105_v36 }
 0x45b   :  { %v3306_v44 = vmul.f32 %v3270_v5, %v6145_v30  ;;  %v3307_v12 = vmul.f32 %v3271_v51, %v6148_v6  ;;  %v6165_v56 = vadd.f32 1e-05, %v2978_v0  ;;  %v3340_v29 = vmul.f32 %v3304_v47, %v6139_v62 }
 0x45c   :  { %v3341_v50 = vmul.f32 %v3305_v19, %v6142_v7  ;;  %v3040_v43 = vmul.f32 %v6128_v22, %v3039_v46  ;;  %vm3045_vm7 = vweird.f32 %v6128_v22  ;;  %vm3044_vm8 = vweird.f32 %v6088_v37 }
 0x45d   :  { %v4936_v52 = vpop.eup %4935  ;;  %v3342_v42 = vmul.f32 %v3306_v44, %v6145_v30  ;;  %v3343_v36 = vmul.f32 %v3307_v12, %v6148_v6  ;;  %4943 = vrsqrt.f32 %v6165_v56  ;;  %v3376_v13 = vadd.f32 %v3340_v29, %v6139_v62  ;;  %vm3046_vm9 = vmor %vm3044_vm8, %vm3045_vm7 }
 0x45e   :  { %v4938_v58 = vpop.eup %4937  ;;  %v3480_v23 = vadd.f32 1.0, %v4936_v52  ;;  %v3377_v17 = vadd.f32 %v3341_v50, %v6142_v7  ;;  %v3041_v59 = vmul.f32 0.5, %v3040_v43  ;;  %v3232_v37 = vmul.f32 0.5, %v6139_v62 }
 0x45f   :  { %v4940_v45 = vpop.eup %4939  ;;  %v3481_v16 = vadd.f32 1.0, %v4938_v58  ;;  %v3378_v34 = vadd.f32 %v3342_v42, %v6145_v30  ;;  %v3379_v39 = vadd.f32 %v3343_v36, %v6148_v6  ;;  %v3412_v31 = vmul.f32 0.7978846, %v3376_v13 }
 0x460   :  { %v4942_v60 = vpop.eup %4941  ;;  %v3482_v54 = vadd.f32 1.0, %v4940_v45  ;;  %v3516_v3 = vmul.f32 %v3480_v23, %v3228_v35  ;;  %v3413_v53 = vmul.f32 0.7978846, %v3377_v17  ;;  %v3042_v1 = vsub.f32 1.5, %v3041_v59  ;;  %v6341_v35 = vld [vmem:[#allocation21_spill] sm:$0xff] }
 0x461   :  { %v3483_v2 = vadd.f32 1.0, %v4942_v60  ;;  %v3517_v32 = vmul.f32 %v3481_v16, %v3229_v33  ;;  %v3414_v14 = vmul.f32 0.7978846, %v3378_v34  ;;  %v3415_v38 = vmul.f32 0.7978846, %v3379_v39 }
 0x462   :  { %v3518_v49 = vmul.f32 %v3482_v54, %v3230_v48  ;;  %3552 = vst [vmem:[#allocation10 + $0xc0] sm:$0xff] %v3516_v3  ;;  %4945 = vtanh.f32 %v3412_v31  ;;  %v3043_v15 = vmul.f32 %v6128_v22, %v3042_v1  ;;  %v3234_v46 = vmul.f32 0.5, %v6145_v30  ;;  %v6342_v31 = vld [vmem:[#allocation17_spill] sm:$0xff] }
 0x463   :  { %v3519_v20 = vmul.f32 %v3483_v2, %v3231_v26  ;;  %3553 = vst [vmem:[#allocation10 + $0xc8] sm:$0xff] %v3517_v32  ;;  %v4944_v8 = vpop.eup %4943  ;;  %4947 = vtanh.f32 %v3413_v53  ;;  %v3235_v42 = vmul.f32 0.5, %v6148_v6  ;;  %vm3074_vm11 = vweird.f32 %v6165_v56 }
 0x464   :  { %3554 = vst [vmem:[#allocation10 + $0xd0] sm:$0xff] %v3518_v49  ;;  %4949 = vtanh.f32 %v3414_v14  ;;  %v3069_v4 = vmul.f32 %v4944_v8, %v6165_v56  ;;  %v3047_v55 = vsel %vm3046_vm9, %v6128_v22, %v3043_v15  ;;  %vm3075_vm10 = vweird.f32 %v4944_v8  ;;  %v6343_v49 = vld [vmem:[#allocation18_spill] sm:$0xff] }
 0x465   :  { %3555 = vst [vmem:[#allocation10 + $0xd8] sm:$0xff] %v3519_v20  ;;  %4951 = vtanh.f32 %v3415_v38  ;;  %v3098_v57 = vmul.f32 %v3047_v55, %v5764_v9  ;;  %v3099_v28 = vmul.f32 %v3047_v55, %v6339_v61  ;;  %v3100_v0 = vmul.f32 %v3047_v55, %v6340_v27  ;;  %vm3076_vm12 = vmor %vm3074_vm11, %vm3075_vm10  ;;  %v6344_v20 = vld [vmem:[#allocation22_spill] sm:$0xff] }
 0x466   :  { %v3101_v24 = vmul.f32 %v3047_v55, %v6341_v35  ;;  %v3070_v33 = vmul.f32 %v4944_v8, %v3069_v4  ;;  %v3233_v9 = vmul.f32 0.5, %v6142_v7  ;;  %v6345_v4 = vld [vmem:[#allocation23_spill] sm:$0xff] }
 0x467   :  { %v3143_v51 = vmul.f32 %v5804_v10, %v3098_v57  ;;  %v3144_v48 = vmul.f32 %v5806_v41, %v3099_v28  ;;  %v3145_v47 = vmul.f32 %v5810_v63, %v3100_v0 }
 0x468   :  { %v4946_v5 = vpop.eup %4945  ;;  %v3146_v22 = vmul.f32 %v5812_v25, %v3101_v24  ;;  %v3071_v44 = vmul.f32 0.5, %v3070_v33 }
 0x469   :  { %v4948_v19 = vpop.eup %4947  ;;  %v3484_v26 = vadd.f32 1.0, %v4946_v5  ;;  %v6196_v62 = vadd.f32 %v5814_v11, %v3143_v51  ;;  %v6199_v29 = vadd.f32 %v5816_v40, %v3144_v48  ;;  %v6202_v50 = vadd.f32 %v5819_v18, %v3145_v47 }
 0x46a   :  { %v4950_v12 = vpop.eup %4949  ;;  %v3485_v52 = vadd.f32 1.0, %v4948_v19  ;;  %v6205_v7 = vadd.f32 %v5821_v21, %v3146_v22  ;;  %v3072_v30 = vsub.f32 1.5, %v3071_v44 }
 0x46b   :  { %v4952_v43 = vpop.eup %4951  ;;  %v3486_v58 = vadd.f32 1.0, %v4950_v12  ;;  %v3520_v23 = vmul.f32 %v3484_v26, %v3232_v37  ;;  %v3260_v13 = vmul.f32 0.044715, %v6196_v62  ;;  %v3261_v59 = vmul.f32 0.044715, %v6199_v29 }
 0x46c   :  { %v3487_v36 = vadd.f32 1.0, %v4952_v43  ;;  %v3521_v45 = vmul.f32 %v3485_v52, %v3233_v9  ;;  %v3262_v60 = vmul.f32 0.044715, %v6202_v50  ;;  %v3073_v54 = vmul.f32 %v4944_v8, %v3072_v30 }
 0x46d   :  { %v3522_v16 = vmul.f32 %v3486_v58, %v3234_v46  ;;  %3556 = vst [vmem:[#allocation10 + $0xe0] sm:$0xff] %v3520_v23  ;;  %v3263_v3 = vmul.f32 0.044715, %v6205_v7  ;;  %v3296_v6 = vmul.f32 %v3260_v13, %v6196_v62  ;;  %v3297_v34 = vmul.f32 %v3261_v59, %v6199_v29 }
 0x46e   :  { %v3523_v17 = vmul.f32 %v3487_v36, %v3235_v42  ;;  %3557 = vst [vmem:[#allocation10 + $0xe8] sm:$0xff] %v3521_v45  ;;  %v3298_v39 = vmul.f32 %v3262_v60, %v6202_v50  ;;  %v3077_v2 = vsel %vm3076_vm12, %v4944_v8, %v3073_v54  ;;  %v3225_v23 = vmul.f32 0.5, %v6199_v29 }
 0x46f   :  { %3558 = vst [vmem:[#allocation10 + $0xf0] sm:$0xff] %v3522_v16  ;;  %v3299_v56 = vmul.f32 %v3263_v3, %v6205_v7  ;;  %v3332_v32 = vmul.f32 %v3296_v6, %v6196_v62  ;;  %v3110_v53 = vmul.f32 %v3077_v2, %v6342_v31  ;;  %v3111_v14 = vmul.f32 %v3077_v2, %v6343_v49 }
 0x470   :  { %3559 = vst [vmem:[#allocation10 + $0xf8] sm:$0xff] %v3523_v17  ;;  %v3333_v38 = vmul.f32 %v3297_v34, %v6199_v29  ;;  %v3334_v1 = vmul.f32 %v3298_v39, %v6202_v50  ;;  %v3112_v15 = vmul.f32 %v3077_v2, %v6344_v20  ;;  %v3113_v55 = vmul.f32 %v3077_v2, %v6345_v4 }
 0x471   :  { %v3335_v57 = vmul.f32 %v3299_v56, %v6205_v7  ;;  %v3368_v8 = vadd.f32 %v3332_v32, %v6196_v62  ;;  %v3155_v61 = vmul.f32 %v5804_v10, %v3110_v53  ;;  %v3156_v28 = vmul.f32 %v5806_v41, %v3111_v14 }
 0x472   :  { %v3369_v27 = vadd.f32 %v3333_v38, %v6199_v29  ;;  %v3370_v0 = vadd.f32 %v3334_v1, %v6202_v50  ;;  %v3157_v35 = vmul.f32 %v5810_v63, %v3112_v15  ;;  %v3158_v24 = vmul.f32 %v5812_v25, %v3113_v55 }
 0x473   :  { %v3371_v37 = vadd.f32 %v3335_v57, %v6205_v7  ;;  %v3404_v33 = vmul.f32 0.7978846, %v3368_v8  ;;  %v3200_v5 = vadd.f32 %v5814_v11, %v3155_v61  ;;  %v3201_v51 = vadd.f32 %v5816_v40, %v3156_v28 }
 0x474   :  { %v3405_v48 = vmul.f32 0.7978846, %v3369_v27  ;;  %v3406_v47 = vmul.f32 0.7978846, %v3370_v0  ;;  %v3202_v10 = vadd.f32 %v5819_v18, %v3157_v35  ;;  %v6237_v41 = vadd.f32 %v5821_v21, %v3158_v24 }
 0x475   :  { %v3407_v22 = vmul.f32 0.7978846, %v3371_v37  ;;  %4953 = vtanh.f32 %v3404_v33  ;;  %v3272_v63 = vmul.f32 0.044715, %v3200_v5  ;;  %v3273_v25 = vmul.f32 0.044715, %v3201_v51 }
 0x476   :  { %4955 = vtanh.f32 %v3405_v48  ;;  %v3274_v19 = vmul.f32 0.044715, %v3202_v10  ;;  %v3275_v9 = vmul.f32 0.044715, %v6237_v41  ;;  %v3224_v21 = vmul.f32 0.5, %v6196_v62 }
 0x477   :  { %4957 = vtanh.f32 %v3406_v47  ;;  %v3308_v11 = vmul.f32 %v3272_v63, %v3200_v5  ;;  %v3309_v46 = vmul.f32 %v3273_v25, %v3201_v51  ;;  %v3226_v30 = vmul.f32 0.5, %v6202_v50 }
 0x478   :  { %4959 = vtanh.f32 %v3407_v22  ;;  %v3310_v40 = vmul.f32 %v3274_v19, %v3202_v10  ;;  %v3311_v26 = vmul.f32 %v3275_v9, %v6237_v41  ;;  %v3227_v62 = vmul.f32 0.5, %v6205_v7 }
 0x479   :  { %v3344_v44 = vmul.f32 %v3308_v11, %v3200_v5  ;;  %v3345_v12 = vmul.f32 %v3309_v46, %v3201_v51  ;;  %v3236_v53 = vmul.f32 0.5, %v3200_v5  ;;  %v3237_v38 = vmul.f32 0.5, %v3201_v51 }
 0x47a   :  { %v3346_v52 = vmul.f32 %v3310_v40, %v3202_v10  ;;  %v3347_v43 = vmul.f32 %v3311_v26, %v6237_v41  ;;  %v3238_v15 = vmul.f32 0.5, %v3202_v10  ;;  %v3239_v57 = vmul.f32 0.5, %v6237_v41 }
 0x47b   :  { %v4954_v18 = vpop.eup %4953  ;;  %v3380_v36 = vadd.f32 %v3344_v44, %v3200_v5  ;;  %v3381_v13 = vadd.f32 %v3345_v12, %v3201_v51 }
 0x47c   :  { %v4956_v58 = vpop.eup %4955  ;;  %v3476_v42 = vadd.f32 1.0, %v4954_v18  ;;  %v3382_v17 = vadd.f32 %v3346_v52, %v3202_v10  ;;  %v3383_v59 = vadd.f32 %v3347_v43, %v6237_v41 }
 0x47d   :  { %v4958_v45 = vpop.eup %4957  ;;  %v3477_v16 = vadd.f32 1.0, %v4956_v58  ;;  %v3416_v6 = vmul.f32 0.7978846, %v3380_v36  ;;  %v3417_v2 = vmul.f32 0.7978846, %v3381_v13 }
 0x47e   :  { %v4960_v60 = vpop.eup %4959  ;;  %v3478_v54 = vadd.f32 1.0, %v4958_v45  ;;  %v3512_v3 = vmul.f32 %v3476_v42, %v3224_v21  ;;  %v3418_v29 = vmul.f32 0.7978846, %v3382_v17  ;;  %v3419_v50 = vmul.f32 0.7978846, %v3383_v59 }
 0x47f   :  { %v3479_v34 = vadd.f32 1.0, %v4960_v60  ;;  %v3513_v39 = vmul.f32 %v3477_v16, %v3225_v23  ;;  %4961 = vtanh.f32 %v3416_v6 }
 0x480   :  { %v3514_v56 = vmul.f32 %v3478_v54, %v3226_v30  ;;  %3548 = vst [vmem:[#allocation10 + $0xa0] sm:$0xff] %v3512_v3  ;;  %4963 = vtanh.f32 %v3417_v2 }
 0x481   :  { %v3515_v32 = vmul.f32 %v3479_v34, %v3227_v62  ;;  %3549 = vst [vmem:[#allocation10 + $0xa8] sm:$0xff] %v3513_v39  ;;  %4965 = vtanh.f32 %v3418_v29 }
 0x482   :  { %3550 = vst [vmem:[#allocation10 + $0xb0] sm:$0xff] %v3514_v56  ;;  %4967 = vtanh.f32 %v3419_v50 }
 0x483   :  { %3551 = vst [vmem:[#allocation10 + $0xb8] sm:$0xff] %v3515_v32 }
 0x485   :  { %v4962_v31 = vpop.eup %4961 }
 0x486   :  { %v4964_v7 = vpop.eup %4963  ;;  %v3488_v49 = vadd.f32 1.0, %v4962_v31 }
 0x487   :  { %v4966_v14 = vpop.eup %4965  ;;  %v3489_v1 = vadd.f32 1.0, %v4964_v7 }
 0x488   :  { %v4968_v20 = vpop.eup %4967  ;;  %v3490_v4 = vadd.f32 1.0, %v4966_v14  ;;  %v3524_v55 = vmul.f32 %v3488_v49, %v3236_v53 }
 0x489   :  { %v3491_v8 = vadd.f32 1.0, %v4968_v20  ;;  %v3525_v61 = vmul.f32 %v3489_v1, %v3237_v38 }
 0x48a   :  { %v3526_v28 = vmul.f32 %v3490_v4, %v3238_v15  ;;  %3560 = vst [vmem:[#allocation10 + $0x100] sm:$0xf] %v3524_v55 }
 0x48b   :  { %v3527_v27 = vmul.f32 %v3491_v8, %v3239_v57  ;;  %3561 = vst [vmem:[#allocation10 + $0x108] sm:$0xf] %v3525_v61 }
 0x48c   :  { %3562 = vst [vmem:[#allocation10 + $0x110] sm:$0xf] %v3526_v28 }
 0x48d   :  { %3563 = vst [vmem:[#allocation10 + $0x118] sm:$0xf] %v3527_v27 }
 0x48e   :  { %3576 = dma.vmem_to_hbm [thread:$0]  %s3569_s3, 4608, %s3571_s13, [#allocation4], %s5107_s14, %s5107_s14, %s5108_s15  }
 0x48f   :  { %5095 = dma.done.wait [#allocation4], 4608  }
 0x490   :  { %5096 = vsyncadd [#allocation4], 4294962688 }
 0x491   :  { %3581 = vsyncpa [#allocation3], 1 }
 0x492   :  { %3582 = vsyncpa [#allocation6], 1 }
 0x493   :  { %3583 = vsyncpa [#allocation9], 1 }
 0x494   :  { %3584 = vsyncpa [#allocation4], 1 }

</bundles_post_ra>
